<compile_context>
chip_gen: v7x
topology: tpu7x:2x2x1
jax: 0.10.0
libtpu: 0.0.40
codegen_flags: <defaults>
</compile_context>

<pallas_src>
import functools

import jax
import jax.numpy as jnp
from jax.experimental import pallas as pl
from jax.experimental.pallas import tpu as pltpu


# ------------------------------------------------------------------ kernel ---
def _fused_matmul_kernel(a_ref, b_ref, s_ref, c_ref, o_ref, *, activation):
    """o = act( (a @ b) * s + c );  a,b bf16 on the MXU, f32 accumulate."""
    acc = jnp.dot(a_ref[...], b_ref[...], preferred_element_type=jnp.float32)
    y = acc * s_ref[...] + c_ref[...]          # per-output-channel scale/bias
    if activation == "relu":
        y = jnp.maximum(y, 0.0)
    elif activation == "sigmoid":
        y = 1.0 / (1.0 + jnp.exp(-y))
    o_ref[...] = y.astype(o_ref.dtype)


def _choose_tile_m(M):
    # Biggest slab that still yields >=2 grid tiles (so the 'parallel' grid
    # axis can use v7x's second TensorCore), capped at 512 rows.  With
    # K <= 864 the double-buffered working set stays ~2 MiB, well inside the
    # default scoped VMEM on v5e / v6e / v7x, so no vmem_limit_bytes needed.
    half = -(-M // 2)
    t = min(512, ((half + 7) // 8) * 8)
    return max(t, 8)


def fused_matmul_bn_act(a, b, scale, bias, activation):
    """a:(M,K) bf16, b:(K,N) bf16, scale/bias:(N,) f32 -> (M,N) bf16."""
    M, K = a.shape
    Kb, N = b.shape
    assert K == Kb
    tile = _choose_tile_m(M)
    Mp = pl.cdiv(M, tile) * tile
    if Mp != M:                      # single cheap pad of the patch matrix
        a = jnp.pad(a, ((0, Mp - M), (0, 0)))
    kernel = functools.partial(_fused_matmul_kernel, activation=activation)
    out = pl.pallas_call(
        kernel,
        out_shape=jax.ShapeDtypeStruct((Mp, N), jnp.bfloat16),
        grid=(Mp // tile,),
        in_specs=[
            pl.BlockSpec((tile, K), lambda i: (i, 0)),
            pl.BlockSpec((K, N), lambda i: (0, 0)),
            pl.BlockSpec((1, N), lambda i: (0, 0)),
            pl.BlockSpec((1, N), lambda i: (0, 0)),
        ],
        out_specs=pl.BlockSpec((tile, N), lambda i: (i, 0)),
        compiler_params=pltpu.CompilerParams(
            dimension_semantics=("parallel",)),
    )(a.astype(jnp.bfloat16), b.astype(jnp.bfloat16),
      scale.reshape(1, N).astype(jnp.float32),
      bias.reshape(1, N).astype(jnp.float32))
    return out[:M] if Mp != M else out


# ------------------------------------------------------------ layer helpers ---
def conv3d_fused(x, p, *, padding=0, activation="relu"):
    """x: (N,D,H,W,Cin) bf16; p['w']: (k,k,k,Cin,Cout) bf16.  Fused conv+BN+act."""
    w = p["w"]
    k = w.shape[0]
    cout = w.shape[-1]
    if padding:
        x = jnp.pad(x, ((0, 0), (padding, padding), (padding, padding),
                        (padding, padding), (0, 0)))
    N, D, H, W, C = x.shape
    Do, Ho, Wo = D - k + 1, H - k + 1, W - k + 1
    # im2col as XLA glue (patch tensors here are tiny: < 3 MiB in bf16).
    cols = []
    for a in range(k):
        for b in range(k):
            for c in range(k):
                cols.append(x[:, a:a + Do, b:b + Ho, c:c + Wo, :])
    pat = jnp.concatenate(cols, axis=-1).reshape(-1, k * k * k * C)
    y = fused_matmul_bn_act(pat, w.reshape(k * k * k * C, cout),
                            p["scale"], p["bias"], activation)
    return y.reshape(N, Do, Ho, Wo, cout)


def maxpool3d_k2s2(x):
    # nn.MaxPool3d(kernel_size=2): stride 2, no padding, floor mode.
    N, D, H, W, C = x.shape
    Do, Ho, Wo = D // 2, H // 2, W // 2
    x = x[:, :Do * 2, :Ho * 2, :Wo * 2, :]
    x = x.reshape(N, Do, 2, Ho, 2, Wo, 2, C)
    return x.max(axis=(2, 4, 6))


# ---------------------------------------------------------------- parameters ---
def _fold_bn(conv_bias, gamma, beta, mean, var, eps=1e-5):
    s = gamma / jnp.sqrt(var + eps)
    return s, (conv_bias - mean) * s + beta


def init_basenet_params(key, feature_depth):
    fd = feature_depth
    keys = jax.random.split(key, 8)

    def conv(kk, k, cin, cout, with_bn=True):
        fan_in = k * k * k * cin
        w = ((2.0 / fan_in) ** 0.5 *
             jax.random.normal(kk, (k, k, k, cin, cout), jnp.float32))
        b = 0.01 * jax.random.normal(jax.random.fold_in(kk, 1), (cout,),
                                     jnp.float32)
        if with_bn:
            # inference-mode BatchNorm3d defaults: gamma=1, beta=0,
            # running_mean=0, running_var=1  -> folded into scale/bias.
            scale, bias = _fold_bn(b, jnp.ones(cout), jnp.zeros(cout),
                                   jnp.zeros(cout), jnp.ones(cout))
        else:
            scale, bias = jnp.ones((cout,), jnp.float32), b
        return {"w": w.astype(jnp.bfloat16),
                "scale": scale.astype(jnp.float32),
                "bias": bias.astype(jnp.float32)}

    return {
        "conv1": conv(keys[0], 4, 1, fd[0]),
        "conv2": conv(keys[1], 3, fd[0], fd[1]),
        "conv3": conv(keys[2], 3, fd[1], fd[2]),
        "conv4": conv(keys[3], 3, fd[2], fd[3]),
        "att_conv": conv(keys[4], 3, 2, 1, with_bn=False),
        "fc_w": 0.1 * jax.random.normal(keys[5], (fd[3], 1), jnp.float32),
        "fc_b": jnp.zeros((1,), jnp.float32),
    }


# -------------------------------------------------------------------- forward ---
def basenet_forward(params, x_ncdhw):
    # NCDHW -> NDHWC, activations kept in bf16 (matches MXU operand dtype).
    x = jnp.transpose(x_ncdhw, (0, 2, 3, 4, 1)).astype(jnp.bfloat16)

    # self.features: each conv fused with (bias + BN + ReLU) in one kernel.
    x = conv3d_fused(x, params["conv1"])           # conv1 k=4 + norm1 + relu1
    x = conv3d_fused(x, params["conv2"])           # conv2 k=3 + norm2 + relu2
    x = maxpool3d_k2s2(x)                          # pool1
    x = conv3d_fused(x, params["conv3"])           # conv3 k=3 + norm3 + relu3
    lf = conv3d_fused(x, params["conv4"])          # conv4 k=3 + norm4 + relu4

    # ---- SpatialAttention ----
    avg = jnp.mean(lf.astype(jnp.float32), axis=-1, keepdims=True)
    mx = jnp.max(lf, axis=-1, keepdims=True).astype(jnp.float32)
    a_in = jnp.concatenate([avg, mx], axis=-1).astype(jnp.bfloat16)
    att = conv3d_fused(a_in, params["att_conv"], padding=1,
                       activation="sigmoid")       # Conv3d(2,1,k=3,p=1)+Sigmoid
    attended = lf.astype(jnp.float32) * att.astype(jnp.float32)

    # ---- classifier head ----
    pooled = jnp.mean(lf.astype(jnp.float32), axis=(1, 2, 3))  # adaptive_avg_pool3d((1,1,1))
    # TODO(synk): Dropout(p=0.3) is identity in inference mode; training-mode
    # stochastic dropout is not implemented.
    score = jax.nn.sigmoid(pooled @ params["fc_w"] + params["fc_b"])

    attended_ncdhw = jnp.transpose(attended, (0, 4, 1, 2, 3))   # back to NCDHW
    return attended_ncdhw, score


# ----------------------------------------------------------------------- main ---
if __name__ == "__main__":
    key = jax.random.PRNGKey(0)
    k_params, k_x = jax.random.split(key)

    feature_depth = (8, 16, 32, 64)
    params = init_basenet_params(k_params, feature_depth)

    # PyTorch-style NCDHW input: batch=2, channels=1, D=H=W=20.
    x = jax.random.normal(k_x, (2, 1, 20, 20, 20), dtype=jnp.float32)

    fwd = jax.jit(basenet_forward)
    attended, score = fwd(params, x)
    attended, score = jax.block_until_ready((attended, score))

    assert attended.shape == (2, feature_depth[3], 3, 3, 3)
    assert attended.dtype == jnp.float32
    assert score.shape == (2, 1) and score.dtype == jnp.float32
    assert bool(jnp.all((score >= 0.0) & (score <= 1.0)))
    print("KERNEL_OK")
</pallas_src>

<mosaic_0001>
module attributes {stable_mosaic.version = 11 : i64} {
  func.func @_fused_matmul_kernel(%arg0: i32, %arg1: memref<512x64xbf16, #tpu.memory_space<vmem>>, %arg2: memref<64x8xbf16, #tpu.memory_space<vmem>>, %arg3: memref<1x8xf32, #tpu.memory_space<vmem>>, %arg4: memref<1x8xf32, #tpu.memory_space<vmem>>, %arg5: memref<512x8xbf16, #tpu.memory_space<vmem>>) attributes {dimension_semantics = [#tpu.dimension_semantics<parallel>], iteration_bounds = array<i64: 20>, scalar_prefetch = 0 : i64, scratch_operands = 0 : i64, tpu.core_type = #tpu.core_type<tc>, window_params = [{transform_indices = @transform_0, window_bounds = array<i64: 512, 64>}, {pipeline_mode = #tpu.pipeline_mode<synchronous>, transform_indices = @transform_1, window_bounds = array<i64: 64, 8>}, {pipeline_mode = #tpu.pipeline_mode<synchronous>, transform_indices = @transform_2, window_bounds = array<i64: 1, 8>}, {pipeline_mode = #tpu.pipeline_mode<synchronous>, transform_indices = @transform_3, window_bounds = array<i64: 1, 8>}, {transform_indices = @transform_4, window_bounds = array<i64: 512, 8>}]} {
    %c0 = arith.constant 0 : index
    %c0_0 = arith.constant 0 : index
    %0 = vector.load %arg1[%c0, %c0_0] : memref<512x64xbf16, #tpu.memory_space<vmem>>, vector<512x64xbf16>
    %c0_1 = arith.constant 0 : index
    %c0_2 = arith.constant 0 : index
    %1 = vector.load %arg2[%c0_1, %c0_2] : memref<64x8xbf16, #tpu.memory_space<vmem>>, vector<64x8xbf16>
    %cst = arith.constant dense<0.000000e+00> : vector<512x8xf32>
    %2 = tpu.matmul %0, %1, %cst {dimension_numbers = #tpu.dot_dimension_numbers<[1], [0], [0], [1], [0, 0, 1, 1], [], []>} : vector<512x64xbf16>, vector<64x8xbf16>, vector<512x8xf32> -> vector<512x8xf32>
    %c0_3 = arith.constant 0 : index
    %c0_4 = arith.constant 0 : index
    %3 = vector.load %arg3[%c0_3, %c0_4] : memref<1x8xf32, #tpu.memory_space<vmem>>, vector<1x8xf32>
    %4 = vector.broadcast %3 : vector<1x8xf32> to vector<512x8xf32>
    %5 = arith.mulf %2, %4 : vector<512x8xf32>
    %c0_5 = arith.constant 0 : index
    %c0_6 = arith.constant 0 : index
    %6 = vector.load %arg4[%c0_5, %c0_6] : memref<1x8xf32, #tpu.memory_space<vmem>>, vector<1x8xf32>
    %7 = vector.broadcast %6 : vector<1x8xf32> to vector<512x8xf32>
    %8 = arith.addf %5, %7 : vector<512x8xf32>
    %cst_7 = arith.constant 0.000000e+00 : f32
    %9 = vector.broadcast %cst_7 : f32 to vector<512x8xf32>
    %10 = arith.maximumf %8, %9 : vector<512x8xf32>
    %11 = arith.truncf %10 : vector<512x8xf32> to vector<512x8xbf16>
    %c0_8 = arith.constant 0 : index
    %c0_9 = arith.constant 0 : index
    %12 = vector.load %arg5[%c0_8, %c0_9] : memref<512x8xbf16, #tpu.memory_space<vmem>>, vector<512x8xbf16>
    tpu.vector_store %arg5[%c0_8, %c0_9], %11 {strides = array<i32>} : memref<512x8xbf16, #tpu.memory_space<vmem>>, vector<512x8xbf16>,
    return
  }
  func.func @transform_0(%arg0: i32) -> (i32, i32) {
    %c0_i32 = arith.constant 0 : i32
    %c0_i32_0 = arith.constant 0 : i32
    return %arg0, %c0_i32 : i32, i32
  }
  func.func @transform_1(%arg0: i32) -> (i32, i32) {
    %c0_i32 = arith.constant 0 : i32
    %c0_i32_0 = arith.constant 0 : i32
    %c0_i32_1 = arith.constant 0 : i32
    return %c0_i32, %c0_i32_0 : i32, i32
  }
  func.func @transform_2(%arg0: i32) -> (i32, i32) {
    %c0_i32 = arith.constant 0 : i32
    %c0_i32_0 = arith.constant 0 : i32
    %c0_i32_1 = arith.constant 0 : i32
    return %c0_i32, %c0_i32_0 : i32, i32
  }
  func.func @transform_3(%arg0: i32) -> (i32, i32) {
    %c0_i32 = arith.constant 0 : i32
    %c0_i32_0 = arith.constant 0 : i32
    %c0_i32_1 = arith.constant 0 : i32
    return %c0_i32, %c0_i32_0 : i32, i32
  }
  func.func @transform_4(%arg0: i32) -> (i32, i32) {
    %c0_i32 = arith.constant 0 : i32
    %c0_i32_0 = arith.constant 0 : i32
    return %arg0, %c0_i32 : i32, i32
  }
}

module attributes {stable_mosaic.version = 11 : i64} {
  func.func @_fused_matmul_kernel(%arg0: i32, %arg1: memref<512x216xbf16, #tpu.memory_space<vmem>>, %arg2: memref<216x16xbf16, #tpu.memory_space<vmem>>, %arg3: memref<1x16xf32, #tpu.memory_space<vmem>>, %arg4: memref<1x16xf32, #tpu.memory_space<vmem>>, %arg5: memref<512x16xbf16, #tpu.memory_space<vmem>>) attributes {dimension_semantics = [#tpu.dimension_semantics<parallel>], iteration_bounds = array<i64: 14>, scalar_prefetch = 0 : i64, scratch_operands = 0 : i64, tpu.core_type = #tpu.core_type<tc>, window_params = [{transform_indices = @transform_0, window_bounds = array<i64: 512, 216>}, {pipeline_mode = #tpu.pipeline_mode<synchronous>, transform_indices = @transform_1, window_bounds = array<i64: 216, 16>}, {pipeline_mode = #tpu.pipeline_mode<synchronous>, transform_indices = @transform_2, window_bounds = array<i64: 1, 16>}, {pipeline_mode = #tpu.pipeline_mode<synchronous>, transform_indices = @transform_3, window_bounds = array<i64: 1, 16>}, {transform_indices = @transform_4, window_bounds = array<i64: 512, 16>}]} {
    %c0 = arith.constant 0 : index
    %c0_0 = arith.constant 0 : index
    %0 = vector.load %arg1[%c0, %c0_0] : memref<512x216xbf16, #tpu.memory_space<vmem>>, vector<512x216xbf16>
    %c0_1 = arith.constant 0 : index
    %c0_2 = arith.constant 0 : index
    %1 = vector.load %arg2[%c0_1, %c0_2] : memref<216x16xbf16, #tpu.memory_space<vmem>>, vector<216x16xbf16>
    %cst = arith.constant dense<0.000000e+00> : vector<512x16xf32>
    %2 = tpu.matmul %0, %1, %cst {dimension_numbers = #tpu.dot_dimension_numbers<[1], [0], [0], [1], [0, 0, 1, 1], [], []>} : vector<512x216xbf16>, vector<216x16xbf16>, vector<512x16xf32> -> vector<512x16xf32>
    %c0_3 = arith.constant 0 : index
    %c0_4 = arith.constant 0 : index
    %3 = vector.load %arg3[%c0_3, %c0_4] : memref<1x16xf32, #tpu.memory_space<vmem>>, vector<1x16xf32>
    %4 = vector.broadcast %3 : vector<1x16xf32> to vector<512x16xf32>
    %5 = arith.mulf %2, %4 : vector<512x16xf32>
    %c0_5 = arith.constant 0 : index
    %c0_6 = arith.constant 0 : index
    %6 = vector.load %arg4[%c0_5, %c0_6] : memref<1x16xf32, #tpu.memory_space<vmem>>, vector<1x16xf32>
    %7 = vector.broadcast %6 : vector<1x16xf32> to vector<512x16xf32>
    %8 = arith.addf %5, %7 : vector<512x16xf32>
    %cst_7 = arith.constant 0.000000e+00 : f32
    %9 = vector.broadcast %cst_7 : f32 to vector<512x16xf32>
    %10 = arith.maximumf %8, %9 : vector<512x16xf32>
    %11 = arith.truncf %10 : vector<512x16xf32> to vector<512x16xbf16>
    %c0_8 = arith.constant 0 : index
    %c0_9 = arith.constant 0 : index
    %12 = vector.load %arg5[%c0_8, %c0_9] : memref<512x16xbf16, #tpu.memory_space<vmem>>, vector<512x16xbf16>
    tpu.vector_store %arg5[%c0_8, %c0_9], %11 {strides = array<i32>} : memref<512x16xbf16, #tpu.memory_space<vmem>>, vector<512x16xbf16>,
    return
  }
  func.func @transform_0(%arg0: i32) -> (i32, i32) {
    %c0_i32 = arith.constant 0 : i32
    %c0_i32_0 = arith.constant 0 : i32
    return %arg0, %c0_i32 : i32, i32
  }
  func.func @transform_1(%arg0: i32) -> (i32, i32) {
    %c0_i32 = arith.constant 0 : i32
    %c0_i32_0 = arith.constant 0 : i32
    %c0_i32_1 = arith.constant 0 : i32
    return %c0_i32, %c0_i32_0 : i32, i32
  }
  func.func @transform_2(%arg0: i32) -> (i32, i32) {
    %c0_i32 = arith.constant 0 : i32
    %c0_i32_0 = arith.constant 0 : i32
    %c0_i32_1 = arith.constant 0 : i32
    return %c0_i32, %c0_i32_0 : i32, i32
  }
  func.func @transform_3(%arg0: i32) -> (i32, i32) {
    %c0_i32 = arith.constant 0 : i32
    %c0_i32_0 = arith.constant 0 : i32
    %c0_i32_1 = arith.constant 0 : i32
    return %c0_i32, %c0_i32_0 : i32, i32
  }
  func.func @transform_4(%arg0: i32) -> (i32, i32) {
    %c0_i32 = arith.constant 0 : i32
    %c0_i32_0 = arith.constant 0 : i32
    return %arg0, %c0_i32 : i32, i32
  }
}

module attributes {stable_mosaic.version = 11 : i64} {
  func.func @_fused_matmul_kernel(%arg0: i32, %arg1: memref<128x432xbf16, #tpu.memory_space<vmem>>, %arg2: memref<432x32xbf16, #tpu.memory_space<vmem>>, %arg3: memref<1x32xf32, #tpu.memory_space<vmem>>, %arg4: memref<1x32xf32, #tpu.memory_space<vmem>>, %arg5: memref<128x32xbf16, #tpu.memory_space<vmem>>) attributes {dimension_semantics = [#tpu.dimension_semantics<parallel>], iteration_bounds = array<i64: 2>, scalar_prefetch = 0 : i64, scratch_operands = 0 : i64, tpu.core_type = #tpu.core_type<tc>, window_params = [{transform_indices = @transform_0, window_bounds = array<i64: 128, 432>}, {pipeline_mode = #tpu.pipeline_mode<synchronous>, transform_indices = @transform_1, window_bounds = array<i64: 432, 32>}, {pipeline_mode = #tpu.pipeline_mode<synchronous>, transform_indices = @transform_2, window_bounds = array<i64: 1, 32>}, {pipeline_mode = #tpu.pipeline_mode<synchronous>, transform_indices = @transform_3, window_bounds = array<i64: 1, 32>}, {transform_indices = @transform_4, window_bounds = array<i64: 128, 32>}]} {
    %c0 = arith.constant 0 : index
    %c0_0 = arith.constant 0 : index
    %0 = vector.load %arg1[%c0, %c0_0] : memref<128x432xbf16, #tpu.memory_space<vmem>>, vector<128x432xbf16>
    %c0_1 = arith.constant 0 : index
    %c0_2 = arith.constant 0 : index
    %1 = vector.load %arg2[%c0_1, %c0_2] : memref<432x32xbf16, #tpu.memory_space<vmem>>, vector<432x32xbf16>
    %cst = arith.constant dense<0.000000e+00> : vector<128x32xf32>
    %2 = tpu.matmul %0, %1, %cst {dimension_numbers = #tpu.dot_dimension_numbers<[1], [0], [0], [1], [0, 0, 1, 1], [], []>} : vector<128x432xbf16>, vector<432x32xbf16>, vector<128x32xf32> -> vector<128x32xf32>
    %c0_3 = arith.constant 0 : index
    %c0_4 = arith.constant 0 : index
    %3 = vector.load %arg3[%c0_3, %c0_4] : memref<1x32xf32, #tpu.memory_space<vmem>>, vector<1x32xf32>
    %4 = vector.broadcast %3 : vector<1x32xf32> to vector<128x32xf32>
    %5 = arith.mulf %2, %4 : vector<128x32xf32>
    %c0_5 = arith.constant 0 : index
    %c0_6 = arith.constant 0 : index
    %6 = vector.load %arg4[%c0_5, %c0_6] : memref<1x32xf32, #tpu.memory_space<vmem>>, vector<1x32xf32>
    %7 = vector.broadcast %6 : vector<1x32xf32> to vector<128x32xf32>
    %8 = arith.addf %5, %7 : vector<128x32xf32>
    %cst_7 = arith.constant 0.000000e+00 : f32
    %9 = vector.broadcast %cst_7 : f32 to vector<128x32xf32>
    %10 = arith.maximumf %8, %9 : vector<128x32xf32>
    %11 = arith.truncf %10 : vector<128x32xf32> to vector<128x32xbf16>
    %c0_8 = arith.constant 0 : index
    %c0_9 = arith.constant 0 : index
    %12 = vector.load %arg5[%c0_8, %c0_9] : memref<128x32xbf16, #tpu.memory_space<vmem>>, vector<128x32xbf16>
    tpu.vector_store %arg5[%c0_8, %c0_9], %11 {strides = array<i32>} : memref<128x32xbf16, #tpu.memory_space<vmem>>, vector<128x32xbf16>,
    return
  }
  func.func @transform_0(%arg0: i32) -> (i32, i32) {
    %c0_i32 = arith.constant 0 : i32
    %c0_i32_0 = arith.constant 0 : i32
    return %arg0, %c0_i32 : i32, i32
  }
  func.func @transform_1(%arg0: i32) -> (i32, i32) {
    %c0_i32 = arith.constant 0 : i32
    %c0_i32_0 = arith.constant 0 : i32
    %c0_i32_1 = arith.constant 0 : i32
    return %c0_i32, %c0_i32_0 : i32, i32
  }
  func.func @transform_2(%arg0: i32) -> (i32, i32) {
    %c0_i32 = arith.constant 0 : i32
    %c0_i32_0 = arith.constant 0 : i32
    %c0_i32_1 = arith.constant 0 : i32
    return %c0_i32, %c0_i32_0 : i32, i32
  }
  func.func @transform_3(%arg0: i32) -> (i32, i32) {
    %c0_i32 = arith.constant 0 : i32
    %c0_i32_0 = arith.constant 0 : i32
    %c0_i32_1 = arith.constant 0 : i32
    return %c0_i32, %c0_i32_0 : i32, i32
  }
  func.func @transform_4(%arg0: i32) -> (i32, i32) {
    %c0_i32 = arith.constant 0 : i32
    %c0_i32_0 = arith.constant 0 : i32
    return %arg0, %c0_i32 : i32, i32
  }
}

module attributes {stable_mosaic.version = 11 : i64} {
  func.func @_fused_matmul_kernel(%arg0: i32, %arg1: memref<32x864xbf16, #tpu.memory_space<vmem>>, %arg2: memref<864x64xbf16, #tpu.memory_space<vmem>>, %arg3: memref<1x64xf32, #tpu.memory_space<vmem>>, %arg4: memref<1x64xf32, #tpu.memory_space<vmem>>, %arg5: memref<32x64xbf16, #tpu.memory_space<vmem>>) attributes {dimension_semantics = [#tpu.dimension_semantics<parallel>], iteration_bounds = array<i64: 2>, scalar_prefetch = 0 : i64, scratch_operands = 0 : i64, tpu.core_type = #tpu.core_type<tc>, window_params = [{transform_indices = @transform_0, window_bounds = array<i64: 32, 864>}, {pipeline_mode = #tpu.pipeline_mode<synchronous>, transform_indices = @transform_1, window_bounds = array<i64: 864, 64>}, {pipeline_mode = #tpu.pipeline_mode<synchronous>, transform_indices = @transform_2, window_bounds = array<i64: 1, 64>}, {pipeline_mode = #tpu.pipeline_mode<synchronous>, transform_indices = @transform_3, window_bounds = array<i64: 1, 64>}, {transform_indices = @transform_4, window_bounds = array<i64: 32, 64>}]} {
    %c0 = arith.constant 0 : index
    %c0_0 = arith.constant 0 : index
    %0 = vector.load %arg1[%c0, %c0_0] : memref<32x864xbf16, #tpu.memory_space<vmem>>, vector<32x864xbf16>
    %c0_1 = arith.constant 0 : index
    %c0_2 = arith.constant 0 : index
    %1 = vector.load %arg2[%c0_1, %c0_2] : memref<864x64xbf16, #tpu.memory_space<vmem>>, vector<864x64xbf16>
    %cst = arith.constant dense<0.000000e+00> : vector<32x64xf32>
    %2 = tpu.matmul %0, %1, %cst {dimension_numbers = #tpu.dot_dimension_numbers<[1], [0], [0], [1], [0, 0, 1, 1], [], []>} : vector<32x864xbf16>, vector<864x64xbf16>, vector<32x64xf32> -> vector<32x64xf32>
    %c0_3 = arith.constant 0 : index
    %c0_4 = arith.constant 0 : index
    %3 = vector.load %arg3[%c0_3, %c0_4] : memref<1x64xf32, #tpu.memory_space<vmem>>, vector<1x64xf32>
    %4 = vector.broadcast %3 : vector<1x64xf32> to vector<32x64xf32>
    %5 = arith.mulf %2, %4 : vector<32x64xf32>
    %c0_5 = arith.constant 0 : index
    %c0_6 = arith.constant 0 : index
    %6 = vector.load %arg4[%c0_5, %c0_6] : memref<1x64xf32, #tpu.memory_space<vmem>>, vector<1x64xf32>
    %7 = vector.broadcast %6 : vector<1x64xf32> to vector<32x64xf32>
    %8 = arith.addf %5, %7 : vector<32x64xf32>
    %cst_7 = arith.constant 0.000000e+00 : f32
    %9 = vector.broadcast %cst_7 : f32 to vector<32x64xf32>
    %10 = arith.maximumf %8, %9 : vector<32x64xf32>
    %11 = arith.truncf %10 : vector<32x64xf32> to vector<32x64xbf16>
    %c0_8 = arith.constant 0 : index
    %c0_9 = arith.constant 0 : index
    %12 = vector.load %arg5[%c0_8, %c0_9] : memref<32x64xbf16, #tpu.memory_space<vmem>>, vector<32x64xbf16>
    tpu.vector_store %arg5[%c0_8, %c0_9], %11 {strides = array<i32>} : memref<32x64xbf16, #tpu.memory_space<vmem>>, vector<32x64xbf16>,
    return
  }
  func.func @transform_0(%arg0: i32) -> (i32, i32) {
    %c0_i32 = arith.constant 0 : i32
    %c0_i32_0 = arith.constant 0 : i32
    return %arg0, %c0_i32 : i32, i32
  }
  func.func @transform_1(%arg0: i32) -> (i32, i32) {
    %c0_i32 = arith.constant 0 : i32
    %c0_i32_0 = arith.constant 0 : i32
    %c0_i32_1 = arith.constant 0 : i32
    return %c0_i32, %c0_i32_0 : i32, i32
  }
  func.func @transform_2(%arg0: i32) -> (i32, i32) {
    %c0_i32 = arith.constant 0 : i32
    %c0_i32_0 = arith.constant 0 : i32
    %c0_i32_1 = arith.constant 0 : i32
    return %c0_i32, %c0_i32_0 : i32, i32
  }
  func.func @transform_3(%arg0: i32) -> (i32, i32) {
    %c0_i32 = arith.constant 0 : i32
    %c0_i32_0 = arith.constant 0 : i32
    %c0_i32_1 = arith.constant 0 : i32
    return %c0_i32, %c0_i32_0 : i32, i32
  }
  func.func @transform_4(%arg0: i32) -> (i32, i32) {
    %c0_i32 = arith.constant 0 : i32
    %c0_i32_0 = arith.constant 0 : i32
    return %arg0, %c0_i32 : i32, i32
  }
}

module attributes {stable_mosaic.version = 11 : i64} {
  func.func @_fused_matmul_kernel(%arg0: i32, %arg1: memref<32x54xbf16, #tpu.memory_space<vmem>>, %arg2: memref<54x1xbf16, #tpu.memory_space<vmem>>, %arg3: memref<1x1xf32, #tpu.memory_space<vmem>>, %arg4: memref<1x1xf32, #tpu.memory_space<vmem>>, %arg5: memref<32x1xbf16, #tpu.memory_space<vmem>>) attributes {dimension_semantics = [#tpu.dimension_semantics<parallel>], iteration_bounds = array<i64: 2>, scalar_prefetch = 0 : i64, scratch_operands = 0 : i64, tpu.core_type = #tpu.core_type<tc>, window_params = [{transform_indices = @transform_0, window_bounds = array<i64: 32, 54>}, {pipeline_mode = #tpu.pipeline_mode<synchronous>, transform_indices = @transform_1, window_bounds = array<i64: 54, 1>}, {pipeline_mode = #tpu.pipeline_mode<synchronous>, transform_indices = @transform_2, window_bounds = array<i64: 1, 1>}, {pipeline_mode = #tpu.pipeline_mode<synchronous>, transform_indices = @transform_3, window_bounds = array<i64: 1, 1>}, {transform_indices = @transform_4, window_bounds = array<i64: 32, 1>}]} {
    %c0 = arith.constant 0 : index
    %c0_0 = arith.constant 0 : index
    %0 = vector.load %arg1[%c0, %c0_0] : memref<32x54xbf16, #tpu.memory_space<vmem>>, vector<32x54xbf16>
    %c0_1 = arith.constant 0 : index
    %c0_2 = arith.constant 0 : index
    %1 = vector.load %arg2[%c0_1, %c0_2] : memref<54x1xbf16, #tpu.memory_space<vmem>>, vector<54x1xbf16>
    %cst = arith.constant dense<0.000000e+00> : vector<32x1xf32>
    %2 = tpu.matmul %0, %1, %cst {dimension_numbers = #tpu.dot_dimension_numbers<[1], [0], [0], [1], [0, 0, 1, 1], [], []>} : vector<32x54xbf16>, vector<54x1xbf16>, vector<32x1xf32> -> vector<32x1xf32>
    %c0_3 = arith.constant 0 : index
    %c0_4 = arith.constant 0 : index
    %3 = vector.load %arg3[%c0_3, %c0_4] : memref<1x1xf32, #tpu.memory_space<vmem>>, vector<1x1xf32>
    %4 = vector.broadcast %3 : vector<1x1xf32> to vector<32x1xf32>
    %5 = arith.mulf %2, %4 : vector<32x1xf32>
    %c0_5 = arith.constant 0 : index
    %c0_6 = arith.constant 0 : index
    %6 = vector.load %arg4[%c0_5, %c0_6] : memref<1x1xf32, #tpu.memory_space<vmem>>, vector<1x1xf32>
    %7 = vector.broadcast %6 : vector<1x1xf32> to vector<32x1xf32>
    %8 = arith.addf %5, %7 : vector<32x1xf32>
    %cst_7 = arith.constant 0.000000e+00 : f32
    %9 = vector.broadcast %cst_7 : f32 to vector<32x1xf32>
    %10 = arith.subf %9, %8 : vector<32x1xf32>
    %11 = math.exp %10 : vector<32x1xf32>
    %cst_8 = arith.constant 1.000000e+00 : f32
    %12 = vector.broadcast %cst_8 : f32 to vector<32x1xf32>
    %13 = arith.addf %12, %11 : vector<32x1xf32>
    %cst_9 = arith.constant 1.000000e+00 : f32
    %14 = vector.broadcast %cst_9 : f32 to vector<32x1xf32>
    %15 = arith.divf %14, %13 : vector<32x1xf32>
    %16 = arith.truncf %15 : vector<32x1xf32> to vector<32x1xbf16>
    %c0_10 = arith.constant 0 : index
    %c0_11 = arith.constant 0 : index
    %17 = vector.load %arg5[%c0_10, %c0_11] : memref<32x1xbf16, #tpu.memory_space<vmem>>, vector<32x1xbf16>
    tpu.vector_store %arg5[%c0_10, %c0_11], %16 {strides = array<i32>} : memref<32x1xbf16, #tpu.memory_space<vmem>>, vector<32x1xbf16>,
    return
  }
  func.func @transform_0(%arg0: i32) -> (i32, i32) {
    %c0_i32 = arith.constant 0 : i32
    %c0_i32_0 = arith.constant 0 : i32
    return %arg0, %c0_i32 : i32, i32
  }
  func.func @transform_1(%arg0: i32) -> (i32, i32) {
    %c0_i32 = arith.constant 0 : i32
    %c0_i32_0 = arith.constant 0 : i32
    %c0_i32_1 = arith.constant 0 : i32
    return %c0_i32, %c0_i32_0 : i32, i32
  }
  func.func @transform_2(%arg0: i32) -> (i32, i32) {
    %c0_i32 = arith.constant 0 : i32
    %c0_i32_0 = arith.constant 0 : i32
    %c0_i32_1 = arith.constant 0 : i32
    return %c0_i32, %c0_i32_0 : i32, i32
  }
  func.func @transform_3(%arg0: i32) -> (i32, i32) {
    %c0_i32 = arith.constant 0 : i32
    %c0_i32_0 = arith.constant 0 : i32
    %c0_i32_1 = arith.constant 0 : i32
    return %c0_i32, %c0_i32_0 : i32, i32
  }
  func.func @transform_4(%arg0: i32) -> (i32, i32) {
    %c0_i32 = arith.constant 0 : i32
    %c0_i32_0 = arith.constant 0 : i32
    return %arg0, %c0_i32 : i32, i32
  }
}

</mosaic_0001>

<bundles_post_ra>
// kernel: basenet_forward.5
= control target key start
LH: loop header
LB: loop body
LE: loop exit
PB: predicated region body
PF: predicated region fallthrough
CT: control target
= control target key end

     0   :  { %s1829_s15 = smov 0   ;;  %s2199_s0 = inlined_call_operand.vmem [shape: bf16[10240,64], index: 0, kind: input, shape index: {}]   ;;  %s2200_s1 = inlined_call_operand.vmem [shape: bf16[64,8], index: 1, kind: input, shape index: {}]   ;;  %s2201_s2 = inlined_call_operand.vmem [shape: f32[1,8], index: 2, kind: input, shape index: {}]   ;;  %s2202_s3 = inlined_call_operand.vmem [shape: f32[1,8], index: 3, kind: input, shape index: {}]   ;;  %s2203_s4 = inlined_call_operand.vmem [shape: bf16[10240,8], index: 4, kind: output, shape index: {}]  }
   0x1 LB: > { %s1427_s16 = sadd.s32 4294967295, %s1802_s15   ;;  %p1431_p0 = scmp.ge.s32.totalorder %s1802_s15, 1  ;;  %s1802_s15 = sphi %s1829_s15, %s14_s15  }
   0x2   : > { %p163_p1 = scmp.lt.s32.totalorder %s1802_s15, 21 }
   0x4   : > { %p164_p2 = pnand %p1431_p0, %p163_p1 }
   0x5   : > { %v1760_v0 = vld [vmem:[%s2200_s1] sm:$0xff] (!%p164_p2)   ;;  %s1432_s19 = sshll.u32 (!%p164_p2), %s1427_s16, 6  ;;  %v1761_v1 = vld [vmem:[%s2200_s1 + $0x8] sm:$0xff] (!%p164_p2)   ;;  %v1762_v2 = vld [vmem:[%s2200_s1 + $0x10] sm:$0xff] (!%p164_p2)   ;;  %vm458_vm0 = vcmask (!%p164_p2), 523264   ;;  %vm1306_vm1 = vcmask (!%p164_p2), 60416  }
   0x6   : > { %167 = sbr.rel (%p164_p2) target bundleno = 309 (0x135), region = 36  ;;  %p190_p3 = scmp.lt.s32.totalorder (!%p164_p2), %s1432_s19, 1279  ;;  %1672 = vmatprep.subr.bf16.mxu0 (!%p164_p2), %v1760_v0  ;;  %1744 = vmatprep.subr.bf16.mxu1 (!%p164_p2), %v1760_v0  ;;  %v1763_v3 = vld [vmem:[%s2200_s1 + $0x18] sm:$0xff] (!%p164_p2)   ;;  %v1926_v36 = vld [vmem:[%s2201_s2] ss:$0 sm:$0xff] (!%p164_p2) }
   0x7   : > { %1673 = vmatpush3.bf16.msra.mxu0 (!%p164_p2), %v1760_v0  ;;  %1748 = vmatpush3.bf16.msra.mxu1 (!%p164_p2), %v1760_v0  ;;  %v1931_v38 = vld [vmem:[%s2202_s3] ss:$0 sm:$0xff] (!%p164_p2) }
   0x8   : > { %1674 = vmatprep.subr.bf16.mxu0 (!%p164_p2), %v1761_v1  ;;  %1745 = vmatprep.subr.bf16.mxu1 (!%p164_p2), %v1761_v1 }
   0xb   : > { %1675 = vmatpush3.bf16.msra.mxu0 (!%p164_p2), %v1761_v1  ;;  %1749 = vmatpush3.bf16.msra.mxu1 (!%p164_p2), %v1761_v1 }
   0xc   : > { %1676 = vmatprep.subr.bf16.mxu0 (!%p164_p2), %v1762_v2  ;;  %1746 = vmatprep.subr.bf16.mxu1 (!%p164_p2), %v1762_v2 }
   0xd   : > { %s2205_s19 = smov (!%p190_p3, %s1432_s19), 1279 }
   0xe   : > { %s1433_s24 = sshll.u32 %s2205_s19, 2 }
   0xf   : > { %s1857_s29 = scalar_lea.vmem %s2199_s0, %s1433_s24  ;;  %1677 = vmatpush3.bf16.msra.mxu0 %v1762_v2  ;;  %1750 = vmatpush3.bf16.msra.mxu1 %v1762_v2  ;;  %s1952_s10 = scalar_lea.vmem %s2203_s4, %s1433_s24 }
  0x10   : > { %v1764_v4 = vld [vmem:[%s1857_s29] sm:$0xff]   ;;  %1678 = vmatprep.subr.bf16.mxu0 %v1763_v3  ;;  %1747 = vmatprep.subr.bf16.mxu1 %v1763_v3  ;;  %v1766_v6 = vld [vmem:[%s1857_s29 + $0x8] sm:$0xff]   ;;  %v1768_v8 = vld [vmem:[%s1857_s29 + $0x10] sm:$0xff]  }
  0x11   : > { %v1765_v5 = vld [vmem:[%s1857_s29 + $0x80] sm:$0xff]   ;;  %1680 = vmatprep.mubr.msk.bf16.mxu0 %vm458_vm0, %v1764_v4  ;;  %v1767_v7 = vld [vmem:[%s1857_s29 + $0x88] sm:$0xff]   ;;  %v1769_v9 = vld [vmem:[%s1857_s29 + $0x90] sm:$0xff]  }
  0x12   : > { %1712 = vmatprep.mubr.msk.bf16.mxu1 %vm458_vm0, %v1765_v5  ;;  %v1770_v10 = vld [vmem:[%s1857_s29 + $0x18] sm:$0xff]   ;;  %v1772_v12 = vld [vmem:[%s1857_s29 + $0x20] sm:$0xff]   ;;  %v1774_v14 = vld [vmem:[%s1857_s29 + $0x28] sm:$0xff]  }
  0x13   : > { %1679 = vmatpush3.bf16.msra.mxu0 %v1763_v3  ;;  %1751 = vmatpush3.bf16.msra.mxu1 %v1763_v3  ;;  %v1771_v11 = vld [vmem:[%s1857_s29 + $0x98] sm:$0xff]   ;;  %v1773_v13 = vld [vmem:[%s1857_s29 + $0xa0] sm:$0xff]   ;;  %v1775_v15 = vld [vmem:[%s1857_s29 + $0xa8] sm:$0xff]  }
  0x14   : > { %v1776_v16 = vld [vmem:[%s1857_s29 + $0x30] sm:$0xff]   ;;  %v1778_v18 = vld [vmem:[%s1857_s29 + $0x38] sm:$0xff]   ;;  %v1780_v20 = vld [vmem:[%s1857_s29 + $0x40] sm:$0xff]  }
  0x15   : > { %v1777_v17 = vld [vmem:[%s1857_s29 + $0xb0] sm:$0xff]   ;;  %v1779_v19 = vld [vmem:[%s1857_s29 + $0xb8] sm:$0xff]   ;;  %v1781_v21 = vld [vmem:[%s1857_s29 + $0xc0] sm:$0xff]  }
  0x16   : > { %1681 = vmatmul.mubr.msk.bf16.vlgmr.msra.gmra.mrb[0].mxu0 %vm458_vm0, %v1766_v6  ;;  %1713 = vmatmul.mubr.msk.bf16.vlgmr.msra.gmra.mrb[0].mxu1 %vm458_vm0, %v1767_v7  ;;  %v1782_v22 = vld [vmem:[%s1857_s29 + $0x48] sm:$0xff]   ;;  %v1784_v24 = vld [vmem:[%s1857_s29 + $0x50] sm:$0xff]   ;;  %v1786_v26 = vld [vmem:[%s1857_s29 + $0x58] sm:$0xff]  }
  0x17   : > { %1684 = vmatprep.mubr.msk.bf16.mxu0 %vm458_vm0, %v1768_v8  ;;  %1716 = vmatprep.mubr.msk.bf16.mxu1 %vm458_vm0, %v1769_v9  ;;  %v1783_v23 = vld [vmem:[%s1857_s29 + $0xc8] sm:$0xff]   ;;  %v1785_v25 = vld [vmem:[%s1857_s29 + $0xd0] sm:$0xff]   ;;  %v1787_v27 = vld [vmem:[%s1857_s29 + $0xd8] sm:$0xff]  }
  0x18   : > { %v1788_v28 = vld [vmem:[%s1857_s29 + $0x60] sm:$0xff]   ;;  %v1790_v30 = vld [vmem:[%s1857_s29 + $0x68] sm:$0xff]   ;;  %v1792_v32 = vld [vmem:[%s1857_s29 + $0x70] sm:$0xff]  }
  0x19   : > { %v1789_v29 = vld [vmem:[%s1857_s29 + $0xe0] sm:$0xff]   ;;  %v1791_v31 = vld [vmem:[%s1857_s29 + $0xe8] sm:$0xff]   ;;  %v1793_v33 = vld [vmem:[%s1857_s29 + $0xf0] sm:$0xff]  }
  0x1a   : > { %v1794_v34 = vld [vmem:[%s1857_s29 + $0x78] sm:$0xff]  }
  0x1b   : > { %v1795_v35 = vld [vmem:[%s1857_s29 + $0xf8] sm:$0xff]  }
  0x1e   : > { %1685 = vmatmul.mubr.msk.bf16.gmra.mrb[4].mxu0 %vm458_vm0, %v1770_v10  ;;  %1717 = vmatmul.mubr.msk.bf16.gmra.mrb[4].mxu1 %vm458_vm0, %v1771_v11 }
  0x1f   : > { %1688 = vmatprep.mubr.msk.bf16.mxu0 %vm458_vm0, %v1772_v12  ;;  %1720 = vmatprep.mubr.msk.bf16.mxu1 %vm458_vm0, %v1773_v13 }
  0x26   : > { %1689 = vmatmul.mubr.msk.bf16.gmra.mrb[8].mxu0 %vm458_vm0, %v1774_v14  ;;  %1721 = vmatmul.mubr.msk.bf16.gmra.mrb[8].mxu1 %vm458_vm0, %v1775_v15 }
  0x27   : > { %1692 = vmatprep.mubr.msk.bf16.mxu0 %vm458_vm0, %v1776_v16  ;;  %1724 = vmatprep.mubr.msk.bf16.mxu1 %vm458_vm0, %v1777_v17 }
  0x2e   : > { %1693 = vmatmul.mubr.msk.bf16.gmra.mrb[12].mxu0 %vm458_vm0, %v1778_v18  ;;  %1725 = vmatmul.mubr.msk.bf16.gmra.mrb[12].mxu1 %vm458_vm0, %v1779_v19 }
  0x2f   : > { %1696 = vmatprep.mubr.msk.bf16.mxu0 %vm458_vm0, %v1780_v20  ;;  %1728 = vmatprep.mubr.msk.bf16.mxu1 %vm458_vm0, %v1781_v21 }
  0x36   : > { %1697 = vmatmul.mubr.msk.bf16.gmra.mrb[16].mxu0 %vm458_vm0, %v1782_v22  ;;  %1729 = vmatmul.mubr.msk.bf16.gmra.mrb[16].mxu1 %vm458_vm0, %v1783_v23 }
  0x37   : > { %1700 = vmatprep.mubr.msk.bf16.mxu0 %vm458_vm0, %v1784_v24  ;;  %1732 = vmatprep.mubr.msk.bf16.mxu1 %vm458_vm0, %v1785_v25 }
  0x3e   : > { %1701 = vmatmul.mubr.msk.bf16.gmra.mrb[20].mxu0 %vm458_vm0, %v1786_v26  ;;  %1733 = vmatmul.mubr.msk.bf16.gmra.mrb[20].mxu1 %vm458_vm0, %v1787_v27 }
  0x3f   : > { %1704 = vmatprep.mubr.msk.bf16.mxu0 %vm458_vm0, %v1788_v28  ;;  %1736 = vmatprep.mubr.msk.bf16.mxu1 %vm458_vm0, %v1789_v29 }
  0x46   : > { %1705 = vmatmul.mubr.msk.bf16.gmra.mrb[24].mxu0 %vm458_vm0, %v1790_v30  ;;  %1737 = vmatmul.mubr.msk.bf16.gmra.mrb[24].mxu1 %vm458_vm0, %v1791_v31 }
  0x47   : > { %1708 = vmatprep.mubr.msk.bf16.mxu0 %vm458_vm0, %v1792_v32  ;;  %1740 = vmatprep.mubr.msk.bf16.mxu1 %vm458_vm0, %v1793_v33 }
  0x4e   : > { %1709 = vmatmul.mubr.msk.bf16.gmra.mrb[28].mxu0 %vm458_vm0, %v1794_v34  ;;  %1741 = vmatmul.mubr.msk.bf16.gmra.mrb[28].mxu1 %vm458_vm0, %v1795_v35 }
  0xe9   : > { %v1682_v37 = vpop.f32.mrb[0].mxu0  ;;  %v1714_v39 = vpop.f32.mrb[0].mxu1 }
  0xea   : > { %v853_v40 = vmul.f32 %v1682_v37, %v1926_v36  ;;  %v885_v41 = vmul.f32 %v1714_v39, %v1926_v36  ;;  %v589_v42 = vpop.f32.mrb[1].mxu0  ;;  %v717_v43 = vpop.f32.mrb[1].mxu1 }
  0xeb   : > { %v851_v44 = vmul.f32 %v1926_v36, %v589_v42  ;;  %v883_v45 = vmul.f32 %v1926_v36, %v717_v43  ;;  %v1683_v46 = vpop.f32.mrb[2].mxu0  ;;  %v1715_v47 = vpop.f32.mrb[2].mxu1 }
  0xec   : > { %v924_v48 = vadd.f32 %v1931_v38, %v853_v40  ;;  %v956_v49 = vadd.f32 %v1931_v38, %v885_v41  ;;  %v854_v50 = vmul.f32 %v1683_v46, %v1926_v36  ;;  %v886_v51 = vmul.f32 %v1715_v47, %v1926_v36  ;;  %v592_v52 = vpop.f32.mrb[3].mxu0  ;;  %v720_v53 = vpop.f32.mrb[3].mxu1 }
  0xed   : > { %v922_v54 = vadd.f32 %v1931_v38, %v851_v44  ;;  %v954_v55 = vadd.f32 %v1931_v38, %v883_v45  ;;  %v852_v56 = vmul.f32 %v1926_v36, %v592_v52  ;;  %v884_v57 = vmul.f32 %v1926_v36, %v720_v53 }
  0xee   : > { %v988_v58 = vmax.f32 %v924_v48, 0.0  ;;  %v1020_v59 = vmax.f32 %v956_v49, 0.0  ;;  %v925_v60 = vadd.f32 %v1931_v38, %v854_v50  ;;  %v957_v61 = vadd.f32 %v1931_v38, %v886_v51 }
  0xef   : > { %v986_v62 = vmax.f32 %v922_v54, 0.0  ;;  %v1018_v63 = vmax.f32 %v954_v55, 0.0  ;;  %v923_v0 = vadd.f32 %v1931_v38, %v852_v56  ;;  %v955_v1 = vadd.f32 %v1931_v38, %v884_v57 }
  0xf0   : > { %v1574_v2 = vpack.c.bf16 %v988_v58, %v988_v58  ;;  %v1606_v3 = vpack.c.bf16 %v1020_v59, %v1020_v59  ;;  %v989_v4 = vmax.f32 %v925_v60, 0.0  ;;  %v1021_v5 = vmax.f32 %v957_v61, 0.0 }
  0xf1   : > { %v1572_v6 = vpack.c.bf16 %v986_v62, %v986_v62  ;;  %v1604_v7 = vpack.c.bf16 %v1018_v63, %v1018_v63  ;;  %v987_v8 = vmax.f32 %v923_v0, 0.0  ;;  %v1019_v9 = vmax.f32 %v955_v1, 0.0  ;;  %v1686_v10 = vpop.f32.mrb[4].mxu0  ;;  %v1718_v11 = vpop.f32.mrb[4].mxu1 }
  0xf2   : > { %1309 = vst.msk [vmem:[%s1952_s10 + $0x8] sm:$0xf] %vm1306_vm1, %v1574_v2  ;;  %1341 = vst.msk [vmem:[%s1952_s10 + $0x88] sm:$0xf] %vm1306_vm1, %v1606_v3  ;;  %v1575_v12 = vpack.c.bf16 %v989_v4, %v989_v4  ;;  %v1607_v13 = vpack.c.bf16 %v1021_v5, %v1021_v5  ;;  %v857_v14 = vmul.f32 %v1686_v10, %v1926_v36  ;;  %v605_v16 = vpop.f32.mrb[5].mxu0  ;;  %v733_v17 = vpop.f32.mrb[5].mxu1 }
  0xf3   : > { %v889_v15 = vmul.f32 %v1718_v11, %v1926_v36  ;;  %1307 = vst.msk [vmem:[%s1952_s10] sm:$0xf] %vm1306_vm1, %v1572_v6  ;;  %1339 = vst.msk [vmem:[%s1952_s10 + $0x80] sm:$0xf] %vm1306_vm1, %v1604_v7  ;;  %v1573_v18 = vpack.c.bf16 %v987_v8, %v987_v8  ;;  %v1605_v19 = vpack.c.bf16 %v1019_v9, %v1019_v9  ;;  %v1687_v22 = vpop.f32.mrb[6].mxu0  ;;  %v1719_v23 = vpop.f32.mrb[6].mxu1 }
  0xf4   : > { %v855_v20 = vmul.f32 %v1926_v36, %v605_v16  ;;  %v887_v21 = vmul.f32 %v1926_v36, %v733_v17  ;;  %1310 = vst.msk [vmem:[%s1952_s10 + $0xc] sm:$0xf] %vm1306_vm1, %v1575_v12  ;;  %1342 = vst.msk [vmem:[%s1952_s10 + $0x8c] sm:$0xf] %vm1306_vm1, %v1607_v13  ;;  %v928_v24 = vadd.f32 %v1931_v38, %v857_v14  ;;  %v608_v28 = vpop.f32.mrb[7].mxu0  ;;  %v736_v29 = vpop.f32.mrb[7].mxu1 }
  0xf5   : > { %v960_v25 = vadd.f32 %v1931_v38, %v889_v15  ;;  %v858_v26 = vmul.f32 %v1687_v22, %v1926_v36  ;;  %v890_v27 = vmul.f32 %v1719_v23, %v1926_v36  ;;  %1308 = vst.msk [vmem:[%s1952_s10 + $0x4] sm:$0xf] %vm1306_vm1, %v1573_v18  ;;  %1340 = vst.msk [vmem:[%s1952_s10 + $0x84] sm:$0xf] %vm1306_vm1, %v1605_v19 }
  0xf6   : > { %v926_v30 = vadd.f32 %v1931_v38, %v855_v20  ;;  %v958_v31 = vadd.f32 %v1931_v38, %v887_v21  ;;  %v856_v32 = vmul.f32 %v1926_v36, %v608_v28  ;;  %v888_v33 = vmul.f32 %v1926_v36, %v736_v29 }
  0xf7   : > { %v992_v34 = vmax.f32 %v928_v24, 0.0  ;;  %v1024_v35 = vmax.f32 %v960_v25, 0.0  ;;  %v929_v37 = vadd.f32 %v1931_v38, %v858_v26  ;;  %v961_v39 = vadd.f32 %v1931_v38, %v890_v27 }
  0xf8   : > { %v990_v40 = vmax.f32 %v926_v30, 0.0  ;;  %v1022_v41 = vmax.f32 %v958_v31, 0.0  ;;  %v927_v42 = vadd.f32 %v1931_v38, %v856_v32  ;;  %v959_v43 = vadd.f32 %v1931_v38, %v888_v33 }
  0xf9   : > { %v1578_v44 = vpack.c.bf16 %v992_v34, %v992_v34  ;;  %v1610_v45 = vpack.c.bf16 %v1024_v35, %v1024_v35  ;;  %v993_v46 = vmax.f32 %v929_v37, 0.0  ;;  %v1025_v47 = vmax.f32 %v961_v39, 0.0  ;;  %v1690_v52 = vpop.f32.mrb[8].mxu0  ;;  %v1722_v53 = vpop.f32.mrb[8].mxu1 }
  0xfa   : > { %v1576_v48 = vpack.c.bf16 %v990_v40, %v990_v40  ;;  %v1608_v49 = vpack.c.bf16 %v1022_v41, %v1022_v41  ;;  %v991_v50 = vmax.f32 %v927_v42, 0.0  ;;  %v1023_v51 = vmax.f32 %v959_v43, 0.0  ;;  %v621_v58 = vpop.f32.mrb[9].mxu0  ;;  %v749_v59 = vpop.f32.mrb[9].mxu1 }
  0xfb   : > { %1313 = vst.msk [vmem:[%s1952_s10 + $0x18] sm:$0xf] %vm1306_vm1, %v1578_v44  ;;  %1345 = vst.msk [vmem:[%s1952_s10 + $0x98] sm:$0xf] %vm1306_vm1, %v1610_v45  ;;  %v1579_v54 = vpack.c.bf16 %v993_v46, %v993_v46  ;;  %v1611_v55 = vpack.c.bf16 %v1025_v47, %v1025_v47  ;;  %v861_v56 = vmul.f32 %v1690_v52, %v1926_v36  ;;  %v1691_v0 = vpop.f32.mrb[10].mxu0  ;;  %v1723_v1 = vpop.f32.mrb[10].mxu1 }
  0xfc   : > { %v893_v57 = vmul.f32 %v1722_v53, %v1926_v36  ;;  %1311 = vst.msk [vmem:[%s1952_s10 + $0x10] sm:$0xf] %vm1306_vm1, %v1576_v48  ;;  %1343 = vst.msk [vmem:[%s1952_s10 + $0x90] sm:$0xf] %vm1306_vm1, %v1608_v49  ;;  %v1577_v60 = vpack.c.bf16 %v991_v50, %v991_v50  ;;  %v1609_v61 = vpack.c.bf16 %v1023_v51, %v1023_v51  ;;  %v624_v6 = vpop.f32.mrb[11].mxu0  ;;  %v752_v7 = vpop.f32.mrb[11].mxu1 }
  0xfd   : > { %v859_v62 = vmul.f32 %v1926_v36, %v621_v58  ;;  %v891_v63 = vmul.f32 %v1926_v36, %v749_v59  ;;  %1314 = vst.msk [vmem:[%s1952_s10 + $0x1c] sm:$0xf] %vm1306_vm1, %v1579_v54  ;;  %1346 = vst.msk [vmem:[%s1952_s10 + $0x9c] sm:$0xf] %vm1306_vm1, %v1611_v55  ;;  %v932_v2 = vadd.f32 %v1931_v38, %v861_v56 }
  0xfe   : > { %v964_v3 = vadd.f32 %v1931_v38, %v893_v57  ;;  %v862_v4 = vmul.f32 %v1691_v0, %v1926_v36  ;;  %v894_v5 = vmul.f32 %v1723_v1, %v1926_v36  ;;  %1312 = vst.msk [vmem:[%s1952_s10 + $0x14] sm:$0xf] %vm1306_vm1, %v1577_v60  ;;  %1344 = vst.msk [vmem:[%s1952_s10 + $0x94] sm:$0xf] %vm1306_vm1, %v1609_v61 }
  0xff   : > { %v930_v8 = vadd.f32 %v1931_v38, %v859_v62  ;;  %v962_v9 = vadd.f32 %v1931_v38, %v891_v63  ;;  %v860_v10 = vmul.f32 %v1926_v36, %v624_v6  ;;  %v892_v11 = vmul.f32 %v1926_v36, %v752_v7 }
 0x100   : > { %v996_v12 = vmax.f32 %v932_v2, 0.0  ;;  %v1028_v13 = vmax.f32 %v964_v3, 0.0  ;;  %v933_v14 = vadd.f32 %v1931_v38, %v862_v4  ;;  %v965_v15 = vadd.f32 %v1931_v38, %v894_v5 }
 0x101   : > { %v994_v16 = vmax.f32 %v930_v8, 0.0  ;;  %v1026_v17 = vmax.f32 %v962_v9, 0.0  ;;  %v931_v18 = vadd.f32 %v1931_v38, %v860_v10  ;;  %v963_v19 = vadd.f32 %v1931_v38, %v892_v11  ;;  %v1694_v28 = vpop.f32.mrb[12].mxu0  ;;  %v1726_v29 = vpop.f32.mrb[12].mxu1 }
 0x102   : > { %v1582_v20 = vpack.c.bf16 %v996_v12, %v996_v12  ;;  %v1614_v21 = vpack.c.bf16 %v1028_v13, %v1028_v13  ;;  %v997_v22 = vmax.f32 %v933_v14, 0.0  ;;  %v1029_v23 = vmax.f32 %v965_v15, 0.0  ;;  %v637_v34 = vpop.f32.mrb[13].mxu0  ;;  %v765_v35 = vpop.f32.mrb[13].mxu1 }
 0x103   : > { %v1580_v24 = vpack.c.bf16 %v994_v16, %v994_v16  ;;  %v1612_v25 = vpack.c.bf16 %v1026_v17, %v1026_v17  ;;  %v995_v26 = vmax.f32 %v931_v18, 0.0  ;;  %v1027_v27 = vmax.f32 %v963_v19, 0.0  ;;  %v1695_v42 = vpop.f32.mrb[14].mxu0  ;;  %v1727_v43 = vpop.f32.mrb[14].mxu1 }
 0x104   : > { %1317 = vst.msk [vmem:[%s1952_s10 + $0x28] sm:$0xf] %vm1306_vm1, %v1582_v20  ;;  %1349 = vst.msk [vmem:[%s1952_s10 + $0xa8] sm:$0xf] %vm1306_vm1, %v1614_v21  ;;  %v1583_v30 = vpack.c.bf16 %v997_v22, %v997_v22  ;;  %v1615_v31 = vpack.c.bf16 %v1029_v23, %v1029_v23  ;;  %v865_v32 = vmul.f32 %v1694_v28, %v1926_v36  ;;  %v640_v48 = vpop.f32.mrb[15].mxu0  ;;  %v768_v49 = vpop.f32.mrb[15].mxu1 }
 0x105   : > { %v897_v33 = vmul.f32 %v1726_v29, %v1926_v36  ;;  %1315 = vst.msk [vmem:[%s1952_s10 + $0x20] sm:$0xf] %vm1306_vm1, %v1580_v24  ;;  %1347 = vst.msk [vmem:[%s1952_s10 + $0xa0] sm:$0xf] %vm1306_vm1, %v1612_v25  ;;  %v1581_v37 = vpack.c.bf16 %v995_v26, %v995_v26  ;;  %v1613_v39 = vpack.c.bf16 %v1027_v27, %v1027_v27 }
 0x106   : > { %v863_v40 = vmul.f32 %v1926_v36, %v637_v34  ;;  %v895_v41 = vmul.f32 %v1926_v36, %v765_v35  ;;  %1318 = vst.msk [vmem:[%s1952_s10 + $0x2c] sm:$0xf] %vm1306_vm1, %v1583_v30  ;;  %1350 = vst.msk [vmem:[%s1952_s10 + $0xac] sm:$0xf] %vm1306_vm1, %v1615_v31  ;;  %v936_v44 = vadd.f32 %v1931_v38, %v865_v32 }
 0x107   : > { %v968_v45 = vadd.f32 %v1931_v38, %v897_v33  ;;  %v866_v46 = vmul.f32 %v1695_v42, %v1926_v36  ;;  %v898_v47 = vmul.f32 %v1727_v43, %v1926_v36  ;;  %1316 = vst.msk [vmem:[%s1952_s10 + $0x24] sm:$0xf] %vm1306_vm1, %v1581_v37  ;;  %1348 = vst.msk [vmem:[%s1952_s10 + $0xa4] sm:$0xf] %vm1306_vm1, %v1613_v39 }
 0x108   : > { %v934_v50 = vadd.f32 %v1931_v38, %v863_v40  ;;  %v966_v51 = vadd.f32 %v1931_v38, %v895_v41  ;;  %v864_v52 = vmul.f32 %v1926_v36, %v640_v48  ;;  %v896_v53 = vmul.f32 %v1926_v36, %v768_v49 }
 0x109   : > { %v1000_v54 = vmax.f32 %v936_v44, 0.0  ;;  %v1032_v55 = vmax.f32 %v968_v45, 0.0  ;;  %v937_v56 = vadd.f32 %v1931_v38, %v866_v46  ;;  %v969_v57 = vadd.f32 %v1931_v38, %v898_v47  ;;  %v1698_v6 = vpop.f32.mrb[16].mxu0  ;;  %v1730_v7 = vpop.f32.mrb[16].mxu1 }
 0x10a   : > { %v998_v58 = vmax.f32 %v934_v50, 0.0  ;;  %v1030_v59 = vmax.f32 %v966_v51, 0.0  ;;  %v935_v60 = vadd.f32 %v1931_v38, %v864_v52  ;;  %v967_v61 = vadd.f32 %v1931_v38, %v896_v53  ;;  %v653_v12 = vpop.f32.mrb[17].mxu0  ;;  %v781_v13 = vpop.f32.mrb[17].mxu1 }
 0x10b   : > { %v1586_v62 = vpack.c.bf16 %v1000_v54, %v1000_v54  ;;  %v1618_v63 = vpack.c.bf16 %v1032_v55, %v1032_v55  ;;  %v1001_v0 = vmax.f32 %v937_v56, 0.0  ;;  %v1033_v1 = vmax.f32 %v969_v57, 0.0  ;;  %v1699_v18 = vpop.f32.mrb[18].mxu0  ;;  %v1731_v19 = vpop.f32.mrb[18].mxu1 }
 0x10c   : > { %v1584_v2 = vpack.c.bf16 %v998_v58, %v998_v58  ;;  %v1616_v3 = vpack.c.bf16 %v1030_v59, %v1030_v59  ;;  %v999_v4 = vmax.f32 %v935_v60, 0.0  ;;  %v1031_v5 = vmax.f32 %v967_v61, 0.0  ;;  %v656_v24 = vpop.f32.mrb[19].mxu0  ;;  %v784_v25 = vpop.f32.mrb[19].mxu1 }
 0x10d   : > { %1321 = vst.msk [vmem:[%s1952_s10 + $0x38] sm:$0xf] %vm1306_vm1, %v1586_v62  ;;  %1353 = vst.msk [vmem:[%s1952_s10 + $0xb8] sm:$0xf] %vm1306_vm1, %v1618_v63  ;;  %v1587_v8 = vpack.c.bf16 %v1001_v0, %v1001_v0  ;;  %v1619_v9 = vpack.c.bf16 %v1033_v1, %v1033_v1  ;;  %v869_v10 = vmul.f32 %v1698_v6, %v1926_v36 }
 0x10e   : > { %v901_v11 = vmul.f32 %v1730_v7, %v1926_v36  ;;  %1319 = vst.msk [vmem:[%s1952_s10 + $0x30] sm:$0xf] %vm1306_vm1, %v1584_v2  ;;  %1351 = vst.msk [vmem:[%s1952_s10 + $0xb0] sm:$0xf] %vm1306_vm1, %v1616_v3  ;;  %v1585_v14 = vpack.c.bf16 %v999_v4, %v999_v4  ;;  %v1617_v15 = vpack.c.bf16 %v1031_v5, %v1031_v5 }
 0x10f   : > { %v867_v16 = vmul.f32 %v1926_v36, %v653_v12  ;;  %v899_v17 = vmul.f32 %v1926_v36, %v781_v13  ;;  %1322 = vst.msk [vmem:[%s1952_s10 + $0x3c] sm:$0xf] %vm1306_vm1, %v1587_v8  ;;  %1354 = vst.msk [vmem:[%s1952_s10 + $0xbc] sm:$0xf] %vm1306_vm1, %v1619_v9  ;;  %v940_v20 = vadd.f32 %v1931_v38, %v869_v10 }
 0x110   : > { %v972_v21 = vadd.f32 %v1931_v38, %v901_v11  ;;  %v870_v22 = vmul.f32 %v1699_v18, %v1926_v36  ;;  %v902_v23 = vmul.f32 %v1731_v19, %v1926_v36  ;;  %1320 = vst.msk [vmem:[%s1952_s10 + $0x34] sm:$0xf] %vm1306_vm1, %v1585_v14  ;;  %1352 = vst.msk [vmem:[%s1952_s10 + $0xb4] sm:$0xf] %vm1306_vm1, %v1617_v15 }
 0x111   : > { %v938_v26 = vadd.f32 %v1931_v38, %v867_v16  ;;  %v970_v27 = vadd.f32 %v1931_v38, %v899_v17  ;;  %v868_v28 = vmul.f32 %v1926_v36, %v656_v24  ;;  %v900_v29 = vmul.f32 %v1926_v36, %v784_v25  ;;  %v1702_v48 = vpop.f32.mrb[20].mxu0  ;;  %v1734_v49 = vpop.f32.mrb[20].mxu1 }
 0x112   : > { %v1004_v30 = vmax.f32 %v940_v20, 0.0  ;;  %v1036_v31 = vmax.f32 %v972_v21, 0.0  ;;  %v941_v32 = vadd.f32 %v1931_v38, %v870_v22  ;;  %v973_v33 = vadd.f32 %v1931_v38, %v902_v23  ;;  %v669_v54 = vpop.f32.mrb[21].mxu0  ;;  %v797_v55 = vpop.f32.mrb[21].mxu1 }
 0x113   : > { %v1002_v34 = vmax.f32 %v938_v26, 0.0  ;;  %v1034_v35 = vmax.f32 %v970_v27, 0.0  ;;  %v939_v37 = vadd.f32 %v1931_v38, %v868_v28  ;;  %v971_v39 = vadd.f32 %v1931_v38, %v900_v29  ;;  %v1703_v60 = vpop.f32.mrb[22].mxu0  ;;  %v1735_v61 = vpop.f32.mrb[22].mxu1 }
 0x114   : > { %v1590_v40 = vpack.c.bf16 %v1004_v30, %v1004_v30  ;;  %v1622_v41 = vpack.c.bf16 %v1036_v31, %v1036_v31  ;;  %v1005_v42 = vmax.f32 %v941_v32, 0.0  ;;  %v1037_v43 = vmax.f32 %v973_v33, 0.0  ;;  %v672_v2 = vpop.f32.mrb[23].mxu0  ;;  %v800_v3 = vpop.f32.mrb[23].mxu1 }
 0x115   : > { %v1588_v44 = vpack.c.bf16 %v1002_v34, %v1002_v34  ;;  %v1620_v45 = vpack.c.bf16 %v1034_v35, %v1034_v35  ;;  %v1003_v46 = vmax.f32 %v939_v37, 0.0  ;;  %v1035_v47 = vmax.f32 %v971_v39, 0.0 }
 0x116   : > { %1325 = vst.msk [vmem:[%s1952_s10 + $0x48] sm:$0xf] %vm1306_vm1, %v1590_v40  ;;  %1357 = vst.msk [vmem:[%s1952_s10 + $0xc8] sm:$0xf] %vm1306_vm1, %v1622_v41  ;;  %v1591_v50 = vpack.c.bf16 %v1005_v42, %v1005_v42  ;;  %v1623_v51 = vpack.c.bf16 %v1037_v43, %v1037_v43  ;;  %v873_v52 = vmul.f32 %v1702_v48, %v1926_v36 }
 0x117   : > { %v905_v53 = vmul.f32 %v1734_v49, %v1926_v36  ;;  %1323 = vst.msk [vmem:[%s1952_s10 + $0x40] sm:$0xf] %vm1306_vm1, %v1588_v44  ;;  %1355 = vst.msk [vmem:[%s1952_s10 + $0xc0] sm:$0xf] %vm1306_vm1, %v1620_v45  ;;  %v1589_v56 = vpack.c.bf16 %v1003_v46, %v1003_v46  ;;  %v1621_v57 = vpack.c.bf16 %v1035_v47, %v1035_v47 }
 0x118   : > { %v871_v58 = vmul.f32 %v1926_v36, %v669_v54  ;;  %v903_v59 = vmul.f32 %v1926_v36, %v797_v55  ;;  %1326 = vst.msk [vmem:[%s1952_s10 + $0x4c] sm:$0xf] %vm1306_vm1, %v1591_v50  ;;  %1358 = vst.msk [vmem:[%s1952_s10 + $0xcc] sm:$0xf] %vm1306_vm1, %v1623_v51  ;;  %v944_v62 = vadd.f32 %v1931_v38, %v873_v52 }
 0x119   : > { %v976_v63 = vadd.f32 %v1931_v38, %v905_v53  ;;  %v874_v0 = vmul.f32 %v1703_v60, %v1926_v36  ;;  %v906_v1 = vmul.f32 %v1735_v61, %v1926_v36  ;;  %1324 = vst.msk [vmem:[%s1952_s10 + $0x44] sm:$0xf] %vm1306_vm1, %v1589_v56  ;;  %1356 = vst.msk [vmem:[%s1952_s10 + $0xc4] sm:$0xf] %vm1306_vm1, %v1621_v57  ;;  %v1706_v24 = vpop.f32.mrb[24].mxu0  ;;  %v1738_v25 = vpop.f32.mrb[24].mxu1 }
 0x11a   : > { %v942_v4 = vadd.f32 %v1931_v38, %v871_v58  ;;  %v974_v5 = vadd.f32 %v1931_v38, %v903_v59  ;;  %v872_v6 = vmul.f32 %v1926_v36, %v672_v2  ;;  %v904_v7 = vmul.f32 %v1926_v36, %v800_v3  ;;  %v685_v30 = vpop.f32.mrb[25].mxu0  ;;  %v813_v31 = vpop.f32.mrb[25].mxu1 }
 0x11b   : > { %v1008_v8 = vmax.f32 %v944_v62, 0.0  ;;  %v1040_v9 = vmax.f32 %v976_v63, 0.0  ;;  %v945_v10 = vadd.f32 %v1931_v38, %v874_v0  ;;  %v977_v11 = vadd.f32 %v1931_v38, %v906_v1  ;;  %v1707_v37 = vpop.f32.mrb[26].mxu0  ;;  %v1739_v39 = vpop.f32.mrb[26].mxu1 }
 0x11c   : > { %v1006_v12 = vmax.f32 %v942_v4, 0.0  ;;  %v1038_v13 = vmax.f32 %v974_v5, 0.0  ;;  %v943_v14 = vadd.f32 %v1931_v38, %v872_v6  ;;  %v975_v15 = vadd.f32 %v1931_v38, %v904_v7  ;;  %v688_v44 = vpop.f32.mrb[27].mxu0  ;;  %v816_v45 = vpop.f32.mrb[27].mxu1 }
 0x11d   : > { %v1594_v16 = vpack.c.bf16 %v1008_v8, %v1008_v8  ;;  %v1626_v17 = vpack.c.bf16 %v1040_v9, %v1040_v9  ;;  %v1009_v18 = vmax.f32 %v945_v10, 0.0  ;;  %v1041_v19 = vmax.f32 %v977_v11, 0.0 }
 0x11e   : > { %v1592_v20 = vpack.c.bf16 %v1006_v12, %v1006_v12  ;;  %v1624_v21 = vpack.c.bf16 %v1038_v13, %v1038_v13  ;;  %v1007_v22 = vmax.f32 %v943_v14, 0.0  ;;  %v1039_v23 = vmax.f32 %v975_v15, 0.0 }
 0x11f   : > { %1329 = vst.msk [vmem:[%s1952_s10 + $0x58] sm:$0xf] %vm1306_vm1, %v1594_v16  ;;  %1361 = vst.msk [vmem:[%s1952_s10 + $0xd8] sm:$0xf] %vm1306_vm1, %v1626_v17  ;;  %v1595_v26 = vpack.c.bf16 %v1009_v18, %v1009_v18  ;;  %v1627_v27 = vpack.c.bf16 %v1041_v19, %v1041_v19  ;;  %v877_v28 = vmul.f32 %v1706_v24, %v1926_v36 }
 0x120   : > { %v909_v29 = vmul.f32 %v1738_v25, %v1926_v36  ;;  %1327 = vst.msk [vmem:[%s1952_s10 + $0x50] sm:$0xf] %vm1306_vm1, %v1592_v20  ;;  %1359 = vst.msk [vmem:[%s1952_s10 + $0xd0] sm:$0xf] %vm1306_vm1, %v1624_v21  ;;  %v1593_v32 = vpack.c.bf16 %v1007_v22, %v1007_v22  ;;  %v1625_v33 = vpack.c.bf16 %v1039_v23, %v1039_v23 }
 0x121   : > { %v875_v34 = vmul.f32 %v1926_v36, %v685_v30  ;;  %v907_v35 = vmul.f32 %v1926_v36, %v813_v31  ;;  %1330 = vst.msk [vmem:[%s1952_s10 + $0x5c] sm:$0xf] %vm1306_vm1, %v1595_v26  ;;  %1362 = vst.msk [vmem:[%s1952_s10 + $0xdc] sm:$0xf] %vm1306_vm1, %v1627_v27  ;;  %v948_v40 = vadd.f32 %v1931_v38, %v877_v28  ;;  %v1710_v2 = vpop.f32.mrb[28].mxu0  ;;  %v1742_v3 = vpop.f32.mrb[28].mxu1 }
 0x122   : > { %v980_v41 = vadd.f32 %v1931_v38, %v909_v29  ;;  %v878_v42 = vmul.f32 %v1707_v37, %v1926_v36  ;;  %v910_v43 = vmul.f32 %v1739_v39, %v1926_v36  ;;  %1328 = vst.msk [vmem:[%s1952_s10 + $0x54] sm:$0xf] %vm1306_vm1, %v1593_v32  ;;  %1360 = vst.msk [vmem:[%s1952_s10 + $0xd4] sm:$0xf] %vm1306_vm1, %v1625_v33  ;;  %v701_v8 = vpop.f32.mrb[29].mxu0  ;;  %v829_v9 = vpop.f32.mrb[29].mxu1 }
 0x123   : > { %v946_v46 = vadd.f32 %v1931_v38, %v875_v34  ;;  %v978_v47 = vadd.f32 %v1931_v38, %v907_v35  ;;  %v876_v48 = vmul.f32 %v1926_v36, %v688_v44  ;;  %v908_v49 = vmul.f32 %v1926_v36, %v816_v45  ;;  %v1711_v14 = vpop.f32.mrb[30].mxu0  ;;  %v1743_v15 = vpop.f32.mrb[30].mxu1 }
 0x124   : > { %v1012_v50 = vmax.f32 %v948_v40, 0.0  ;;  %v1044_v51 = vmax.f32 %v980_v41, 0.0  ;;  %v949_v52 = vadd.f32 %v1931_v38, %v878_v42  ;;  %v981_v53 = vadd.f32 %v1931_v38, %v910_v43  ;;  %v704_v20 = vpop.f32.mrb[31].mxu0  ;;  %v832_v21 = vpop.f32.mrb[31].mxu1 }
 0x125   : > { %v1010_v54 = vmax.f32 %v946_v46, 0.0  ;;  %v1042_v55 = vmax.f32 %v978_v47, 0.0  ;;  %v947_v56 = vadd.f32 %v1931_v38, %v876_v48  ;;  %v979_v57 = vadd.f32 %v1931_v38, %v908_v49 }
 0x126   : > { %v1598_v58 = vpack.c.bf16 %v1012_v50, %v1012_v50  ;;  %v1630_v59 = vpack.c.bf16 %v1044_v51, %v1044_v51  ;;  %v1013_v60 = vmax.f32 %v949_v52, 0.0  ;;  %v1045_v61 = vmax.f32 %v981_v53, 0.0 }
 0x127   : > { %v1596_v62 = vpack.c.bf16 %v1010_v54, %v1010_v54  ;;  %v1628_v63 = vpack.c.bf16 %v1042_v55, %v1042_v55  ;;  %v1011_v0 = vmax.f32 %v947_v56, 0.0  ;;  %v1043_v1 = vmax.f32 %v979_v57, 0.0 }
 0x128   : > { %1333 = vst.msk [vmem:[%s1952_s10 + $0x68] sm:$0xf] %vm1306_vm1, %v1598_v58  ;;  %1365 = vst.msk [vmem:[%s1952_s10 + $0xe8] sm:$0xf] %vm1306_vm1, %v1630_v59  ;;  %v1599_v4 = vpack.c.bf16 %v1013_v60, %v1013_v60  ;;  %v1631_v5 = vpack.c.bf16 %v1045_v61, %v1045_v61  ;;  %v881_v6 = vmul.f32 %v1710_v2, %v1926_v36 }
 0x129   : > { %v913_v7 = vmul.f32 %v1742_v3, %v1926_v36  ;;  %1331 = vst.msk [vmem:[%s1952_s10 + $0x60] sm:$0xf] %vm1306_vm1, %v1596_v62  ;;  %1363 = vst.msk [vmem:[%s1952_s10 + $0xe0] sm:$0xf] %vm1306_vm1, %v1628_v63  ;;  %v1597_v10 = vpack.c.bf16 %v1011_v0, %v1011_v0  ;;  %v1629_v11 = vpack.c.bf16 %v1043_v1, %v1043_v1 }
 0x12a   : > { %v879_v12 = vmul.f32 %v1926_v36, %v701_v8  ;;  %v911_v13 = vmul.f32 %v1926_v36, %v829_v9  ;;  %1334 = vst.msk [vmem:[%s1952_s10 + $0x6c] sm:$0xf] %vm1306_vm1, %v1599_v4  ;;  %1366 = vst.msk [vmem:[%s1952_s10 + $0xec] sm:$0xf] %vm1306_vm1, %v1631_v5  ;;  %v952_v16 = vadd.f32 %v1931_v38, %v881_v6 }
 0x12b   : > { %v984_v17 = vadd.f32 %v1931_v38, %v913_v7  ;;  %v882_v18 = vmul.f32 %v1711_v14, %v1926_v36  ;;  %v914_v19 = vmul.f32 %v1743_v15, %v1926_v36  ;;  %1332 = vst.msk [vmem:[%s1952_s10 + $0x64] sm:$0xf] %vm1306_vm1, %v1597_v10  ;;  %1364 = vst.msk [vmem:[%s1952_s10 + $0xe4] sm:$0xf] %vm1306_vm1, %v1629_v11 }
 0x12c   : > { %v950_v22 = vadd.f32 %v1931_v38, %v879_v12  ;;  %v982_v23 = vadd.f32 %v1931_v38, %v911_v13  ;;  %v880_v24 = vmul.f32 %v1926_v36, %v704_v20  ;;  %v912_v25 = vmul.f32 %v1926_v36, %v832_v21 }
 0x12d   : > { %v1016_v26 = vmax.f32 %v952_v16, 0.0  ;;  %v1048_v27 = vmax.f32 %v984_v17, 0.0  ;;  %v953_v28 = vadd.f32 %v1931_v38, %v882_v18  ;;  %v985_v29 = vadd.f32 %v1931_v38, %v914_v19 }
 0x12e   : > { %v1014_v30 = vmax.f32 %v950_v22, 0.0  ;;  %v1046_v31 = vmax.f32 %v982_v23, 0.0  ;;  %v951_v32 = vadd.f32 %v1931_v38, %v880_v24  ;;  %v983_v33 = vadd.f32 %v1931_v38, %v912_v25 }
 0x12f   : > { %v1602_v34 = vpack.c.bf16 %v1016_v26, %v1016_v26  ;;  %v1634_v35 = vpack.c.bf16 %v1048_v27, %v1048_v27  ;;  %v1017_v36 = vmax.f32 %v953_v28, 0.0  ;;  %v1049_v37 = vmax.f32 %v985_v29, 0.0 }
 0x130   : > { %v1600_v39 = vpack.c.bf16 %v1014_v30, %v1014_v30  ;;  %v1632_v40 = vpack.c.bf16 %v1046_v31, %v1046_v31  ;;  %v1015_v41 = vmax.f32 %v951_v32, 0.0  ;;  %v1047_v42 = vmax.f32 %v983_v33, 0.0 }
 0x131   : > { %1337 = vst.msk [vmem:[%s1952_s10 + $0x78] sm:$0xf] %vm1306_vm1, %v1602_v34  ;;  %1369 = vst.msk [vmem:[%s1952_s10 + $0xf8] sm:$0xf] %vm1306_vm1, %v1634_v35  ;;  %v1603_v43 = vpack.c.bf16 %v1017_v36, %v1017_v36  ;;  %v1635_v44 = vpack.c.bf16 %v1049_v37, %v1049_v37 }
 0x132   : > { %1335 = vst.msk [vmem:[%s1952_s10 + $0x70] sm:$0xf] %vm1306_vm1, %v1600_v39  ;;  %1367 = vst.msk [vmem:[%s1952_s10 + $0xf0] sm:$0xf] %vm1306_vm1, %v1632_v40  ;;  %v1601_v38 = vpack.c.bf16 %v1015_v41, %v1015_v41  ;;  %v1633_v45 = vpack.c.bf16 %v1047_v42, %v1047_v42 }
 0x133   : > { %1338 = vst.msk [vmem:[%s1952_s10 + $0x7c] sm:$0xf] %vm1306_vm1, %v1603_v43  ;;  %1370 = vst.msk [vmem:[%s1952_s10 + $0xfc] sm:$0xf] %vm1306_vm1, %v1635_v44 }
 0x134   : > { %1336 = vst.msk [vmem:[%s1952_s10 + $0x74] sm:$0xf] %vm1306_vm1, %v1601_v38  ;;  %1368 = vst.msk [vmem:[%s1952_s10 + $0xf4] sm:$0xf] %vm1306_vm1, %v1633_v45 }
 0x135 PF: > { %s14_s15 = sadd.s32 1, %s1802_s15  }
 0x136   : > { %p11_p4 = scmp.ge.s32.totalorder %s14_s15, 22  }
 0x138   :  { %13 = sbr.rel (!%p11_p4) target bundleno = 1 (0x1), region = 66 }

// kernel: basenet_forward.6
= control target key start
LH: loop header
LB: loop body
LE: loop exit
PB: predicated region body
PF: predicated region fallthrough
CT: control target
= control target key end

     0   :  { %s2072_s15 = smov 0   ;;  %s2529_s0 = inlined_call_operand.vmem [shape: bf16[7168,216], index: 0, kind: input, shape index: {}]   ;;  %s2530_s1 = inlined_call_operand.vmem [shape: bf16[216,16], index: 1, kind: input, shape index: {}]   ;;  %s2531_s2 = inlined_call_operand.vmem [shape: f32[1,16], index: 2, kind: input, shape index: {}]   ;;  %s2532_s3 = inlined_call_operand.vmem [shape: f32[1,16], index: 3, kind: input, shape index: {}]   ;;  %s2533_s4 = inlined_call_operand.vmem [shape: bf16[7168,16], index: 4, kind: output, shape index: {}]  }
   0x1 LB: > { %s1638_s16 = sadd.s32 4294967295, %s2044_s15   ;;  %p1642_p0 = scmp.ge.s32.totalorder %s2044_s15, 1  ;;  %s2044_s15 = sphi %s2072_s15, %s14_s15  }
   0x2   : > { %p164_p1 = scmp.lt.s32.totalorder %s2044_s15, 15 }
   0x4   : > { %p165_p2 = pnand %p1642_p0, %p164_p1 }
   0x5   : > { %v1928_v0 = vld [vmem:[%s2530_s1] sm:$0xff] (!%p165_p2)   ;;  %v2046_v1 = vmov (!%p165_p2), 0   ;;  %v1929_v2 = vld [vmem:[%s2530_s1 + $0x8] sm:$0xff] (!%p165_p2)   ;;  %s1643_s21 = sshll.u32 (!%p165_p2), %s1638_s16, 6  ;;  %v1930_v3 = vld [vmem:[%s2530_s1 + $0x10] sm:$0xff] (!%p165_p2)   ;;  %vm665_vm0 = vcmask (!%p165_p2), 719872  }
   0x6   : > { %168 = sbr.rel (%p165_p2) target bundleno = 405 (0x195), region = 36  ;;  %766 = vmatprep.subr.bf16.mxu0 (!%p165_p2), %v2046_v1  ;;  %1891 = vmatprep.subr.bf16.mxu1 (!%p165_p2), %v2046_v1  ;;  %p192_p3 = scmp.lt.s32.totalorder (!%p165_p2), %s1643_s21, 895  ;;  %v1931_v4 = vld [vmem:[%s2530_s1 + $0x18] sm:$0xff] (!%p165_p2)   ;;  %v1932_v5 = vld [vmem:[%s2530_s1 + $0x20] sm:$0xff] (!%p165_p2)   ;;  %v1933_v8 = vld [vmem:[%s2530_s1 + $0x28] sm:$0xff] (!%p165_p2)   ;;  %vm762_vm1 = vcmask (!%p165_p2), 1043456  }
   0x7   : > { %767 = vmatpush1.bf16.msra.mxu0 (!%p165_p2), %v1928_v0  ;;  %1905 = vmatpush1.bf16.msra.mxu1 (!%p165_p2), %v1928_v0  ;;  %v1934_v9 = vld [vmem:[%s2530_s1 + $0x30] sm:$0xff] (!%p165_p2)   ;;  %v1935_v10 = vld [vmem:[%s2530_s1 + $0x38] sm:$0xff] (!%p165_p2)   ;;  %v1936_v11 = vld [vmem:[%s2530_s1 + $0x40] sm:$0xff] (!%p165_p2)   ;;  %vm1517_vm2 = vcmask (!%p165_p2), 125952  }
   0x8   : > { %768 = vmatprep.subr.bf16.mxu0 (!%p165_p2), %v2046_v1  ;;  %1892 = vmatprep.subr.bf16.mxu1 (!%p165_p2), %v2046_v1  ;;  %v1937_v12 = vld [vmem:[%s2530_s1 + $0x48] sm:$0xff] (!%p165_p2)   ;;  %v1938_v13 = vld [vmem:[%s2530_s1 + $0x50] sm:$0xff] (!%p165_p2)   ;;  %v1939_v14 = vld [vmem:[%s2530_s1 + $0x58] sm:$0xff] (!%p165_p2)  }
   0x9   : > { %v1940_v15 = vld [vmem:[%s2530_s1 + $0x60] sm:$0xff] (!%p165_p2)   ;;  %v1941_v16 = vld [vmem:[%s2530_s1 + $0x68] ss:$0 sps:$4 sm:$0xff] (!%p165_p2)  }
   0xa   : > { %v764_v17 = vsel (!%p165_p2), %vm762_vm1, %v1941_v16, 0  ;;  %v2257_v16 = vld [vmem:[%s2531_s2] ss:$0 sm:$0xff] (!%p165_p2) }
   0xb   : > { %769 = vmatpush1.bf16.msra.mxu0 (!%p165_p2), %v1929_v2  ;;  %1906 = vmatpush1.bf16.msra.mxu1 (!%p165_p2), %v1929_v2 }
   0xc   : > { %770 = vmatprep.subr.bf16.mxu0 (!%p165_p2), %v2046_v1  ;;  %1893 = vmatprep.subr.bf16.mxu1 (!%p165_p2), %v2046_v1 }
   0xd   : > { %s2535_s21 = smov (!%p192_p3, %s1643_s21), 895 }
   0xe   : > { %s1826_s24 = sshll.u32 %s2535_s21, 3 }
   0xf   : > { %771 = vmatpush1.bf16.msra.mxu0 %v1930_v3  ;;  %1907 = vmatpush1.bf16.msra.mxu1 %v1930_v3  ;;  %s2106_s29 = scalar_lea.vmem %s2529_s0, %s1826_s24 }
  0x10   : > { %772 = vmatprep.subr.bf16.mxu0 %v2046_v1  ;;  %1894 = vmatprep.subr.bf16.mxu1 %v2046_v1  ;;  %v1944_v6 = vld [vmem:[%s2106_s29 + $0x4] ss:$8 sps:$4 sm:$0xff]   ;;  %v1942_v18 = vld [vmem:[%s2106_s29] ss:$8 sps:$4 sm:$0xff]   ;;  %v1948_v20 = vld [vmem:[%s2106_s29 + $0x14] ss:$8 sps:$4 sm:$0xff]  }
  0x11   : > { %1726 = vmatprep.mubr.msk.bf16.mxu0 %vm665_vm0, %v1944_v6  ;;  %v1947_v7 = vld [vmem:[%s2106_s29 + $0x104] ss:$8 sps:$4 sm:$0xff]   ;;  %v1945_v19 = vld [vmem:[%s2106_s29 + $0x100] ss:$8 sps:$4 sm:$0xff]   ;;  %v1950_v21 = vld [vmem:[%s2106_s29 + $0x114] ss:$8 sps:$4 sm:$0xff]  }
  0x12   : > { %1742 = vmatprep.mubr.msk.bf16.mxu1 %vm665_vm0, %v1947_v7  ;;  %v1952_v22 = vld [vmem:[%s2106_s29 + $0x10] ss:$8 sps:$4 sm:$0xff]   ;;  %v1954_v24 = vld [vmem:[%s2106_s29 + $0x24] ss:$8 sps:$4 sm:$0xff]   ;;  %v1958_v26 = vld [vmem:[%s2106_s29 + $0x20] ss:$8 sps:$4 sm:$0xff]  }
  0x13   : > { %773 = vmatpush1.bf16.msra.mxu0 %v1931_v4  ;;  %1908 = vmatpush1.bf16.msra.mxu1 %v1931_v4  ;;  %v1953_v23 = vld [vmem:[%s2106_s29 + $0x110] ss:$8 sps:$4 sm:$0xff]   ;;  %v1956_v25 = vld [vmem:[%s2106_s29 + $0x124] ss:$8 sps:$4 sm:$0xff]   ;;  %v1959_v27 = vld [vmem:[%s2106_s29 + $0x120] ss:$8 sps:$4 sm:$0xff]  }
  0x14   : > { %774 = vmatprep.subr.bf16.mxu0 %v2046_v1  ;;  %1895 = vmatprep.subr.bf16.mxu1 %v2046_v1  ;;  %v1960_v28 = vld [vmem:[%s2106_s29 + $0x34] ss:$8 sps:$4 sm:$0xff]   ;;  %v1964_v30 = vld [vmem:[%s2106_s29 + $0x30] ss:$8 sps:$4 sm:$0xff]   ;;  %v1966_v32 = vld [vmem:[%s2106_s29 + $0x44] ss:$8 sps:$4 sm:$0xff]  }
  0x15   : > { %v1962_v29 = vld [vmem:[%s2106_s29 + $0x134] ss:$8 sps:$4 sm:$0xff]   ;;  %v1965_v31 = vld [vmem:[%s2106_s29 + $0x130] ss:$8 sps:$4 sm:$0xff]   ;;  %v1968_v33 = vld [vmem:[%s2106_s29 + $0x144] ss:$8 sps:$4 sm:$0xff]  }
  0x16   : > { %v1970_v34 = vld [vmem:[%s2106_s29 + $0x40] ss:$8 sps:$4 sm:$0xff]   ;;  %v1972_v36 = vld [vmem:[%s2106_s29 + $0x54] ss:$8 sps:$4 sm:$0xff]   ;;  %v1976_v38 = vld [vmem:[%s2106_s29 + $0x50] ss:$8 sps:$4 sm:$0xff]  }
  0x17   : > { %775 = vmatpush1.bf16.msra.mxu0 %v1932_v5  ;;  %1909 = vmatpush1.bf16.msra.mxu1 %v1932_v5  ;;  %v1971_v35 = vld [vmem:[%s2106_s29 + $0x140] ss:$8 sps:$4 sm:$0xff]   ;;  %v1974_v37 = vld [vmem:[%s2106_s29 + $0x154] ss:$8 sps:$4 sm:$0xff]   ;;  %v1977_v39 = vld [vmem:[%s2106_s29 + $0x150] ss:$8 sps:$4 sm:$0xff]  }
  0x18   : > { %776 = vmatprep.subr.bf16.mxu0 %v2046_v1  ;;  %1896 = vmatprep.subr.bf16.mxu1 %v2046_v1  ;;  %v1978_v40 = vld [vmem:[%s2106_s29 + $0x64] ss:$8 sps:$4 sm:$0xff]   ;;  %v1982_v42 = vld [vmem:[%s2106_s29 + $0x60] ss:$8 sps:$4 sm:$0xff]   ;;  %v1984_v44 = vld [vmem:[%s2106_s29 + $0x74] ss:$8 sps:$4 sm:$0xff]  }
  0x19   : > { %v1980_v41 = vld [vmem:[%s2106_s29 + $0x164] ss:$8 sps:$4 sm:$0xff]   ;;  %v1983_v43 = vld [vmem:[%s2106_s29 + $0x160] ss:$8 sps:$4 sm:$0xff]   ;;  %v1986_v45 = vld [vmem:[%s2106_s29 + $0x174] ss:$8 sps:$4 sm:$0xff]  }
  0x1a   : > { %v1988_v46 = vld [vmem:[%s2106_s29 + $0x70] ss:$8 sps:$4 sm:$0xff]   ;;  %v1990_v48 = vld [vmem:[%s2106_s29 + $0x84] ss:$8 sps:$4 sm:$0xff]   ;;  %v1994_v50 = vld [vmem:[%s2106_s29 + $0x80] ss:$8 sps:$4 sm:$0xff]  }
  0x1b   : > { %777 = vmatpush1.bf16.msra.mxu0 %v1933_v8  ;;  %1910 = vmatpush1.bf16.msra.mxu1 %v1933_v8  ;;  %v1989_v47 = vld [vmem:[%s2106_s29 + $0x170] ss:$8 sps:$4 sm:$0xff]   ;;  %v1992_v49 = vld [vmem:[%s2106_s29 + $0x184] ss:$8 sps:$4 sm:$0xff]   ;;  %v1995_v51 = vld [vmem:[%s2106_s29 + $0x180] ss:$8 sps:$4 sm:$0xff]  }
  0x1c   : > { %778 = vmatprep.subr.bf16.mxu0 %v2046_v1  ;;  %1897 = vmatprep.subr.bf16.mxu1 %v2046_v1  ;;  %v1996_v52 = vld [vmem:[%s2106_s29 + $0x94] ss:$8 sps:$4 sm:$0xff]   ;;  %v2000_v54 = vld [vmem:[%s2106_s29 + $0x90] ss:$8 sps:$4 sm:$0xff]   ;;  %v2002_v56 = vld [vmem:[%s2106_s29 + $0xa4] ss:$8 sps:$4 sm:$0xff]  }
  0x1d   : > { %v1998_v53 = vld [vmem:[%s2106_s29 + $0x194] ss:$8 sps:$4 sm:$0xff]   ;;  %v2001_v55 = vld [vmem:[%s2106_s29 + $0x190] ss:$8 sps:$4 sm:$0xff]   ;;  %v2004_v57 = vld [vmem:[%s2106_s29 + $0x1a4] ss:$8 sps:$4 sm:$0xff]  }
  0x1e   : > { %v2006_v58 = vld [vmem:[%s2106_s29 + $0xa0] ss:$8 sps:$4 sm:$0xff]   ;;  %v2008_v60 = vld [vmem:[%s2106_s29 + $0xb4] ss:$8 sps:$4 sm:$0xff]   ;;  %v2012_v62 = vld [vmem:[%s2106_s29 + $0xb0] ss:$8 sps:$4 sm:$0xff]  }
  0x1f   : > { %779 = vmatpush1.bf16.msra.mxu0 %v1934_v9  ;;  %1911 = vmatpush1.bf16.msra.mxu1 %v1934_v9  ;;  %v2007_v59 = vld [vmem:[%s2106_s29 + $0x1a0] ss:$8 sps:$4 sm:$0xff]   ;;  %v2010_v61 = vld [vmem:[%s2106_s29 + $0x1b4] ss:$8 sps:$4 sm:$0xff]   ;;  %v2013_v63 = vld [vmem:[%s2106_s29 + $0x1b0] ss:$8 sps:$4 sm:$0xff]  }
  0x20   : > { %780 = vmatprep.subr.bf16.mxu0 %v2046_v1  ;;  %1898 = vmatprep.subr.bf16.mxu1 %v2046_v1  ;;  %v2014_v0 = vld [vmem:[%s2106_s29 + $0xc4] ss:$8 sps:$4 sm:$0xff]   ;;  %v2018_v2 = vld [vmem:[%s2106_s29 + $0xc0] ss:$8 sps:$4 sm:$0xff]   ;;  %v2020_v4 = vld [vmem:[%s2106_s29 + $0xd4] ss:$8 sps:$4 sm:$0xff]  }
  0x21   : > { %v2019_v3 = vld [vmem:[%s2106_s29 + $0x1c0] ss:$8 sps:$4 sm:$0xff]   ;;  %v2022_v5 = vld [vmem:[%s2106_s29 + $0x1d4] ss:$8 sps:$4 sm:$0xff]   ;;  %v2024_v6 = vld [vmem:[%s2106_s29 + $0xd0] ss:$8 sps:$4 sm:$0xff]  }
  0x22   : > { %v2025_v7 = vld [vmem:[%s2106_s29 + $0x1d0] ss:$8 sps:$4 sm:$0xff]   ;;  %v2026_v8 = vld [vmem:[%s2106_s29 + $0xe4] ss:$8 sps:$4 sm:$0xff]  }
  0x23   : > { %781 = vmatpush1.bf16.msra.mxu0 %v1935_v10  ;;  %1912 = vmatpush1.bf16.msra.mxu1 %v1935_v10  ;;  %v2028_v9 = vld [vmem:[%s2106_s29 + $0x1e4] ss:$8 sps:$4 sm:$0xff]   ;;  %v2030_v10 = vld [vmem:[%s2106_s29 + $0xe0] ss:$8 sps:$4 sm:$0xff]  }
  0x24   : > { %782 = vmatprep.subr.bf16.mxu0 %v2046_v1  ;;  %1899 = vmatprep.subr.bf16.mxu1 %v2046_v1 }
  0x27   : > { %783 = vmatpush1.bf16.msra.mxu0 %v1936_v11  ;;  %1913 = vmatpush1.bf16.msra.mxu1 %v1936_v11  ;;  %v2031_v11 = vld [vmem:[%s2106_s29 + $0x1e0] ss:$8 sps:$4 sm:$0xff]  }
  0x28   : > { %784 = vmatprep.subr.bf16.mxu0 %v2046_v1  ;;  %1900 = vmatprep.subr.bf16.mxu1 %v2046_v1 }
  0x2b   : > { %785 = vmatpush1.bf16.msra.mxu0 %v1937_v12  ;;  %1914 = vmatpush1.bf16.msra.mxu1 %v1937_v12  ;;  %v2032_v12 = vld [vmem:[%s2106_s29 + $0xf4] ss:$8 sps:$4 sm:$0xff]  }
  0x2c   : > { %786 = vmatprep.subr.bf16.mxu0 %v2046_v1  ;;  %1901 = vmatprep.subr.bf16.mxu1 %v2046_v1 }
  0x2f   : > { %787 = vmatpush1.bf16.msra.mxu0 %v1938_v13  ;;  %1915 = vmatpush1.bf16.msra.mxu1 %v1938_v13  ;;  %v2034_v13 = vld [vmem:[%s2106_s29 + $0x1f4] ss:$8 sps:$4 sm:$0xff]  }
  0x30   : > { %788 = vmatprep.subr.bf16.mxu0 %v2046_v1  ;;  %1902 = vmatprep.subr.bf16.mxu1 %v2046_v1 }
  0x33   : > { %789 = vmatpush1.bf16.msra.mxu0 %v1939_v14  ;;  %1916 = vmatpush1.bf16.msra.mxu1 %v1939_v14  ;;  %v2036_v14 = vld [vmem:[%s2106_s29 + $0xf0] ss:$8 sps:$4 sm:$0xff]  }
  0x34   : > { %790 = vmatprep.subr.bf16.mxu0 %v2046_v1  ;;  %1903 = vmatprep.subr.bf16.mxu1 %v2046_v1 }
  0x37   : > { %791 = vmatpush1.bf16.msra.mxu0 %v1940_v15  ;;  %1917 = vmatpush1.bf16.msra.mxu1 %v1940_v15  ;;  %v2037_v15 = vld [vmem:[%s2106_s29 + $0x1f0] ss:$8 sps:$4 sm:$0xff]  }
  0x38   : > { %792 = vmatprep.subr.bf16.mxu0 %v2046_v1  ;;  %1904 = vmatprep.subr.bf16.mxu1 %v2046_v1  ;;  %v2016_v1 = vld [vmem:[%s2106_s29 + $0x1c4] ss:$8 sps:$4 sm:$0xff]   ;;  %s1647_s29 = sshll.u32 %s2535_s21, 2 }
  0x39   : > { %s2276_s21 = scalar_lea.vmem %s2533_s4, %s1647_s29 }
  0x3b   : > { %793 = vmatpush1.bf16.msra.mxu0 %v764_v17  ;;  %1918 = vmatpush1.bf16.msra.mxu1 %v764_v17 }
  0x3e   : > { %799 = vmatmul.mubr.bf16.vlgmr.msra.gmra.mrb[0].mxu0 %v1942_v18  ;;  %927 = vmatmul.mubr.bf16.vlgmr.msra.gmra.mrb[0].mxu1 %v1945_v19  ;;  %v2262_v18 = vld [vmem:[%s2532_s3] ss:$0 sm:$0xff] }
  0x3f   : > { %1727 = vmatprep.mubr.msk.bf16.mxu0 %vm665_vm0, %v1948_v20  ;;  %1743 = vmatprep.mubr.msk.bf16.mxu1 %vm665_vm0, %v1950_v21 }
  0x46   : > { %807 = vmatmul.mubr.bf16.gmra.mrb[4].mxu0 %v1952_v22  ;;  %935 = vmatmul.mubr.bf16.gmra.mrb[4].mxu1 %v1953_v23 }
  0x47   : > { %1728 = vmatprep.mubr.msk.bf16.mxu0 %vm665_vm0, %v1954_v24  ;;  %1744 = vmatprep.mubr.msk.bf16.mxu1 %vm665_vm0, %v1956_v25 }
  0x4e   : > { %815 = vmatmul.mubr.bf16.gmra.mrb[8].mxu0 %v1958_v26  ;;  %943 = vmatmul.mubr.bf16.gmra.mrb[8].mxu1 %v1959_v27 }
  0x4f   : > { %1729 = vmatprep.mubr.msk.bf16.mxu0 %vm665_vm0, %v1960_v28  ;;  %1745 = vmatprep.mubr.msk.bf16.mxu1 %vm665_vm0, %v1962_v29 }
  0x56   : > { %823 = vmatmul.mubr.bf16.gmra.mrb[12].mxu0 %v1964_v30  ;;  %951 = vmatmul.mubr.bf16.gmra.mrb[12].mxu1 %v1965_v31 }
  0x57   : > { %1730 = vmatprep.mubr.msk.bf16.mxu0 %vm665_vm0, %v1966_v32  ;;  %1746 = vmatprep.mubr.msk.bf16.mxu1 %vm665_vm0, %v1968_v33 }
  0x5e   : > { %831 = vmatmul.mubr.bf16.gmra.mrb[16].mxu0 %v1970_v34  ;;  %959 = vmatmul.mubr.bf16.gmra.mrb[16].mxu1 %v1971_v35 }
  0x5f   : > { %1731 = vmatprep.mubr.msk.bf16.mxu0 %vm665_vm0, %v1972_v36  ;;  %1747 = vmatprep.mubr.msk.bf16.mxu1 %vm665_vm0, %v1974_v37 }
  0x66   : > { %839 = vmatmul.mubr.bf16.gmra.mrb[20].mxu0 %v1976_v38  ;;  %967 = vmatmul.mubr.bf16.gmra.mrb[20].mxu1 %v1977_v39 }
  0x67   : > { %1732 = vmatprep.mubr.msk.bf16.mxu0 %vm665_vm0, %v1978_v40  ;;  %1748 = vmatprep.mubr.msk.bf16.mxu1 %vm665_vm0, %v1980_v41 }
  0x6e   : > { %847 = vmatmul.mubr.bf16.gmra.mrb[24].mxu0 %v1982_v42  ;;  %975 = vmatmul.mubr.bf16.gmra.mrb[24].mxu1 %v1983_v43 }
  0x6f   : > { %1733 = vmatprep.mubr.msk.bf16.mxu0 %vm665_vm0, %v1984_v44  ;;  %1749 = vmatprep.mubr.msk.bf16.mxu1 %vm665_vm0, %v1986_v45 }
  0x76   : > { %855 = vmatmul.mubr.bf16.gmra.mrb[28].mxu0 %v1988_v46  ;;  %983 = vmatmul.mubr.bf16.gmra.mrb[28].mxu1 %v1989_v47 }
  0x77   : > { %1734 = vmatprep.mubr.msk.bf16.mxu0 %vm665_vm0, %v1990_v48  ;;  %1750 = vmatprep.mubr.msk.bf16.mxu1 %vm665_vm0, %v1992_v49 }
  0x7e   : > { %863 = vmatmul.mubr.bf16.gmra.mrb[32].mxu0 %v1994_v50  ;;  %991 = vmatmul.mubr.bf16.gmra.mrb[32].mxu1 %v1995_v51 }
  0x7f   : > { %1735 = vmatprep.mubr.msk.bf16.mxu0 %vm665_vm0, %v1996_v52  ;;  %1751 = vmatprep.mubr.msk.bf16.mxu1 %vm665_vm0, %v1998_v53 }
  0x86   : > { %871 = vmatmul.mubr.bf16.gmra.mrb[36].mxu0 %v2000_v54  ;;  %999 = vmatmul.mubr.bf16.gmra.mrb[36].mxu1 %v2001_v55 }
  0x87   : > { %1736 = vmatprep.mubr.msk.bf16.mxu0 %vm665_vm0, %v2002_v56  ;;  %1752 = vmatprep.mubr.msk.bf16.mxu1 %vm665_vm0, %v2004_v57 }
  0x8e   : > { %879 = vmatmul.mubr.bf16.gmra.mrb[40].mxu0 %v2006_v58  ;;  %1007 = vmatmul.mubr.bf16.gmra.mrb[40].mxu1 %v2007_v59 }
  0x8f   : > { %1737 = vmatprep.mubr.msk.bf16.mxu0 %vm665_vm0, %v2008_v60  ;;  %1753 = vmatprep.mubr.msk.bf16.mxu1 %vm665_vm0, %v2010_v61 }
  0x96   : > { %887 = vmatmul.mubr.bf16.gmra.mrb[44].mxu0 %v2012_v62  ;;  %1015 = vmatmul.mubr.bf16.gmra.mrb[44].mxu1 %v2013_v63 }
  0x97   : > { %1738 = vmatprep.mubr.msk.bf16.mxu0 %vm665_vm0, %v2014_v0  ;;  %1754 = vmatprep.mubr.msk.bf16.mxu1 %vm665_vm0, %v2016_v1 }
  0x9e   : > { %895 = vmatmul.mubr.bf16.gmra.mrb[48].mxu0 %v2018_v2  ;;  %1023 = vmatmul.mubr.bf16.gmra.mrb[48].mxu1 %v2019_v3 }
  0x9f   : > { %1739 = vmatprep.mubr.msk.bf16.mxu0 %vm665_vm0, %v2020_v4  ;;  %1755 = vmatprep.mubr.msk.bf16.mxu1 %vm665_vm0, %v2022_v5 }
  0xa6   : > { %903 = vmatmul.mubr.bf16.gmra.mrb[52].mxu0 %v2024_v6  ;;  %1031 = vmatmul.mubr.bf16.gmra.mrb[52].mxu1 %v2025_v7 }
  0xa7   : > { %1740 = vmatprep.mubr.msk.bf16.mxu0 %vm665_vm0, %v2026_v8  ;;  %1756 = vmatprep.mubr.msk.bf16.mxu1 %vm665_vm0, %v2028_v9 }
  0xae   : > { %911 = vmatmul.mubr.bf16.gmra.mrb[56].mxu0 %v2030_v10  ;;  %1039 = vmatmul.mubr.bf16.gmra.mrb[56].mxu1 %v2031_v11 }
  0xaf   : > { %1741 = vmatprep.mubr.msk.bf16.mxu0 %vm665_vm0, %v2032_v12  ;;  %1757 = vmatprep.mubr.msk.bf16.mxu1 %vm665_vm0, %v2034_v13 }
  0xb6   : > { %919 = vmatmul.mubr.bf16.gmra.mrb[60].mxu0 %v2036_v14  ;;  %1047 = vmatmul.mubr.bf16.gmra.mrb[60].mxu1 %v2037_v15 }
 0x111   : > { %v800_v17 = vpop.f32.mrb[0].mxu0  ;;  %v928_v19 = vpop.f32.mrb[0].mxu1 }
 0x112   : > { %v1062_v20 = vmul.f32 %v2257_v16, %v800_v17  ;;  %v1094_v21 = vmul.f32 %v2257_v16, %v928_v19  ;;  %v802_v22 = vpop.f32.mrb[1].mxu0  ;;  %v930_v23 = vpop.f32.mrb[1].mxu1 }
 0x113   : > { %v803_v24 = vpop.f32.mrb[2].mxu0  ;;  %v931_v25 = vpop.f32.mrb[2].mxu1 }
 0x114   : > { %v1133_v26 = vadd.f32 %v2262_v18, %v1062_v20  ;;  %v1165_v27 = vadd.f32 %v2262_v18, %v1094_v21  ;;  %v1063_v28 = vmul.f32 %v2257_v16, %v803_v24  ;;  %v1095_v29 = vmul.f32 %v2257_v16, %v931_v25  ;;  %v805_v30 = vpop.f32.mrb[3].mxu0  ;;  %v933_v31 = vpop.f32.mrb[3].mxu1 }
 0x116   : > { %v1197_v32 = vmax.f32 %v1133_v26, 0.0  ;;  %v1229_v33 = vmax.f32 %v1165_v27, 0.0  ;;  %v1134_v34 = vadd.f32 %v2262_v18, %v1063_v28  ;;  %v1166_v35 = vadd.f32 %v2262_v18, %v1095_v29 }
 0x118   : > { %v1827_v36 = vpack.c.bf16 %v1197_v32, %v1197_v32  ;;  %v1859_v37 = vpack.c.bf16 %v1229_v33, %v1229_v33  ;;  %v1198_v38 = vmax.f32 %v1134_v34, 0.0  ;;  %v1230_v39 = vmax.f32 %v1166_v35, 0.0 }
 0x119   : > { %v808_v40 = vpop.f32.mrb[4].mxu0  ;;  %v936_v41 = vpop.f32.mrb[4].mxu1 }
 0x11a   : > { %1518 = vst.msk [vmem:[%s2276_s21] sm:$0xf] %vm1517_vm2, %v1827_v36  ;;  %1550 = vst.msk [vmem:[%s2276_s21 + $0x80] sm:$0xf] %vm1517_vm2, %v1859_v37  ;;  %v1828_v42 = vpack.c.bf16 %v1198_v38, %v1198_v38  ;;  %v1860_v43 = vpack.c.bf16 %v1230_v39, %v1230_v39  ;;  %v1064_v44 = vmul.f32 %v2257_v16, %v808_v40  ;;  %v810_v46 = vpop.f32.mrb[5].mxu0  ;;  %v938_v47 = vpop.f32.mrb[5].mxu1 }
 0x11b   : > { %v1096_v45 = vmul.f32 %v2257_v16, %v936_v41  ;;  %v811_v48 = vpop.f32.mrb[6].mxu0  ;;  %v939_v49 = vpop.f32.mrb[6].mxu1 }
 0x11c   : > { %1519 = vst.msk [vmem:[%s2276_s21 + $0x4] sm:$0xf] %vm1517_vm2, %v1828_v42  ;;  %1551 = vst.msk [vmem:[%s2276_s21 + $0x84] sm:$0xf] %vm1517_vm2, %v1860_v43  ;;  %v1135_v50 = vadd.f32 %v2262_v18, %v1064_v44  ;;  %v1065_v52 = vmul.f32 %v2257_v16, %v811_v48  ;;  %v1097_v53 = vmul.f32 %v2257_v16, %v939_v49  ;;  %v813_v54 = vpop.f32.mrb[7].mxu0  ;;  %v941_v55 = vpop.f32.mrb[7].mxu1 }
 0x11d   : > { %v1167_v51 = vadd.f32 %v2262_v18, %v1096_v45 }
 0x11e   : > { %v1199_v56 = vmax.f32 %v1135_v50, 0.0  ;;  %v1136_v58 = vadd.f32 %v2262_v18, %v1065_v52  ;;  %v1168_v59 = vadd.f32 %v2262_v18, %v1097_v53 }
 0x11f   : > { %v1231_v57 = vmax.f32 %v1167_v51, 0.0 }
 0x120   : > { %v1829_v60 = vpack.c.bf16 %v1199_v56, %v1199_v56  ;;  %v1200_v62 = vmax.f32 %v1136_v58, 0.0  ;;  %v1232_v63 = vmax.f32 %v1168_v59, 0.0 }
 0x121   : > { %v1861_v61 = vpack.c.bf16 %v1231_v57, %v1231_v57  ;;  %v816_v0 = vpop.f32.mrb[8].mxu0  ;;  %v944_v1 = vpop.f32.mrb[8].mxu1 }
 0x122   : > { %1520 = vst.msk [vmem:[%s2276_s21 + $0x8] sm:$0xf] %vm1517_vm2, %v1829_v60  ;;  %v1830_v2 = vpack.c.bf16 %v1200_v62, %v1200_v62  ;;  %v1862_v3 = vpack.c.bf16 %v1232_v63, %v1232_v63  ;;  %v1066_v4 = vmul.f32 %v2257_v16, %v816_v0  ;;  %v1098_v5 = vmul.f32 %v2257_v16, %v944_v1  ;;  %v818_v6 = vpop.f32.mrb[9].mxu0  ;;  %v946_v7 = vpop.f32.mrb[9].mxu1 }
 0x123   : > { %1552 = vst.msk [vmem:[%s2276_s21 + $0x88] sm:$0xf] %vm1517_vm2, %v1861_v61  ;;  %v819_v8 = vpop.f32.mrb[10].mxu0  ;;  %v947_v9 = vpop.f32.mrb[10].mxu1 }
 0x124   : > { %1521 = vst.msk [vmem:[%s2276_s21 + $0xc] sm:$0xf] %vm1517_vm2, %v1830_v2  ;;  %1553 = vst.msk [vmem:[%s2276_s21 + $0x8c] sm:$0xf] %vm1517_vm2, %v1862_v3  ;;  %v1137_v10 = vadd.f32 %v2262_v18, %v1066_v4  ;;  %v1169_v11 = vadd.f32 %v2262_v18, %v1098_v5  ;;  %v1067_v12 = vmul.f32 %v2257_v16, %v819_v8  ;;  %v821_v14 = vpop.f32.mrb[11].mxu0  ;;  %v949_v15 = vpop.f32.mrb[11].mxu1 }
 0x125   : > { %v1099_v13 = vmul.f32 %v2257_v16, %v947_v9 }
 0x126   : > { %v1201_v17 = vmax.f32 %v1137_v10, 0.0  ;;  %v1233_v19 = vmax.f32 %v1169_v11, 0.0  ;;  %v1138_v20 = vadd.f32 %v2262_v18, %v1067_v12 }
 0x127   : > { %v1170_v21 = vadd.f32 %v2262_v18, %v1099_v13 }
 0x128   : > { %v1831_v22 = vpack.c.bf16 %v1201_v17, %v1201_v17  ;;  %v1863_v23 = vpack.c.bf16 %v1233_v19, %v1233_v19  ;;  %v1202_v24 = vmax.f32 %v1138_v20, 0.0 }
 0x129   : > { %v1234_v25 = vmax.f32 %v1170_v21, 0.0  ;;  %v824_v26 = vpop.f32.mrb[12].mxu0  ;;  %v952_v27 = vpop.f32.mrb[12].mxu1 }
 0x12a   : > { %1522 = vst.msk [vmem:[%s2276_s21 + $0x10] sm:$0xf] %vm1517_vm2, %v1831_v22  ;;  %1554 = vst.msk [vmem:[%s2276_s21 + $0x90] sm:$0xf] %vm1517_vm2, %v1863_v23  ;;  %v1832_v28 = vpack.c.bf16 %v1202_v24, %v1202_v24  ;;  %v1068_v30 = vmul.f32 %v2257_v16, %v824_v26  ;;  %v1100_v31 = vmul.f32 %v2257_v16, %v952_v27  ;;  %v826_v32 = vpop.f32.mrb[13].mxu0  ;;  %v954_v33 = vpop.f32.mrb[13].mxu1 }
 0x12b   : > { %v1864_v29 = vpack.c.bf16 %v1234_v25, %v1234_v25  ;;  %v827_v34 = vpop.f32.mrb[14].mxu0  ;;  %v955_v35 = vpop.f32.mrb[14].mxu1 }
 0x12c   : > { %1523 = vst.msk [vmem:[%s2276_s21 + $0x14] sm:$0xf] %vm1517_vm2, %v1832_v28  ;;  %v1139_v36 = vadd.f32 %v2262_v18, %v1068_v30  ;;  %v1171_v37 = vadd.f32 %v2262_v18, %v1100_v31  ;;  %v1069_v38 = vmul.f32 %v2257_v16, %v827_v34  ;;  %v1101_v39 = vmul.f32 %v2257_v16, %v955_v35  ;;  %v829_v40 = vpop.f32.mrb[15].mxu0  ;;  %v957_v41 = vpop.f32.mrb[15].mxu1 }
 0x12d   : > { %1555 = vst.msk [vmem:[%s2276_s21 + $0x94] sm:$0xf] %vm1517_vm2, %v1864_v29 }
 0x12e   : > { %v1203_v42 = vmax.f32 %v1139_v36, 0.0  ;;  %v1235_v43 = vmax.f32 %v1171_v37, 0.0  ;;  %v1140_v44 = vadd.f32 %v2262_v18, %v1069_v38  ;;  %v1172_v45 = vadd.f32 %v2262_v18, %v1101_v39 }
 0x130   : > { %v1833_v46 = vpack.c.bf16 %v1203_v42, %v1203_v42  ;;  %v1865_v47 = vpack.c.bf16 %v1235_v43, %v1235_v43  ;;  %v1204_v48 = vmax.f32 %v1140_v44, 0.0  ;;  %v1236_v49 = vmax.f32 %v1172_v45, 0.0 }
 0x131   : > { %v832_v50 = vpop.f32.mrb[16].mxu0  ;;  %v960_v51 = vpop.f32.mrb[16].mxu1 }
 0x132   : > { %1524 = vst.msk [vmem:[%s2276_s21 + $0x18] sm:$0xf] %vm1517_vm2, %v1833_v46  ;;  %1556 = vst.msk [vmem:[%s2276_s21 + $0x98] sm:$0xf] %vm1517_vm2, %v1865_v47  ;;  %v1834_v52 = vpack.c.bf16 %v1204_v48, %v1204_v48  ;;  %v1866_v53 = vpack.c.bf16 %v1236_v49, %v1236_v49  ;;  %v1070_v54 = vmul.f32 %v2257_v16, %v832_v50  ;;  %v834_v56 = vpop.f32.mrb[17].mxu0  ;;  %v962_v57 = vpop.f32.mrb[17].mxu1 }
 0x133   : > { %v1102_v55 = vmul.f32 %v2257_v16, %v960_v51  ;;  %v835_v58 = vpop.f32.mrb[18].mxu0  ;;  %v963_v59 = vpop.f32.mrb[18].mxu1 }
 0x134   : > { %1525 = vst.msk [vmem:[%s2276_s21 + $0x1c] sm:$0xf] %vm1517_vm2, %v1834_v52  ;;  %1557 = vst.msk [vmem:[%s2276_s21 + $0x9c] sm:$0xf] %vm1517_vm2, %v1866_v53  ;;  %v1141_v60 = vadd.f32 %v2262_v18, %v1070_v54  ;;  %v1071_v62 = vmul.f32 %v2257_v16, %v835_v58  ;;  %v1103_v63 = vmul.f32 %v2257_v16, %v963_v59  ;;  %v837_v0 = vpop.f32.mrb[19].mxu0  ;;  %v965_v1 = vpop.f32.mrb[19].mxu1 }
 0x135   : > { %v1173_v61 = vadd.f32 %v2262_v18, %v1102_v55 }
 0x136   : > { %v1205_v2 = vmax.f32 %v1141_v60, 0.0  ;;  %v1142_v4 = vadd.f32 %v2262_v18, %v1071_v62  ;;  %v1174_v5 = vadd.f32 %v2262_v18, %v1103_v63 }
 0x137   : > { %v1237_v3 = vmax.f32 %v1173_v61, 0.0 }
 0x138   : > { %v1835_v6 = vpack.c.bf16 %v1205_v2, %v1205_v2  ;;  %v1206_v8 = vmax.f32 %v1142_v4, 0.0  ;;  %v1238_v9 = vmax.f32 %v1174_v5, 0.0 }
 0x139   : > { %v1867_v7 = vpack.c.bf16 %v1237_v3, %v1237_v3  ;;  %v840_v10 = vpop.f32.mrb[20].mxu0  ;;  %v968_v11 = vpop.f32.mrb[20].mxu1 }
 0x13a   : > { %1526 = vst.msk [vmem:[%s2276_s21 + $0x20] sm:$0xf] %vm1517_vm2, %v1835_v6  ;;  %v1836_v12 = vpack.c.bf16 %v1206_v8, %v1206_v8  ;;  %v1868_v13 = vpack.c.bf16 %v1238_v9, %v1238_v9  ;;  %v1072_v14 = vmul.f32 %v2257_v16, %v840_v10  ;;  %v1104_v15 = vmul.f32 %v2257_v16, %v968_v11  ;;  %v842_v17 = vpop.f32.mrb[21].mxu0  ;;  %v970_v19 = vpop.f32.mrb[21].mxu1 }
 0x13b   : > { %1558 = vst.msk [vmem:[%s2276_s21 + $0xa0] sm:$0xf] %vm1517_vm2, %v1867_v7  ;;  %v843_v20 = vpop.f32.mrb[22].mxu0  ;;  %v971_v21 = vpop.f32.mrb[22].mxu1 }
 0x13c   : > { %1527 = vst.msk [vmem:[%s2276_s21 + $0x24] sm:$0xf] %vm1517_vm2, %v1836_v12  ;;  %1559 = vst.msk [vmem:[%s2276_s21 + $0xa4] sm:$0xf] %vm1517_vm2, %v1868_v13  ;;  %v1143_v22 = vadd.f32 %v2262_v18, %v1072_v14  ;;  %v1175_v23 = vadd.f32 %v2262_v18, %v1104_v15  ;;  %v1073_v24 = vmul.f32 %v2257_v16, %v843_v20  ;;  %v845_v26 = vpop.f32.mrb[23].mxu0  ;;  %v973_v27 = vpop.f32.mrb[23].mxu1 }
 0x13d   : > { %v1105_v25 = vmul.f32 %v2257_v16, %v971_v21 }
 0x13e   : > { %v1207_v28 = vmax.f32 %v1143_v22, 0.0  ;;  %v1239_v29 = vmax.f32 %v1175_v23, 0.0  ;;  %v1144_v30 = vadd.f32 %v2262_v18, %v1073_v24 }
 0x13f   : > { %v1176_v31 = vadd.f32 %v2262_v18, %v1105_v25 }
 0x140   : > { %v1837_v32 = vpack.c.bf16 %v1207_v28, %v1207_v28  ;;  %v1869_v33 = vpack.c.bf16 %v1239_v29, %v1239_v29  ;;  %v1208_v34 = vmax.f32 %v1144_v30, 0.0 }
 0x141   : > { %v1240_v35 = vmax.f32 %v1176_v31, 0.0  ;;  %v848_v36 = vpop.f32.mrb[24].mxu0  ;;  %v976_v37 = vpop.f32.mrb[24].mxu1 }
 0x142   : > { %1528 = vst.msk [vmem:[%s2276_s21 + $0x28] sm:$0xf] %vm1517_vm2, %v1837_v32  ;;  %1560 = vst.msk [vmem:[%s2276_s21 + $0xa8] sm:$0xf] %vm1517_vm2, %v1869_v33  ;;  %v1838_v38 = vpack.c.bf16 %v1208_v34, %v1208_v34  ;;  %v1074_v40 = vmul.f32 %v2257_v16, %v848_v36  ;;  %v1106_v41 = vmul.f32 %v2257_v16, %v976_v37  ;;  %v850_v42 = vpop.f32.mrb[25].mxu0  ;;  %v978_v43 = vpop.f32.mrb[25].mxu1 }
 0x143   : > { %v1870_v39 = vpack.c.bf16 %v1240_v35, %v1240_v35  ;;  %v851_v44 = vpop.f32.mrb[26].mxu0  ;;  %v979_v45 = vpop.f32.mrb[26].mxu1 }
 0x144   : > { %1529 = vst.msk [vmem:[%s2276_s21 + $0x2c] sm:$0xf] %vm1517_vm2, %v1838_v38  ;;  %v1145_v46 = vadd.f32 %v2262_v18, %v1074_v40  ;;  %v1177_v47 = vadd.f32 %v2262_v18, %v1106_v41  ;;  %v1075_v48 = vmul.f32 %v2257_v16, %v851_v44  ;;  %v1107_v49 = vmul.f32 %v2257_v16, %v979_v45  ;;  %v853_v50 = vpop.f32.mrb[27].mxu0  ;;  %v981_v51 = vpop.f32.mrb[27].mxu1 }
 0x145   : > { %1561 = vst.msk [vmem:[%s2276_s21 + $0xac] sm:$0xf] %vm1517_vm2, %v1870_v39 }
 0x146   : > { %v1209_v52 = vmax.f32 %v1145_v46, 0.0  ;;  %v1241_v53 = vmax.f32 %v1177_v47, 0.0  ;;  %v1146_v54 = vadd.f32 %v2262_v18, %v1075_v48  ;;  %v1178_v55 = vadd.f32 %v2262_v18, %v1107_v49 }
 0x148   : > { %v1839_v56 = vpack.c.bf16 %v1209_v52, %v1209_v52  ;;  %v1871_v57 = vpack.c.bf16 %v1241_v53, %v1241_v53  ;;  %v1210_v58 = vmax.f32 %v1146_v54, 0.0  ;;  %v1242_v59 = vmax.f32 %v1178_v55, 0.0 }
 0x149   : > { %v856_v60 = vpop.f32.mrb[28].mxu0  ;;  %v984_v61 = vpop.f32.mrb[28].mxu1 }
 0x14a   : > { %1530 = vst.msk [vmem:[%s2276_s21 + $0x30] sm:$0xf] %vm1517_vm2, %v1839_v56  ;;  %1562 = vst.msk [vmem:[%s2276_s21 + $0xb0] sm:$0xf] %vm1517_vm2, %v1871_v57  ;;  %v1840_v62 = vpack.c.bf16 %v1210_v58, %v1210_v58  ;;  %v1872_v63 = vpack.c.bf16 %v1242_v59, %v1242_v59  ;;  %v1076_v0 = vmul.f32 %v2257_v16, %v856_v60  ;;  %v858_v2 = vpop.f32.mrb[29].mxu0  ;;  %v986_v3 = vpop.f32.mrb[29].mxu1 }
 0x14b   : > { %v1108_v1 = vmul.f32 %v2257_v16, %v984_v61  ;;  %v859_v4 = vpop.f32.mrb[30].mxu0  ;;  %v987_v5 = vpop.f32.mrb[30].mxu1 }
 0x14c   : > { %1531 = vst.msk [vmem:[%s2276_s21 + $0x34] sm:$0xf] %vm1517_vm2, %v1840_v62  ;;  %1563 = vst.msk [vmem:[%s2276_s21 + $0xb4] sm:$0xf] %vm1517_vm2, %v1872_v63  ;;  %v1147_v6 = vadd.f32 %v2262_v18, %v1076_v0  ;;  %v1077_v8 = vmul.f32 %v2257_v16, %v859_v4  ;;  %v1109_v9 = vmul.f32 %v2257_v16, %v987_v5  ;;  %v861_v10 = vpop.f32.mrb[31].mxu0  ;;  %v989_v11 = vpop.f32.mrb[31].mxu1 }
 0x14d   : > { %v1179_v7 = vadd.f32 %v2262_v18, %v1108_v1 }
 0x14e   : > { %v1211_v12 = vmax.f32 %v1147_v6, 0.0  ;;  %v1148_v14 = vadd.f32 %v2262_v18, %v1077_v8  ;;  %v1180_v15 = vadd.f32 %v2262_v18, %v1109_v9 }
 0x14f   : > { %v1243_v13 = vmax.f32 %v1179_v7, 0.0 }
 0x150   : > { %v1841_v17 = vpack.c.bf16 %v1211_v12, %v1211_v12  ;;  %v1212_v20 = vmax.f32 %v1148_v14, 0.0  ;;  %v1244_v21 = vmax.f32 %v1180_v15, 0.0 }
 0x151   : > { %v1873_v19 = vpack.c.bf16 %v1243_v13, %v1243_v13  ;;  %v864_v22 = vpop.f32.mrb[32].mxu0  ;;  %v992_v23 = vpop.f32.mrb[32].mxu1 }
 0x152   : > { %1532 = vst.msk [vmem:[%s2276_s21 + $0x38] sm:$0xf] %vm1517_vm2, %v1841_v17  ;;  %v1842_v24 = vpack.c.bf16 %v1212_v20, %v1212_v20  ;;  %v1874_v25 = vpack.c.bf16 %v1244_v21, %v1244_v21  ;;  %v1078_v26 = vmul.f32 %v2257_v16, %v864_v22  ;;  %v1110_v27 = vmul.f32 %v2257_v16, %v992_v23  ;;  %v866_v28 = vpop.f32.mrb[33].mxu0  ;;  %v994_v29 = vpop.f32.mrb[33].mxu1 }
 0x153   : > { %1564 = vst.msk [vmem:[%s2276_s21 + $0xb8] sm:$0xf] %vm1517_vm2, %v1873_v19  ;;  %v867_v30 = vpop.f32.mrb[34].mxu0  ;;  %v995_v31 = vpop.f32.mrb[34].mxu1 }
 0x154   : > { %1533 = vst.msk [vmem:[%s2276_s21 + $0x3c] sm:$0xf] %vm1517_vm2, %v1842_v24  ;;  %1565 = vst.msk [vmem:[%s2276_s21 + $0xbc] sm:$0xf] %vm1517_vm2, %v1874_v25  ;;  %v1149_v32 = vadd.f32 %v2262_v18, %v1078_v26  ;;  %v1181_v33 = vadd.f32 %v2262_v18, %v1110_v27  ;;  %v1079_v34 = vmul.f32 %v2257_v16, %v867_v30  ;;  %v869_v36 = vpop.f32.mrb[35].mxu0  ;;  %v997_v37 = vpop.f32.mrb[35].mxu1 }
 0x155   : > { %v1111_v35 = vmul.f32 %v2257_v16, %v995_v31 }
 0x156   : > { %v1213_v38 = vmax.f32 %v1149_v32, 0.0  ;;  %v1245_v39 = vmax.f32 %v1181_v33, 0.0  ;;  %v1150_v40 = vadd.f32 %v2262_v18, %v1079_v34 }
 0x157   : > { %v1182_v41 = vadd.f32 %v2262_v18, %v1111_v35 }
 0x158   : > { %v1843_v42 = vpack.c.bf16 %v1213_v38, %v1213_v38  ;;  %v1875_v43 = vpack.c.bf16 %v1245_v39, %v1245_v39  ;;  %v1214_v44 = vmax.f32 %v1150_v40, 0.0 }
 0x159   : > { %v1246_v45 = vmax.f32 %v1182_v41, 0.0  ;;  %v872_v46 = vpop.f32.mrb[36].mxu0  ;;  %v1000_v47 = vpop.f32.mrb[36].mxu1 }
 0x15a   : > { %1534 = vst.msk [vmem:[%s2276_s21 + $0x40] sm:$0xf] %vm1517_vm2, %v1843_v42  ;;  %1566 = vst.msk [vmem:[%s2276_s21 + $0xc0] sm:$0xf] %vm1517_vm2, %v1875_v43  ;;  %v1844_v48 = vpack.c.bf16 %v1214_v44, %v1214_v44  ;;  %v1080_v50 = vmul.f32 %v2257_v16, %v872_v46  ;;  %v1112_v51 = vmul.f32 %v2257_v16, %v1000_v47  ;;  %v874_v52 = vpop.f32.mrb[37].mxu0  ;;  %v1002_v53 = vpop.f32.mrb[37].mxu1 }
 0x15b   : > { %v1876_v49 = vpack.c.bf16 %v1246_v45, %v1246_v45  ;;  %v875_v54 = vpop.f32.mrb[38].mxu0  ;;  %v1003_v55 = vpop.f32.mrb[38].mxu1 }
 0x15c   : > { %1535 = vst.msk [vmem:[%s2276_s21 + $0x44] sm:$0xf] %vm1517_vm2, %v1844_v48  ;;  %v1151_v56 = vadd.f32 %v2262_v18, %v1080_v50  ;;  %v1183_v57 = vadd.f32 %v2262_v18, %v1112_v51  ;;  %v1081_v58 = vmul.f32 %v2257_v16, %v875_v54  ;;  %v1113_v59 = vmul.f32 %v2257_v16, %v1003_v55  ;;  %v877_v60 = vpop.f32.mrb[39].mxu0  ;;  %v1005_v61 = vpop.f32.mrb[39].mxu1 }
 0x15d   : > { %1567 = vst.msk [vmem:[%s2276_s21 + $0xc4] sm:$0xf] %vm1517_vm2, %v1876_v49 }
 0x15e   : > { %v1215_v62 = vmax.f32 %v1151_v56, 0.0  ;;  %v1247_v63 = vmax.f32 %v1183_v57, 0.0  ;;  %v1152_v0 = vadd.f32 %v2262_v18, %v1081_v58  ;;  %v1184_v1 = vadd.f32 %v2262_v18, %v1113_v59 }
 0x160   : > { %v1845_v2 = vpack.c.bf16 %v1215_v62, %v1215_v62  ;;  %v1877_v3 = vpack.c.bf16 %v1247_v63, %v1247_v63  ;;  %v1216_v4 = vmax.f32 %v1152_v0, 0.0  ;;  %v1248_v5 = vmax.f32 %v1184_v1, 0.0 }
 0x161   : > { %v880_v6 = vpop.f32.mrb[40].mxu0  ;;  %v1008_v7 = vpop.f32.mrb[40].mxu1 }
 0x162   : > { %1536 = vst.msk [vmem:[%s2276_s21 + $0x48] sm:$0xf] %vm1517_vm2, %v1845_v2  ;;  %1568 = vst.msk [vmem:[%s2276_s21 + $0xc8] sm:$0xf] %vm1517_vm2, %v1877_v3  ;;  %v1846_v8 = vpack.c.bf16 %v1216_v4, %v1216_v4  ;;  %v1878_v9 = vpack.c.bf16 %v1248_v5, %v1248_v5  ;;  %v1082_v10 = vmul.f32 %v2257_v16, %v880_v6  ;;  %v882_v12 = vpop.f32.mrb[41].mxu0  ;;  %v1010_v13 = vpop.f32.mrb[41].mxu1 }
 0x163   : > { %v1114_v11 = vmul.f32 %v2257_v16, %v1008_v7  ;;  %v883_v14 = vpop.f32.mrb[42].mxu0  ;;  %v1011_v15 = vpop.f32.mrb[42].mxu1 }
 0x164   : > { %1537 = vst.msk [vmem:[%s2276_s21 + $0x4c] sm:$0xf] %vm1517_vm2, %v1846_v8  ;;  %1569 = vst.msk [vmem:[%s2276_s21 + $0xcc] sm:$0xf] %vm1517_vm2, %v1878_v9  ;;  %v1153_v17 = vadd.f32 %v2262_v18, %v1082_v10  ;;  %v1083_v20 = vmul.f32 %v2257_v16, %v883_v14  ;;  %v1115_v21 = vmul.f32 %v2257_v16, %v1011_v15  ;;  %v885_v22 = vpop.f32.mrb[43].mxu0  ;;  %v1013_v23 = vpop.f32.mrb[43].mxu1 }
 0x165   : > { %v1185_v19 = vadd.f32 %v2262_v18, %v1114_v11 }
 0x166   : > { %v1217_v24 = vmax.f32 %v1153_v17, 0.0  ;;  %v1154_v26 = vadd.f32 %v2262_v18, %v1083_v20  ;;  %v1186_v27 = vadd.f32 %v2262_v18, %v1115_v21 }
 0x167   : > { %v1249_v25 = vmax.f32 %v1185_v19, 0.0 }
 0x168   : > { %v1847_v28 = vpack.c.bf16 %v1217_v24, %v1217_v24  ;;  %v1218_v30 = vmax.f32 %v1154_v26, 0.0  ;;  %v1250_v31 = vmax.f32 %v1186_v27, 0.0 }
 0x169   : > { %v1879_v29 = vpack.c.bf16 %v1249_v25, %v1249_v25  ;;  %v888_v32 = vpop.f32.mrb[44].mxu0  ;;  %v1016_v33 = vpop.f32.mrb[44].mxu1 }
 0x16a   : > { %1538 = vst.msk [vmem:[%s2276_s21 + $0x50] sm:$0xf] %vm1517_vm2, %v1847_v28  ;;  %v1848_v34 = vpack.c.bf16 %v1218_v30, %v1218_v30  ;;  %v1880_v35 = vpack.c.bf16 %v1250_v31, %v1250_v31  ;;  %v1084_v36 = vmul.f32 %v2257_v16, %v888_v32  ;;  %v1116_v37 = vmul.f32 %v2257_v16, %v1016_v33  ;;  %v890_v38 = vpop.f32.mrb[45].mxu0  ;;  %v1018_v39 = vpop.f32.mrb[45].mxu1 }
 0x16b   : > { %1570 = vst.msk [vmem:[%s2276_s21 + $0xd0] sm:$0xf] %vm1517_vm2, %v1879_v29  ;;  %v891_v40 = vpop.f32.mrb[46].mxu0  ;;  %v1019_v41 = vpop.f32.mrb[46].mxu1 }
 0x16c   : > { %1539 = vst.msk [vmem:[%s2276_s21 + $0x54] sm:$0xf] %vm1517_vm2, %v1848_v34  ;;  %1571 = vst.msk [vmem:[%s2276_s21 + $0xd4] sm:$0xf] %vm1517_vm2, %v1880_v35  ;;  %v1155_v42 = vadd.f32 %v2262_v18, %v1084_v36  ;;  %v1187_v43 = vadd.f32 %v2262_v18, %v1116_v37  ;;  %v1085_v44 = vmul.f32 %v2257_v16, %v891_v40  ;;  %v893_v46 = vpop.f32.mrb[47].mxu0  ;;  %v1021_v47 = vpop.f32.mrb[47].mxu1 }
 0x16d   : > { %v1117_v45 = vmul.f32 %v2257_v16, %v1019_v41 }
 0x16e   : > { %v1219_v48 = vmax.f32 %v1155_v42, 0.0  ;;  %v1251_v49 = vmax.f32 %v1187_v43, 0.0  ;;  %v1156_v50 = vadd.f32 %v2262_v18, %v1085_v44 }
 0x16f   : > { %v1188_v51 = vadd.f32 %v2262_v18, %v1117_v45 }
 0x170   : > { %v1849_v52 = vpack.c.bf16 %v1219_v48, %v1219_v48  ;;  %v1881_v53 = vpack.c.bf16 %v1251_v49, %v1251_v49  ;;  %v1220_v54 = vmax.f32 %v1156_v50, 0.0 }
 0x171   : > { %v1252_v55 = vmax.f32 %v1188_v51, 0.0  ;;  %v896_v56 = vpop.f32.mrb[48].mxu0  ;;  %v1024_v57 = vpop.f32.mrb[48].mxu1 }
 0x172   : > { %1540 = vst.msk [vmem:[%s2276_s21 + $0x58] sm:$0xf] %vm1517_vm2, %v1849_v52  ;;  %1572 = vst.msk [vmem:[%s2276_s21 + $0xd8] sm:$0xf] %vm1517_vm2, %v1881_v53  ;;  %v1850_v58 = vpack.c.bf16 %v1220_v54, %v1220_v54  ;;  %v1086_v60 = vmul.f32 %v2257_v16, %v896_v56  ;;  %v1118_v61 = vmul.f32 %v2257_v16, %v1024_v57  ;;  %v898_v62 = vpop.f32.mrb[49].mxu0  ;;  %v1026_v63 = vpop.f32.mrb[49].mxu1 }
 0x173   : > { %v1882_v59 = vpack.c.bf16 %v1252_v55, %v1252_v55  ;;  %v899_v0 = vpop.f32.mrb[50].mxu0  ;;  %v1027_v1 = vpop.f32.mrb[50].mxu1 }
 0x174   : > { %1541 = vst.msk [vmem:[%s2276_s21 + $0x5c] sm:$0xf] %vm1517_vm2, %v1850_v58  ;;  %v1157_v2 = vadd.f32 %v2262_v18, %v1086_v60  ;;  %v1189_v3 = vadd.f32 %v2262_v18, %v1118_v61  ;;  %v1087_v4 = vmul.f32 %v2257_v16, %v899_v0  ;;  %v1119_v5 = vmul.f32 %v2257_v16, %v1027_v1  ;;  %v901_v6 = vpop.f32.mrb[51].mxu0  ;;  %v1029_v7 = vpop.f32.mrb[51].mxu1 }
 0x175   : > { %1573 = vst.msk [vmem:[%s2276_s21 + $0xdc] sm:$0xf] %vm1517_vm2, %v1882_v59 }
 0x176   : > { %v1221_v8 = vmax.f32 %v1157_v2, 0.0  ;;  %v1253_v9 = vmax.f32 %v1189_v3, 0.0  ;;  %v1158_v10 = vadd.f32 %v2262_v18, %v1087_v4  ;;  %v1190_v11 = vadd.f32 %v2262_v18, %v1119_v5 }
 0x178   : > { %v1851_v12 = vpack.c.bf16 %v1221_v8, %v1221_v8  ;;  %v1883_v13 = vpack.c.bf16 %v1253_v9, %v1253_v9  ;;  %v1222_v14 = vmax.f32 %v1158_v10, 0.0  ;;  %v1254_v15 = vmax.f32 %v1190_v11, 0.0 }
 0x179   : > { %v904_v17 = vpop.f32.mrb[52].mxu0  ;;  %v1032_v19 = vpop.f32.mrb[52].mxu1 }
 0x17a   : > { %1542 = vst.msk [vmem:[%s2276_s21 + $0x60] sm:$0xf] %vm1517_vm2, %v1851_v12  ;;  %1574 = vst.msk [vmem:[%s2276_s21 + $0xe0] sm:$0xf] %vm1517_vm2, %v1883_v13  ;;  %v1852_v20 = vpack.c.bf16 %v1222_v14, %v1222_v14  ;;  %v1884_v21 = vpack.c.bf16 %v1254_v15, %v1254_v15  ;;  %v1088_v22 = vmul.f32 %v2257_v16, %v904_v17  ;;  %v906_v24 = vpop.f32.mrb[53].mxu0  ;;  %v1034_v25 = vpop.f32.mrb[53].mxu1 }
 0x17b   : > { %v1120_v23 = vmul.f32 %v2257_v16, %v1032_v19  ;;  %v907_v26 = vpop.f32.mrb[54].mxu0  ;;  %v1035_v27 = vpop.f32.mrb[54].mxu1 }
 0x17c   : > { %1543 = vst.msk [vmem:[%s2276_s21 + $0x64] sm:$0xf] %vm1517_vm2, %v1852_v20  ;;  %1575 = vst.msk [vmem:[%s2276_s21 + $0xe4] sm:$0xf] %vm1517_vm2, %v1884_v21  ;;  %v1159_v28 = vadd.f32 %v2262_v18, %v1088_v22  ;;  %v1089_v30 = vmul.f32 %v2257_v16, %v907_v26  ;;  %v1121_v31 = vmul.f32 %v2257_v16, %v1035_v27  ;;  %v909_v32 = vpop.f32.mrb[55].mxu0  ;;  %v1037_v33 = vpop.f32.mrb[55].mxu1 }
 0x17d   : > { %v1191_v29 = vadd.f32 %v2262_v18, %v1120_v23 }
 0x17e   : > { %v1223_v34 = vmax.f32 %v1159_v28, 0.0  ;;  %v1160_v36 = vadd.f32 %v2262_v18, %v1089_v30  ;;  %v1192_v37 = vadd.f32 %v2262_v18, %v1121_v31 }
 0x17f   : > { %v1255_v35 = vmax.f32 %v1191_v29, 0.0 }
 0x180   : > { %v1853_v38 = vpack.c.bf16 %v1223_v34, %v1223_v34  ;;  %v1224_v40 = vmax.f32 %v1160_v36, 0.0  ;;  %v1256_v41 = vmax.f32 %v1192_v37, 0.0 }
 0x181   : > { %v1885_v39 = vpack.c.bf16 %v1255_v35, %v1255_v35  ;;  %v912_v42 = vpop.f32.mrb[56].mxu0  ;;  %v1040_v43 = vpop.f32.mrb[56].mxu1 }
 0x182   : > { %1544 = vst.msk [vmem:[%s2276_s21 + $0x68] sm:$0xf] %vm1517_vm2, %v1853_v38  ;;  %v1854_v44 = vpack.c.bf16 %v1224_v40, %v1224_v40  ;;  %v1886_v45 = vpack.c.bf16 %v1256_v41, %v1256_v41  ;;  %v1090_v46 = vmul.f32 %v2257_v16, %v912_v42  ;;  %v1122_v47 = vmul.f32 %v2257_v16, %v1040_v43  ;;  %v914_v48 = vpop.f32.mrb[57].mxu0  ;;  %v1042_v49 = vpop.f32.mrb[57].mxu1 }
 0x183   : > { %1576 = vst.msk [vmem:[%s2276_s21 + $0xe8] sm:$0xf] %vm1517_vm2, %v1885_v39  ;;  %v915_v50 = vpop.f32.mrb[58].mxu0  ;;  %v1043_v51 = vpop.f32.mrb[58].mxu1 }
 0x184   : > { %1545 = vst.msk [vmem:[%s2276_s21 + $0x6c] sm:$0xf] %vm1517_vm2, %v1854_v44  ;;  %1577 = vst.msk [vmem:[%s2276_s21 + $0xec] sm:$0xf] %vm1517_vm2, %v1886_v45  ;;  %v1161_v52 = vadd.f32 %v2262_v18, %v1090_v46  ;;  %v1193_v53 = vadd.f32 %v2262_v18, %v1122_v47  ;;  %v1091_v54 = vmul.f32 %v2257_v16, %v915_v50  ;;  %v917_v56 = vpop.f32.mrb[59].mxu0  ;;  %v1045_v57 = vpop.f32.mrb[59].mxu1 }
 0x185   : > { %v1123_v55 = vmul.f32 %v2257_v16, %v1043_v51 }
 0x186   : > { %v1225_v58 = vmax.f32 %v1161_v52, 0.0  ;;  %v1257_v59 = vmax.f32 %v1193_v53, 0.0  ;;  %v1162_v60 = vadd.f32 %v2262_v18, %v1091_v54 }
 0x187   : > { %v1194_v61 = vadd.f32 %v2262_v18, %v1123_v55 }
 0x188   : > { %v1855_v62 = vpack.c.bf16 %v1225_v58, %v1225_v58  ;;  %v1887_v63 = vpack.c.bf16 %v1257_v59, %v1257_v59  ;;  %v1226_v0 = vmax.f32 %v1162_v60, 0.0 }
 0x189   : > { %v1258_v1 = vmax.f32 %v1194_v61, 0.0  ;;  %v920_v2 = vpop.f32.mrb[60].mxu0  ;;  %v1048_v3 = vpop.f32.mrb[60].mxu1 }
 0x18a   : > { %1546 = vst.msk [vmem:[%s2276_s21 + $0x70] sm:$0xf] %vm1517_vm2, %v1855_v62  ;;  %1578 = vst.msk [vmem:[%s2276_s21 + $0xf0] sm:$0xf] %vm1517_vm2, %v1887_v63  ;;  %v1856_v4 = vpack.c.bf16 %v1226_v0, %v1226_v0  ;;  %v1092_v6 = vmul.f32 %v2257_v16, %v920_v2  ;;  %v1124_v7 = vmul.f32 %v2257_v16, %v1048_v3  ;;  %v922_v8 = vpop.f32.mrb[61].mxu0  ;;  %v1050_v9 = vpop.f32.mrb[61].mxu1 }
 0x18b   : > { %v1888_v5 = vpack.c.bf16 %v1258_v1, %v1258_v1  ;;  %v923_v10 = vpop.f32.mrb[62].mxu0  ;;  %v1051_v11 = vpop.f32.mrb[62].mxu1 }
 0x18c   : > { %1547 = vst.msk [vmem:[%s2276_s21 + $0x74] sm:$0xf] %vm1517_vm2, %v1856_v4  ;;  %v1163_v12 = vadd.f32 %v2262_v18, %v1092_v6  ;;  %v1195_v13 = vadd.f32 %v2262_v18, %v1124_v7  ;;  %v1093_v14 = vmul.f32 %v2257_v16, %v923_v10  ;;  %v1125_v15 = vmul.f32 %v2257_v16, %v1051_v11  ;;  %v925_v17 = vpop.f32.mrb[63].mxu0  ;;  %v1053_v19 = vpop.f32.mrb[63].mxu1 }
 0x18d   : > { %1579 = vst.msk [vmem:[%s2276_s21 + $0xf4] sm:$0xf] %vm1517_vm2, %v1888_v5 }
 0x18e   : > { %v1227_v20 = vmax.f32 %v1163_v12, 0.0  ;;  %v1259_v21 = vmax.f32 %v1195_v13, 0.0  ;;  %v1164_v22 = vadd.f32 %v2262_v18, %v1093_v14  ;;  %v1196_v23 = vadd.f32 %v2262_v18, %v1125_v15 }
 0x190   : > { %v1857_v24 = vpack.c.bf16 %v1227_v20, %v1227_v20  ;;  %v1889_v25 = vpack.c.bf16 %v1259_v21, %v1259_v21  ;;  %v1228_v26 = vmax.f32 %v1164_v22, 0.0  ;;  %v1260_v27 = vmax.f32 %v1196_v23, 0.0 }
 0x192   : > { %1548 = vst.msk [vmem:[%s2276_s21 + $0x78] sm:$0xf] %vm1517_vm2, %v1857_v24  ;;  %1580 = vst.msk [vmem:[%s2276_s21 + $0xf8] sm:$0xf] %vm1517_vm2, %v1889_v25  ;;  %v1858_v28 = vpack.c.bf16 %v1228_v26, %v1228_v26  ;;  %v1890_v29 = vpack.c.bf16 %v1260_v27, %v1260_v27 }
 0x194   : > { %1549 = vst.msk [vmem:[%s2276_s21 + $0x7c] sm:$0xf] %vm1517_vm2, %v1858_v28  ;;  %1581 = vst.msk [vmem:[%s2276_s21 + $0xfc] sm:$0xf] %vm1517_vm2, %v1890_v29 }
 0x195 PF: > { %s14_s15 = sadd.s32 1, %s2044_s15  }
 0x196   : > { %p11_p4 = scmp.ge.s32.totalorder %s14_s15, 16  }
 0x198   :  { %13 = sbr.rel (!%p11_p4) target bundleno = 1 (0x1), region = 66 }

// kernel: basenet_forward.7
= control target key start
LH: loop header
LB: loop body
LE: loop exit
PB: predicated region body
PF: predicated region fallthrough
CT: control target
= control target key end

     0   :  { %s1319_s15 = smov 0   ;;  %s1550_s0 = inlined_call_operand.vmem [shape: bf16[256,432], index: 0, kind: input, shape index: {}]   ;;  %s1551_s1 = inlined_call_operand.vmem [shape: bf16[432,32], index: 1, kind: input, shape index: {}]   ;;  %s1552_s2 = inlined_call_operand.vmem [shape: f32[1,32], index: 2, kind: input, shape index: {}]   ;;  %s1553_s3 = inlined_call_operand.vmem [shape: f32[1,32], index: 3, kind: input, shape index: {}]   ;;  %s1554_s4 = inlined_call_operand.vmem [shape: bf16[256,32], index: 4, kind: output, shape index: {}]  }
   0x1 LB: > { %s1023_s16 = sadd.s32 4294967295, %s1291_s15   ;;  %p1027_p0 = scmp.ge.s32.totalorder %s1291_s15, 1  ;;  %s1291_s15 = sphi %s1319_s15, %s14_s15  }
   0x2   : > { %p164_p1 = scmp.lt.s32.totalorder %s1291_s15, 3 }
   0x4   : > { %p165_p2 = pnand %p1027_p0, %p164_p1 }
   0x5   : > { %v1210_v0 = vld [vmem:[%s1551_s1 + $0x80] sm:$0xff] (!%p165_p2)   ;;  %v1293_v1 = vmov (!%p165_p2), 0   ;;  %v1211_v2 = vld [vmem:[%s1551_s1 + $0x88] sm:$0xff] (!%p165_p2)   ;;  %v1214_v5 = vld [vmem:[%s1551_s1 + $0x90] sm:$0xff] (!%p165_p2)   ;;  %s1028_s9 = sshll.u32 (!%p165_p2), %s1023_s16, 4  ;;  %vm605_vm0 = vcmask (!%p165_p2), 392192  }
   0x6   : > { %168 = sbr.rel (%p165_p2) target bundleno = 331 (0x14b), region = 36  ;;  %727 = vmatprep.subr.bf16.mxu1 (!%p165_p2), %v1293_v1  ;;  %v1212_v3 = vld [vmem:[%s1551_s1 + $0x40] sm:$0xff] (!%p165_p2)   ;;  %v1215_v6 = vld [vmem:[%s1551_s1 + $0x48] sm:$0xff] (!%p165_p2)   ;;  %v1218_v8 = vld [vmem:[%s1551_s1 + $0x50] sm:$0xff] (!%p165_p2)   ;;  %p192_p3 = scmp.lt.s32.totalorder (!%p165_p2), %s1028_s9, 31  ;;  %vm950_vm1 = vcmask (!%p165_p2), 257024  }
   0x7   : > { %728 = vmatpush1.bf16.msra.mxu1 (!%p165_p2), %v1210_v0  ;;  %v1213_v4 = vld [vmem:[%s1551_s1] sm:$0xff] (!%p165_p2)   ;;  %1137 = vmatprep.subr.bf16.mxu0 (!%p165_p2), %v1212_v3  ;;  %v1216_v7 = vld [vmem:[%s1551_s1 + $0x8] sm:$0xff] (!%p165_p2)   ;;  %v1219_v9 = vld [vmem:[%s1551_s1 + $0x10] sm:$0xff] (!%p165_p2)  }
   0x8   : > { %729 = vmatprep.subr.bf16.mxu1 (!%p165_p2), %v1293_v1  ;;  %1138 = vmatpush3.bf16.msra.mxu0 (!%p165_p2), %v1213_v4  ;;  %v1217_v10 = vld [vmem:[%s1551_s1 + $0x98] sm:$0xff] (!%p165_p2)   ;;  %v1220_v12 = vld [vmem:[%s1551_s1 + $0xa0] sm:$0xff] (!%p165_p2)   ;;  %v1223_v15 = vld [vmem:[%s1551_s1 + $0xa8] sm:$0xff] (!%p165_p2)  }
   0x9   : > { %1139 = vmatprep.subr.bf16.mxu0 (!%p165_p2), %v1215_v6  ;;  %v1221_v11 = vld [vmem:[%s1551_s1 + $0x58] sm:$0xff] (!%p165_p2)   ;;  %v1224_v14 = vld [vmem:[%s1551_s1 + $0x60] sm:$0xff] (!%p165_p2)   ;;  %v1227_v17 = vld [vmem:[%s1551_s1 + $0x68] sm:$0xff] (!%p165_p2)  }
   0xa   : > { %v1222_v13 = vld [vmem:[%s1551_s1 + $0x18] sm:$0xff] (!%p165_p2)   ;;  %v1225_v16 = vld [vmem:[%s1551_s1 + $0x20] sm:$0xff] (!%p165_p2)   ;;  %v1226_v18 = vld [vmem:[%s1551_s1 + $0xb0] sm:$0xff] (!%p165_p2)  }
   0xb   : > { %730 = vmatpush1.bf16.msra.mxu1 (!%p165_p2), %v1211_v2  ;;  %v1228_v19 = vld [vmem:[%s1551_s1 + $0x28] sm:$0xff] (!%p165_p2)   ;;  %v1230_v20 = vld [vmem:[%s1551_s1 + $0x70] sm:$0xff] (!%p165_p2)   ;;  %v1229_v21 = vld [vmem:[%s1551_s1 + $0xb8] sm:$0xff] (!%p165_p2)  }
   0xc   : > { %731 = vmatprep.subr.bf16.mxu1 (!%p165_p2), %v1293_v1  ;;  %1140 = vmatpush3.bf16.msra.mxu0 (!%p165_p2), %v1216_v7  ;;  %v1231_v22 = vld [vmem:[%s1551_s1 + $0x30] sm:$0xff] (!%p165_p2)   ;;  %v1233_v23 = vld [vmem:[%s1551_s1 + $0x78] sm:$0xff] (!%p165_p2)   ;;  %v1232_v27 = vld [vmem:[%s1551_s1 + $0xc0] sm:$0xff] (!%p165_p2)  }
   0xd   : > { %1141 = vmatprep.subr.bf16.mxu0 %v1218_v8  ;;  %s1556_s9 = smov (!%p192_p3, %s1028_s9), 31  ;;  %v1234_v25 = vld [vmem:[%s1551_s1 + $0x38] sm:$0xff]   ;;  %v1238_v30 = vld [vmem:[%s1551_s1 + $0xc8] sm:$0xff]   ;;  %v1239_v31 = vld [vmem:[%s1551_s1 + $0xd0] sm:$0xff]  }
   0xe   : > { %s1120_s29 = sshll.u32 %s1556_s9, 4  ;;  %v1470_v4 = vld [vmem:[%s1552_s2] ss:$0 sm:$0xff]  ;;  %s1032_s5 = sshll.u32 %s1556_s9, 2 }
   0xf   : > { %732 = vmatpush1.bf16.msra.mxu1 %v1214_v5  ;;  %s1400_s11 = scalar_lea.vmem %s1550_s0, %s1120_s29  ;;  %s1485_s8 = scalar_lea.vmem %s1554_s4, %s1032_s5 }
  0x10   : > { %733 = vmatprep.subr.bf16.mxu1 %v1293_v1  ;;  %1142 = vmatpush3.bf16.msra.mxu0 %v1219_v9  ;;  %v1237_v24 = vld [vmem:[%s1400_s11 + $0x4] ss:$16 sps:$4 sm:$0xff]   ;;  %v1242_v26 = vld [vmem:[%s1400_s11 + $0xc] ss:$16 sps:$4 sm:$0xff]   ;;  %v1235_v28 = vld [vmem:[%s1400_s11] ss:$16 sps:$4 sm:$0xff]  }
  0x11   : > { %1143 = vmatprep.subr.bf16.mxu0 %v1221_v11  ;;  %662 = vmatprep.mubr.bf16.mxu0 %v1237_v24  ;;  %v1243_v29 = vld [vmem:[%s1400_s11 + $0x24] ss:$16 sps:$4 sm:$0xff]   ;;  %v1245_v32 = vld [vmem:[%s1400_s11 + $0x20] ss:$16 sps:$4 sm:$0xff]   ;;  %v1240_v33 = vld [vmem:[%s1400_s11 + $0x8] ss:$16 sps:$4 sm:$0xff]  }
  0x12   : > { %1092 = vmatprep.mubr.msk.bf16.mxu1 %vm605_vm0, %v1242_v26  ;;  %v1249_v34 = vld [vmem:[%s1400_s11 + $0x44] ss:$16 sps:$4 sm:$0xff]   ;;  %v1246_v35 = vld [vmem:[%s1400_s11 + $0x2c] ss:$16 sps:$4 sm:$0xff]   ;;  %v1251_v36 = vld [vmem:[%s1400_s11 + $0x40] ss:$16 sps:$4 sm:$0xff]  }
  0x13   : > { %734 = vmatpush1.bf16.msra.mxu1 %v1217_v10  ;;  %v1248_v37 = vld [vmem:[%s1400_s11 + $0x28] ss:$16 sps:$4 sm:$0xff]   ;;  %v1255_v38 = vld [vmem:[%s1400_s11 + $0x64] ss:$16 sps:$4 sm:$0xff]   ;;  %v1252_v39 = vld [vmem:[%s1400_s11 + $0x4c] ss:$16 sps:$4 sm:$0xff]  }
  0x14   : > { %735 = vmatprep.subr.bf16.mxu1 %v1293_v1  ;;  %1144 = vmatpush3.bf16.msra.mxu0 %v1222_v13  ;;  %v1257_v40 = vld [vmem:[%s1400_s11 + $0x60] ss:$16 sps:$4 sm:$0xff]   ;;  %v1254_v41 = vld [vmem:[%s1400_s11 + $0x48] ss:$16 sps:$4 sm:$0xff]   ;;  %v1261_v42 = vld [vmem:[%s1400_s11 + $0x84] ss:$16 sps:$4 sm:$0xff]  }
  0x15   : > { %1145 = vmatprep.subr.bf16.mxu0 %v1224_v14  ;;  %v1258_v43 = vld [vmem:[%s1400_s11 + $0x6c] ss:$16 sps:$4 sm:$0xff]   ;;  %v1263_v44 = vld [vmem:[%s1400_s11 + $0x80] ss:$16 sps:$4 sm:$0xff]   ;;  %v1260_v45 = vld [vmem:[%s1400_s11 + $0x68] ss:$16 sps:$4 sm:$0xff]  }
  0x16   : > { %v1267_v46 = vld [vmem:[%s1400_s11 + $0xa4] ss:$16 sps:$4 sm:$0xff]   ;;  %v1264_v47 = vld [vmem:[%s1400_s11 + $0x8c] ss:$16 sps:$4 sm:$0xff]   ;;  %v1269_v48 = vld [vmem:[%s1400_s11 + $0xa0] ss:$16 sps:$4 sm:$0xff]  }
  0x17   : > { %736 = vmatpush1.bf16.msra.mxu1 %v1220_v12  ;;  %v1266_v49 = vld [vmem:[%s1400_s11 + $0x88] ss:$16 sps:$4 sm:$0xff]   ;;  %v1273_v50 = vld [vmem:[%s1400_s11 + $0xc4] ss:$16 sps:$4 sm:$0xff]   ;;  %v1270_v51 = vld [vmem:[%s1400_s11 + $0xac] ss:$16 sps:$4 sm:$0xff]  }
  0x18   : > { %737 = vmatprep.subr.bf16.mxu1 %v1293_v1  ;;  %1146 = vmatpush3.bf16.msra.mxu0 %v1225_v16  ;;  %v1275_v52 = vld [vmem:[%s1400_s11 + $0xc0] ss:$16 sps:$4 sm:$0xff]   ;;  %v1272_v53 = vld [vmem:[%s1400_s11 + $0xa8] ss:$16 sps:$4 sm:$0xff]   ;;  %v1279_v54 = vld [vmem:[%s1400_s11 + $0xe4] ss:$16 sps:$4 sm:$0xff]  }
  0x19   : > { %1147 = vmatprep.subr.bf16.mxu0 %v1227_v17  ;;  %v1276_v55 = vld [vmem:[%s1400_s11 + $0xcc] ss:$16 sps:$4 sm:$0xff]   ;;  %v1281_v56 = vld [vmem:[%s1400_s11 + $0xe0] ss:$16 sps:$4 sm:$0xff]   ;;  %v1278_v57 = vld [vmem:[%s1400_s11 + $0xc8] ss:$16 sps:$4 sm:$0xff]  }
  0x1a   : > { %v1282_v58 = vld [vmem:[%s1400_s11 + $0xec] ss:$16 sps:$4 sm:$0xff]   ;;  %v1284_v59 = vld [vmem:[%s1400_s11 + $0xe8] ss:$16 sps:$4 sm:$0xff]   ;;  %v1475_v10 = vld [vmem:[%s1553_s3] ss:$0 sm:$0xff] }
  0x1b   : > { %738 = vmatpush1.bf16.msra.mxu1 %v1223_v15 }
  0x1c   : > { %739 = vmatprep.subr.bf16.mxu1 %v1293_v1  ;;  %1148 = vmatpush3.bf16.msra.mxu0 %v1228_v19 }
  0x1d   : > { %1149 = vmatprep.subr.bf16.mxu0 %v1230_v20 }
  0x1f   : > { %740 = vmatpush1.bf16.msra.mxu1 %v1226_v18 }
  0x20   : > { %741 = vmatprep.subr.bf16.mxu1 %v1293_v1  ;;  %1150 = vmatpush3.bf16.msra.mxu0 %v1231_v22 }
  0x21   : > { %1151 = vmatprep.subr.bf16.mxu0 %v1233_v23 }
  0x23   : > { %742 = vmatpush1.bf16.msra.mxu1 %v1229_v21 }
  0x24   : > { %743 = vmatprep.subr.bf16.mxu1 %v1293_v1  ;;  %1152 = vmatpush3.bf16.msra.mxu0 %v1234_v25 }
  0x27   : > { %744 = vmatpush1.bf16.msra.mxu1 %v1232_v27  ;;  %663 = vmatmul.mubr.bf16.vlgmr.msra.gmra.mrb[0].mxu0 %v1235_v28 }
  0x28   : > { %745 = vmatprep.subr.bf16.mxu1 %v1293_v1  ;;  %670 = vmatprep.mubr.bf16.mxu0 %v1243_v29 }
  0x2b   : > { %746 = vmatpush1.bf16.msra.mxu1 %v1238_v30 }
  0x2c   : > { %747 = vmatprep.subr.bf16.mxu1 %v1293_v1 }
  0x2f   : > { %748 = vmatpush1.bf16.msra.mxu1 %v1239_v31  ;;  %671 = vmatmul.mubr.bf16.gmra.mrb[4].mxu0 %v1245_v32 }
  0x30   : > { %678 = vmatprep.mubr.bf16.mxu0 %v1249_v34 }
  0x32   : > { %760 = vmatmul.mubr.bf16.vlgmr.msra.gmra.mrb[0].mxu1 %v1240_v33 }
  0x33   : > { %1093 = vmatprep.mubr.msk.bf16.mxu1 %vm605_vm0, %v1246_v35 }
  0x37   : > { %679 = vmatmul.mubr.bf16.gmra.mrb[8].mxu0 %v1251_v36 }
  0x38   : > { %686 = vmatprep.mubr.bf16.mxu0 %v1255_v38 }
  0x3a   : > { %768 = vmatmul.mubr.bf16.gmra.mrb[4].mxu1 %v1248_v37 }
  0x3b   : > { %1094 = vmatprep.mubr.msk.bf16.mxu1 %vm605_vm0, %v1252_v39 }
  0x3f   : > { %687 = vmatmul.mubr.bf16.gmra.mrb[12].mxu0 %v1257_v40 }
  0x40   : > { %694 = vmatprep.mubr.bf16.mxu0 %v1261_v42 }
  0x42   : > { %776 = vmatmul.mubr.bf16.gmra.mrb[8].mxu1 %v1254_v41 }
  0x43   : > { %1095 = vmatprep.mubr.msk.bf16.mxu1 %vm605_vm0, %v1258_v43 }
  0x47   : > { %695 = vmatmul.mubr.bf16.gmra.mrb[16].mxu0 %v1263_v44 }
  0x48   : > { %702 = vmatprep.mubr.bf16.mxu0 %v1267_v46 }
  0x4a   : > { %784 = vmatmul.mubr.bf16.gmra.mrb[12].mxu1 %v1260_v45 }
  0x4b   : > { %1096 = vmatprep.mubr.msk.bf16.mxu1 %vm605_vm0, %v1264_v47 }
  0x4f   : > { %703 = vmatmul.mubr.bf16.gmra.mrb[20].mxu0 %v1269_v48 }
  0x50   : > { %710 = vmatprep.mubr.bf16.mxu0 %v1273_v50 }
  0x52   : > { %792 = vmatmul.mubr.bf16.gmra.mrb[16].mxu1 %v1266_v49 }
  0x53   : > { %1097 = vmatprep.mubr.msk.bf16.mxu1 %vm605_vm0, %v1270_v51 }
  0x57   : > { %711 = vmatmul.mubr.bf16.gmra.mrb[24].mxu0 %v1275_v52 }
  0x58   : > { %718 = vmatprep.mubr.bf16.mxu0 %v1279_v54 }
  0x5a   : > { %800 = vmatmul.mubr.bf16.gmra.mrb[20].mxu1 %v1272_v53 }
  0x5b   : > { %1098 = vmatprep.mubr.msk.bf16.mxu1 %vm605_vm0, %v1276_v55 }
  0x5f   : > { %719 = vmatmul.mubr.bf16.gmra.mrb[28].mxu0 %v1281_v56 }
  0x62   : > { %808 = vmatmul.mubr.bf16.gmra.mrb[24].mxu1 %v1278_v57 }
  0x63   : > { %1099 = vmatprep.mubr.msk.bf16.mxu1 %vm605_vm0, %v1282_v58 }
  0x6a   : > { %816 = vmatmul.mubr.bf16.gmra.mrb[28].mxu1 %v1284_v59 }
  0xfa   : > { %v1153_v60 = vpop.f32.mrb[0].mxu0 }
  0xfb   : > { %v1154_v61 = vpop.f32.mrb[1].mxu0 }
  0xfc   : > { %v1155_v62 = vadd.f32 %v1154_v61, %v1153_v60  ;;  %v1156_v63 = vpop.f32.mrb[2].mxu0 }
  0xfd   : > { %v1157_v0 = vpop.f32.mrb[3].mxu0 }
  0xfe   : > { %v1158_v1 = vadd.f32 %v1157_v0, %v1156_v63 }
 0x102   : > { %v1159_v2 = vpop.f32.mrb[4].mxu0 }
 0x103   : > { %v1160_v5 = vpop.f32.mrb[5].mxu0 }
 0x104   : > { %v1161_v8 = vadd.f32 %v1160_v5, %v1159_v2  ;;  %v1162_v9 = vpop.f32.mrb[6].mxu0 }
 0x105   : > { %v761_v3 = vpop.f32.mrb[0].mxu1  ;;  %v1163_v12 = vpop.f32.mrb[7].mxu0 }
 0x106   : > { %v762_v6 = vadd.f32 %v1155_v62, %v761_v3  ;;  %v763_v7 = vpop.f32.mrb[1].mxu1  ;;  %v1164_v16 = vadd.f32 %v1163_v12, %v1162_v9 }
 0x107   : > { %v764_v11 = vpop.f32.mrb[2].mxu1 }
 0x108   : > { %v831_v13 = vmul.f32 %v1470_v4, %v762_v6  ;;  %v765_v14 = vadd.f32 %v1158_v1, %v764_v11  ;;  %v766_v15 = vpop.f32.mrb[3].mxu1 }
 0x10a   : > { %v854_v17 = vadd.f32 %v1475_v10, %v831_v13  ;;  %v832_v18 = vmul.f32 %v1470_v4, %v765_v14  ;;  %v1165_v21 = vpop.f32.mrb[8].mxu0 }
 0x10b   : > { %v1166_v23 = vpop.f32.mrb[9].mxu0 }
 0x10c   : > { %v870_v19 = vmax.f32 %v854_v17, 0.0  ;;  %v855_v20 = vadd.f32 %v1475_v10, %v832_v18  ;;  %v1167_v28 = vadd.f32 %v1166_v23, %v1165_v21  ;;  %v1168_v29 = vpop.f32.mrb[10].mxu0 }
 0x10d   : > { %v769_v22 = vpop.f32.mrb[4].mxu1  ;;  %v1169_v31 = vpop.f32.mrb[11].mxu0 }
 0x10e   : > { %v1121_v24 = vpack.c.bf16 %v870_v19, %v870_v19  ;;  %v871_v25 = vmax.f32 %v855_v20, 0.0  ;;  %v770_v26 = vadd.f32 %v1161_v8, %v769_v22  ;;  %v771_v27 = vpop.f32.mrb[5].mxu1  ;;  %v1170_v36 = vadd.f32 %v1169_v31, %v1168_v29 }
 0x10f   : > { %v772_v30 = vpop.f32.mrb[6].mxu1 }
 0x110   : > { %951 = vst.msk [vmem:[%s1485_s8] sm:$0xf] %vm950_vm1, %v1121_v24  ;;  %v1122_v32 = vpack.c.bf16 %v871_v25, %v871_v25  ;;  %v833_v33 = vmul.f32 %v1470_v4, %v770_v26  ;;  %v773_v34 = vadd.f32 %v1164_v16, %v772_v30  ;;  %v774_v35 = vpop.f32.mrb[7].mxu1 }
 0x112   : > { %952 = vst.msk [vmem:[%s1485_s8 + $0x4] sm:$0xf] %vm950_vm1, %v1122_v32  ;;  %v856_v37 = vadd.f32 %v1475_v10, %v833_v33  ;;  %v834_v38 = vmul.f32 %v1470_v4, %v773_v34  ;;  %v1171_v41 = vpop.f32.mrb[12].mxu0 }
 0x113   : > { %v1172_v43 = vpop.f32.mrb[13].mxu0 }
 0x114   : > { %v872_v39 = vmax.f32 %v856_v37, 0.0  ;;  %v857_v40 = vadd.f32 %v1475_v10, %v834_v38  ;;  %v1173_v48 = vadd.f32 %v1172_v43, %v1171_v41  ;;  %v1174_v49 = vpop.f32.mrb[14].mxu0 }
 0x115   : > { %v777_v42 = vpop.f32.mrb[8].mxu1  ;;  %v1175_v51 = vpop.f32.mrb[15].mxu0 }
 0x116   : > { %v1123_v44 = vpack.c.bf16 %v872_v39, %v872_v39  ;;  %v873_v45 = vmax.f32 %v857_v40, 0.0  ;;  %v778_v46 = vadd.f32 %v1167_v28, %v777_v42  ;;  %v779_v47 = vpop.f32.mrb[9].mxu1  ;;  %v1176_v56 = vadd.f32 %v1175_v51, %v1174_v49 }
 0x117   : > { %v780_v50 = vpop.f32.mrb[10].mxu1 }
 0x118   : > { %953 = vst.msk [vmem:[%s1485_s8 + $0x8] sm:$0xf] %vm950_vm1, %v1123_v44  ;;  %v1124_v52 = vpack.c.bf16 %v873_v45, %v873_v45  ;;  %v835_v53 = vmul.f32 %v1470_v4, %v778_v46  ;;  %v781_v54 = vadd.f32 %v1170_v36, %v780_v50  ;;  %v782_v55 = vpop.f32.mrb[11].mxu1 }
 0x11a   : > { %954 = vst.msk [vmem:[%s1485_s8 + $0xc] sm:$0xf] %vm950_vm1, %v1124_v52  ;;  %v858_v57 = vadd.f32 %v1475_v10, %v835_v53  ;;  %v836_v58 = vmul.f32 %v1470_v4, %v781_v54  ;;  %v1177_v61 = vpop.f32.mrb[16].mxu0 }
 0x11b   : > { %v1178_v63 = vpop.f32.mrb[17].mxu0 }
 0x11c   : > { %v874_v59 = vmax.f32 %v858_v57, 0.0  ;;  %v859_v60 = vadd.f32 %v1475_v10, %v836_v58  ;;  %v1179_v5 = vadd.f32 %v1178_v63, %v1177_v61  ;;  %v1180_v6 = vpop.f32.mrb[18].mxu0 }
 0x11d   : > { %v785_v62 = vpop.f32.mrb[12].mxu1  ;;  %v1181_v8 = vpop.f32.mrb[19].mxu0 }
 0x11e   : > { %v1125_v0 = vpack.c.bf16 %v874_v59, %v874_v59  ;;  %v875_v1 = vmax.f32 %v859_v60, 0.0  ;;  %v786_v2 = vadd.f32 %v1173_v48, %v785_v62  ;;  %v787_v3 = vpop.f32.mrb[13].mxu1  ;;  %v1182_v14 = vadd.f32 %v1181_v8, %v1180_v6 }
 0x11f   : > { %v788_v7 = vpop.f32.mrb[14].mxu1 }
 0x120   : > { %955 = vst.msk [vmem:[%s1485_s8 + $0x10] sm:$0xf] %vm950_vm1, %v1125_v0  ;;  %v1126_v9 = vpack.c.bf16 %v875_v1, %v875_v1  ;;  %v837_v11 = vmul.f32 %v1470_v4, %v786_v2  ;;  %v789_v12 = vadd.f32 %v1176_v56, %v788_v7  ;;  %v790_v13 = vpop.f32.mrb[15].mxu1 }
 0x122   : > { %956 = vst.msk [vmem:[%s1485_s8 + $0x14] sm:$0xf] %vm950_vm1, %v1126_v9  ;;  %v860_v15 = vadd.f32 %v1475_v10, %v837_v11  ;;  %v838_v16 = vmul.f32 %v1470_v4, %v789_v12  ;;  %v1183_v19 = vpop.f32.mrb[20].mxu0 }
 0x123   : > { %v1184_v21 = vpop.f32.mrb[21].mxu0 }
 0x124   : > { %v876_v17 = vmax.f32 %v860_v15, 0.0  ;;  %v861_v18 = vadd.f32 %v1475_v10, %v838_v16  ;;  %v1185_v26 = vadd.f32 %v1184_v21, %v1183_v19  ;;  %v1186_v27 = vpop.f32.mrb[22].mxu0 }
 0x125   : > { %v793_v20 = vpop.f32.mrb[16].mxu1  ;;  %v1187_v29 = vpop.f32.mrb[23].mxu0 }
 0x126   : > { %v1127_v22 = vpack.c.bf16 %v876_v17, %v876_v17  ;;  %v877_v23 = vmax.f32 %v861_v18, 0.0  ;;  %v794_v24 = vadd.f32 %v1179_v5, %v793_v20  ;;  %v795_v25 = vpop.f32.mrb[17].mxu1  ;;  %v1188_v34 = vadd.f32 %v1187_v29, %v1186_v27 }
 0x127   : > { %v796_v28 = vpop.f32.mrb[18].mxu1 }
 0x128   : > { %957 = vst.msk [vmem:[%s1485_s8 + $0x18] sm:$0xf] %vm950_vm1, %v1127_v22  ;;  %v1128_v30 = vpack.c.bf16 %v877_v23, %v877_v23  ;;  %v839_v31 = vmul.f32 %v1470_v4, %v794_v24  ;;  %v797_v32 = vadd.f32 %v1182_v14, %v796_v28  ;;  %v798_v33 = vpop.f32.mrb[19].mxu1 }
 0x12a   : > { %958 = vst.msk [vmem:[%s1485_s8 + $0x1c] sm:$0xf] %vm950_vm1, %v1128_v30  ;;  %v862_v35 = vadd.f32 %v1475_v10, %v839_v31  ;;  %v840_v36 = vmul.f32 %v1470_v4, %v797_v32  ;;  %v1189_v39 = vpop.f32.mrb[24].mxu0 }
 0x12b   : > { %v1190_v41 = vpop.f32.mrb[25].mxu0 }
 0x12c   : > { %v878_v37 = vmax.f32 %v862_v35, 0.0  ;;  %v863_v38 = vadd.f32 %v1475_v10, %v840_v36  ;;  %v1191_v46 = vadd.f32 %v1190_v41, %v1189_v39  ;;  %v1192_v47 = vpop.f32.mrb[26].mxu0 }
 0x12d   : > { %v801_v40 = vpop.f32.mrb[20].mxu1  ;;  %v1193_v49 = vpop.f32.mrb[27].mxu0 }
 0x12e   : > { %v1129_v42 = vpack.c.bf16 %v878_v37, %v878_v37  ;;  %v879_v43 = vmax.f32 %v863_v38, 0.0  ;;  %v802_v44 = vadd.f32 %v1185_v26, %v801_v40  ;;  %v803_v45 = vpop.f32.mrb[21].mxu1  ;;  %v1194_v54 = vadd.f32 %v1193_v49, %v1192_v47 }
 0x12f   : > { %v804_v48 = vpop.f32.mrb[22].mxu1 }
 0x130   : > { %959 = vst.msk [vmem:[%s1485_s8 + $0x20] sm:$0xf] %vm950_vm1, %v1129_v42  ;;  %v1130_v50 = vpack.c.bf16 %v879_v43, %v879_v43  ;;  %v841_v51 = vmul.f32 %v1470_v4, %v802_v44  ;;  %v805_v52 = vadd.f32 %v1188_v34, %v804_v48  ;;  %v806_v53 = vpop.f32.mrb[23].mxu1 }
 0x132   : > { %960 = vst.msk [vmem:[%s1485_s8 + $0x24] sm:$0xf] %vm950_vm1, %v1130_v50  ;;  %v864_v55 = vadd.f32 %v1475_v10, %v841_v51  ;;  %v842_v56 = vmul.f32 %v1470_v4, %v805_v52  ;;  %v1195_v59 = vpop.f32.mrb[28].mxu0 }
 0x133   : > { %v1196_v61 = vpop.f32.mrb[29].mxu0 }
 0x134   : > { %v880_v57 = vmax.f32 %v864_v55, 0.0  ;;  %v865_v58 = vadd.f32 %v1475_v10, %v842_v56  ;;  %v1197_v2 = vadd.f32 %v1196_v61, %v1195_v59  ;;  %v1198_v3 = vpop.f32.mrb[30].mxu0 }
 0x135   : > { %v809_v60 = vpop.f32.mrb[24].mxu1  ;;  %v1199_v6 = vpop.f32.mrb[31].mxu0 }
 0x136   : > { %v1131_v62 = vpack.c.bf16 %v880_v57, %v880_v57  ;;  %v881_v63 = vmax.f32 %v865_v58, 0.0  ;;  %v810_v0 = vadd.f32 %v1191_v46, %v809_v60  ;;  %v811_v1 = vpop.f32.mrb[25].mxu1  ;;  %v1200_v12 = vadd.f32 %v1199_v6, %v1198_v3 }
 0x137   : > { %v812_v5 = vpop.f32.mrb[26].mxu1 }
 0x138   : > { %961 = vst.msk [vmem:[%s1485_s8 + $0x28] sm:$0xf] %vm950_vm1, %v1131_v62  ;;  %v1132_v7 = vpack.c.bf16 %v881_v63, %v881_v63  ;;  %v843_v8 = vmul.f32 %v1470_v4, %v810_v0  ;;  %v813_v9 = vadd.f32 %v1194_v54, %v812_v5  ;;  %v814_v11 = vpop.f32.mrb[27].mxu1 }
 0x13a   : > { %962 = vst.msk [vmem:[%s1485_s8 + $0x2c] sm:$0xf] %vm950_vm1, %v1132_v7  ;;  %v866_v13 = vadd.f32 %v1475_v10, %v843_v8  ;;  %v844_v14 = vmul.f32 %v1470_v4, %v813_v9 }
 0x13c   : > { %v882_v15 = vmax.f32 %v866_v13, 0.0  ;;  %v867_v16 = vadd.f32 %v1475_v10, %v844_v14 }
 0x13d   : > { %v817_v17 = vpop.f32.mrb[28].mxu1 }
 0x13e   : > { %v1133_v18 = vpack.c.bf16 %v882_v15, %v882_v15  ;;  %v883_v19 = vmax.f32 %v867_v16, 0.0  ;;  %v818_v20 = vadd.f32 %v1197_v2, %v817_v17  ;;  %v819_v21 = vpop.f32.mrb[29].mxu1 }
 0x13f   : > { %v820_v22 = vpop.f32.mrb[30].mxu1 }
 0x140   : > { %963 = vst.msk [vmem:[%s1485_s8 + $0x30] sm:$0xf] %vm950_vm1, %v1133_v18  ;;  %v1134_v23 = vpack.c.bf16 %v883_v19, %v883_v19  ;;  %v845_v24 = vmul.f32 %v1470_v4, %v818_v20  ;;  %v821_v25 = vadd.f32 %v1200_v12, %v820_v22  ;;  %v822_v26 = vpop.f32.mrb[31].mxu1 }
 0x142   : > { %964 = vst.msk [vmem:[%s1485_s8 + $0x34] sm:$0xf] %vm950_vm1, %v1134_v23  ;;  %v868_v27 = vadd.f32 %v1475_v10, %v845_v24  ;;  %v846_v28 = vmul.f32 %v1470_v4, %v821_v25 }
 0x144   : > { %v884_v29 = vmax.f32 %v868_v27, 0.0  ;;  %v869_v30 = vadd.f32 %v1475_v10, %v846_v28 }
 0x146   : > { %v1135_v31 = vpack.c.bf16 %v884_v29, %v884_v29  ;;  %v885_v32 = vmax.f32 %v869_v30, 0.0 }
 0x148   : > { %965 = vst.msk [vmem:[%s1485_s8 + $0x38] sm:$0xf] %vm950_vm1, %v1135_v31  ;;  %v1136_v33 = vpack.c.bf16 %v885_v32, %v885_v32 }
 0x14a   : > { %966 = vst.msk [vmem:[%s1485_s8 + $0x3c] sm:$0xf] %vm950_vm1, %v1136_v33 }
 0x14b PF: > { %s14_s15 = sadd.s32 1, %s1291_s15  }
 0x14c   : > { %p11_p4 = scmp.ge.s32.totalorder %s14_s15, 4  }
 0x14e   :  { %13 = sbr.rel (!%p11_p4) target bundleno = 1 (0x1), region = 66 }

// kernel: basenet_forward.8
= control target key start
LH: loop header
LB: loop body
LE: loop exit
PB: predicated region body
PF: predicated region fallthrough
CT: control target
= control target key end

     0   :  { %s1344_s15 = smov 0   ;;  %s1555_s0 = inlined_call_operand.vmem [shape: bf16[64,864], index: 0, kind: input, shape index: {}]   ;;  %s1556_s1 = inlined_call_operand.vmem [shape: bf16[864,64], index: 1, kind: input, shape index: {}]   ;;  %s1557_s2 = inlined_call_operand.vmem [shape: f32[1,64], index: 2, kind: input, shape index: {}]   ;;  %s1558_s3 = inlined_call_operand.vmem [shape: f32[1,64], index: 3, kind: input, shape index: {}]   ;;  %s1559_s4 = inlined_call_operand.vmem [shape: bf16[64,64], index: 4, kind: output, shape index: {}]  }
   0x1 LB: > { %s1029_s16 = sadd.s32 4294967295, %s1317_s15   ;;  %p1033_p0 = scmp.ge.s32.totalorder %s1317_s15, 1  ;;  %s1317_s15 = sphi %s1344_s15, %s14_s15  }
   0x2   : > { %p164_p1 = scmp.lt.s32.totalorder %s1317_s15, 3 }
   0x4   : > { %p165_p2 = pnand %p1033_p0, %p164_p1 }
   0x5   : > { %v1237_v0 = vld [vmem:[%s1556_s1 + $0x40] sm:$0xff] (!%p165_p2)   ;;  %v1241_v4 = vld [vmem:[%s1556_s1 + $0x48] sm:$0xff] (!%p165_p2)   ;;  %v1245_v8 = vld [vmem:[%s1556_s1 + $0x50] sm:$0xff] (!%p165_p2)   ;;  %s1034_s23 = sshll.u32 (!%p165_p2), %s1029_s16, 2  ;;  %vm723_vm0 = vcmask (!%p165_p2), 785408   ;;  %vm968_vm1 = vcmask (!%p165_p2), 519168  }
   0x6   : > { %168 = sbr.rel (%p165_p2) target bundleno = 309 (0x135), region = 36  ;;  %v1238_v1 = vld [vmem:[%s1556_s1 + $0xc0] sm:$0xff] (!%p165_p2)   ;;  %1120 = vmatprep.subr.bf16.mxu0 (!%p165_p2), %v1237_v0  ;;  %v1242_v5 = vld [vmem:[%s1556_s1 + $0xc8] sm:$0xff] (!%p165_p2)   ;;  %v1246_v9 = vld [vmem:[%s1556_s1 + $0xd0] sm:$0xff] (!%p165_p2)   ;;  %p192_p3 = scmp.lt.s32.totalorder (!%p165_p2), %s1034_s23, 7 }
   0x7   : > { %v1239_v2 = vld [vmem:[%s1556_s1] sm:$0xff] (!%p165_p2)   ;;  %1148 = vmatprep.subr.bf16.mxu1 (!%p165_p2), %v1238_v1  ;;  %v1243_v6 = vld [vmem:[%s1556_s1 + $0x8] sm:$0xff] (!%p165_p2)   ;;  %v1247_v10 = vld [vmem:[%s1556_s1 + $0x10] sm:$0xff] (!%p165_p2)  }
   0x8   : > { %v1240_v3 = vld [vmem:[%s1556_s1 + $0x80] sm:$0xff] (!%p165_p2)   ;;  %1121 = vmatpush3.bf16.msra.mxu0 (!%p165_p2), %v1239_v2  ;;  %v1244_v7 = vld [vmem:[%s1556_s1 + $0x88] sm:$0xff] (!%p165_p2)   ;;  %v1248_v11 = vld [vmem:[%s1556_s1 + $0x90] sm:$0xff] (!%p165_p2)  }
   0x9   : > { %1149 = vmatpush3.bf16.msra.mxu1 (!%p165_p2), %v1240_v3  ;;  %1122 = vmatprep.subr.bf16.mxu0 (!%p165_p2), %v1241_v4  ;;  %v1249_v12 = vld [vmem:[%s1556_s1 + $0x58] sm:$0xff] (!%p165_p2)   ;;  %v1253_v16 = vld [vmem:[%s1556_s1 + $0x60] sm:$0xff] (!%p165_p2)   ;;  %v1257_v20 = vld [vmem:[%s1556_s1 + $0x68] sm:$0xff] (!%p165_p2)  }
   0xa   : > { %1150 = vmatprep.subr.bf16.mxu1 (!%p165_p2), %v1242_v5  ;;  %v1250_v13 = vld [vmem:[%s1556_s1 + $0xd8] sm:$0xff] (!%p165_p2)   ;;  %v1254_v17 = vld [vmem:[%s1556_s1 + $0xe0] sm:$0xff] (!%p165_p2)   ;;  %v1258_v21 = vld [vmem:[%s1556_s1 + $0xe8] sm:$0xff] (!%p165_p2)  }
   0xb   : > { %v1251_v14 = vld [vmem:[%s1556_s1 + $0x18] sm:$0xff] (!%p165_p2)   ;;  %v1255_v18 = vld [vmem:[%s1556_s1 + $0x20] sm:$0xff] (!%p165_p2)   ;;  %v1259_v22 = vld [vmem:[%s1556_s1 + $0x28] sm:$0xff] (!%p165_p2)  }
   0xc   : > { %1123 = vmatpush3.bf16.msra.mxu0 (!%p165_p2), %v1243_v6  ;;  %v1252_v15 = vld [vmem:[%s1556_s1 + $0x98] sm:$0xff] (!%p165_p2)   ;;  %v1256_v19 = vld [vmem:[%s1556_s1 + $0xa0] sm:$0xff] (!%p165_p2)   ;;  %v1260_v23 = vld [vmem:[%s1556_s1 + $0xa8] sm:$0xff] (!%p165_p2)  }
   0xd   : > { %1151 = vmatpush3.bf16.msra.mxu1 %v1244_v7  ;;  %1124 = vmatprep.subr.bf16.mxu0 %v1245_v8  ;;  %s1561_s23 = smov (!%p192_p3, %s1034_s23), 7  ;;  %v1261_v24 = vld [vmem:[%s1556_s1 + $0x70] sm:$0xff]   ;;  %v1265_v28 = vld [vmem:[%s1556_s1 + $0x78] sm:$0xff]   ;;  %v1275_v36 = vld [vmem:[%s1556_s1 + $0x140] sm:$0xff]  }
   0xe   : > { %1152 = vmatprep.subr.bf16.mxu1 %v1246_v9  ;;  %v1262_v25 = vld [vmem:[%s1556_s1 + $0xf0] sm:$0xff]   ;;  %s1228_s21 = smul.u32 28, %s1561_s23  ;;  %v1266_v29 = vld [vmem:[%s1556_s1 + $0xf8] sm:$0xff]   ;;  %v1276_v37 = vld [vmem:[%s1556_s1 + $0x100] sm:$0xff]   ;;  %s1037_s12 = sshll.u32 %s1561_s23, 2 }
   0xf   : > { %v1263_v26 = vld [vmem:[%s1556_s1 + $0x30] sm:$0xff]   ;;  %v1267_v30 = vld [vmem:[%s1556_s1 + $0x38] sm:$0xff]   ;;  %v1277_v38 = vld [vmem:[%s1556_s1 + $0x148] sm:$0xff]   ;;  %s202_s17 = scalar_lea.vmem %s1559_s4, %s1037_s12 }
  0x10   : > { %1125 = vmatpush3.bf16.msra.mxu0 %v1247_v10  ;;  %v1264_v27 = vld [vmem:[%s1556_s1 + $0xb0] sm:$0xff]   ;;  %s1450_s6 = scalar_lea.vmem %s1555_s0, %s1228_s21  ;;  %v1268_v31 = vld [vmem:[%s1556_s1 + $0xb8] sm:$0xff]   ;;  %v1278_v39 = vld [vmem:[%s1556_s1 + $0x108] sm:$0xff]  }
  0x11   : > { %1153 = vmatpush3.bf16.msra.mxu1 %v1248_v11  ;;  %1126 = vmatprep.subr.bf16.mxu0 %v1249_v12  ;;  %v1269_v32 = vld [vmem:[%s1450_s6] ss:$28 sps:$4 sm:$0xff]   ;;  %v1272_v34 = vld [vmem:[%s1450_s6 + $0x8] ss:$28 sps:$4 sm:$0xff]   ;;  %v1279_v40 = vld [vmem:[%s1556_s1 + $0x150] sm:$0xff]  }
  0x12   : > { %1154 = vmatprep.subr.bf16.mxu1 %v1250_v13  ;;  %v1271_v33 = vld [vmem:[%s1450_s6 + $0x4] ss:$28 sps:$4 sm:$0xff]   ;;  %v1274_v35 = vld [vmem:[%s1450_s6 + $0xc] ss:$28 sps:$4 sm:$0xff]   ;;  %v1280_v41 = vld [vmem:[%s1556_s1 + $0x110] sm:$0xff]  }
  0x13   : > { %762 = vmatprep.mubr.bf16.mxu0 %v1271_v33  ;;  %811 = vmatprep.mubr.bf16.mxu1 %v1274_v35  ;;  %v1282_v42 = vld [vmem:[%s1556_s1 + $0x180] sm:$0xff]   ;;  %v1281_v43 = vld [vmem:[%s1556_s1 + $0x158] sm:$0xff]   ;;  %v1285_v45 = vld [vmem:[%s1556_s1 + $0x188] sm:$0xff]  }
  0x14   : > { %1127 = vmatpush3.bf16.msra.mxu0 %v1251_v14  ;;  %v1283_v44 = vld [vmem:[%s1556_s1 + $0x118] sm:$0xff]   ;;  %v1284_v46 = vld [vmem:[%s1556_s1 + $0x160] sm:$0xff]   ;;  %v1291_v50 = vld [vmem:[%s1556_s1 + $0x168] sm:$0xff]  }
  0x15   : > { %1155 = vmatpush3.bf16.msra.mxu1 %v1252_v15  ;;  %1128 = vmatprep.subr.bf16.mxu0 %v1253_v16  ;;  %v1287_v47 = vld [vmem:[%s1450_s6 + $0x3c] ss:$28 sps:$4 sm:$0xff]   ;;  %v1286_v48 = vld [vmem:[%s1556_s1 + $0x120] sm:$0xff]   ;;  %v1292_v51 = vld [vmem:[%s1556_s1 + $0x190] sm:$0xff]  }
  0x16   : > { %1156 = vmatprep.subr.bf16.mxu1 %v1254_v17  ;;  %v1289_v49 = vld [vmem:[%s1450_s6 + $0x44] ss:$28 sps:$4 sm:$0xff]   ;;  %v1293_v52 = vld [vmem:[%s1450_s6 + $0x38] ss:$28 sps:$4 sm:$0xff]   ;;  %v1295_v54 = vld [vmem:[%s1556_s1 + $0x128] sm:$0xff]  }
  0x17   : > { %v1294_v53 = vld [vmem:[%s1450_s6 + $0x40] ss:$28 sps:$4 sm:$0xff]   ;;  %v1296_v56 = vld [vmem:[%s1556_s1 + $0x170] sm:$0xff]   ;;  %v1305_v61 = vld [vmem:[%s1556_s1 + $0x1a8] sm:$0xff]  }
  0x18   : > { %1129 = vmatpush3.bf16.msra.mxu0 %v1255_v18  ;;  %v1297_v55 = vld [vmem:[%s1556_s1 + $0x198] sm:$0xff]   ;;  %v1300_v57 = vld [vmem:[%s1556_s1 + $0x1a0] sm:$0xff]   ;;  %v1298_v58 = vld [vmem:[%s1556_s1 + $0x130] sm:$0xff]  }
  0x19   : > { %1157 = vmatpush3.bf16.msra.mxu1 %v1256_v19  ;;  %1130 = vmatprep.subr.bf16.mxu0 %v1257_v20  ;;  %v1299_v59 = vld [vmem:[%s1556_s1 + $0x178] sm:$0xff]   ;;  %v1304_v60 = vld [vmem:[%s1450_s6 + $0x14] ss:$28 sps:$4 sm:$0xff]   ;;  %v1308_v2 = vld [vmem:[%s1450_s6 + $0x4c] ss:$28 sps:$4 sm:$0xff]  }
  0x1a   : > { %1158 = vmatprep.subr.bf16.mxu1 %v1258_v21  ;;  %v1306_v62 = vld [vmem:[%s1450_s6 + $0x18] ss:$28 sps:$4 sm:$0xff]   ;;  %v1302_v0 = vld [vmem:[%s1450_s6 + $0x10] ss:$28 sps:$4 sm:$0xff]   ;;  %v1310_v3 = vld [vmem:[%s1450_s6 + $0x48] ss:$28 sps:$4 sm:$0xff]  }
  0x1b   : > { %v1301_v63 = vld [vmem:[%s1556_s1 + $0x138] sm:$0xff]   ;;  %v1307_v1 = vld [vmem:[%s1450_s6 + $0x50] ss:$28 sps:$4 sm:$0xff]  }
  0x1c   : > { %1131 = vmatpush3.bf16.msra.mxu0 %v1259_v22 }
  0x1d   : > { %1159 = vmatpush3.bf16.msra.mxu1 %v1260_v23  ;;  %1132 = vmatprep.subr.bf16.mxu0 %v1261_v24 }
  0x1e   : > { %1160 = vmatprep.subr.bf16.mxu1 %v1262_v25 }
  0x20   : > { %1133 = vmatpush3.bf16.msra.mxu0 %v1263_v26 }
  0x21   : > { %1161 = vmatpush3.bf16.msra.mxu1 %v1264_v27  ;;  %1134 = vmatprep.subr.bf16.mxu0 %v1265_v28 }
  0x22   : > { %1162 = vmatprep.subr.bf16.mxu1 %v1266_v29 }
  0x24   : > { %1135 = vmatpush3.bf16.msra.mxu0 %v1267_v30 }
  0x25   : > { %1163 = vmatpush3.bf16.msra.mxu1 %v1268_v31  ;;  %1176 = vmatprep.subr.bf16.mxu0 %v1275_v36 }
  0x26   : > { %1212 = vmatprep.subr.bf16.mxu1 %v1282_v42 }
  0x27   : > { %763 = vmatmul.mubr.bf16.vlgmr.msra.gmra.mrb[0].mxu0 %v1269_v32 }
  0x28   : > { %812 = vmatmul.mubr.bf16.vlgmr.msra.gmra.mrb[0].mxu1 %v1272_v34  ;;  %1177 = vmatpush3.bf16.msra.mxu0 %v1276_v37 }
  0x29   : > { %1178 = vmatprep.subr.bf16.mxu0 %v1277_v38  ;;  %1213 = vmatpush3.bf16.msra.mxu1 %v1282_v42 }
  0x2a   : > { %1214 = vmatprep.subr.bf16.mxu1 %v1285_v45  ;;  %770 = vmatprep.mubr.bf16.mxu0 %v1287_v47 }
  0x2b   : > { %819 = vmatprep.mubr.bf16.mxu1 %v1289_v49 }
  0x2c   : > { %1179 = vmatpush3.bf16.msra.mxu0 %v1278_v39 }
  0x2d   : > { %1180 = vmatprep.subr.bf16.mxu0 %v1279_v40  ;;  %1215 = vmatpush3.bf16.msra.mxu1 %v1285_v45 }
  0x2e   : > { %1216 = vmatprep.subr.bf16.mxu1 %v1292_v51 }
  0x2f   : > { %771 = vmatmul.mubr.bf16.gmra.mrb[4].mxu0 %v1293_v52 }
  0x30   : > { %1181 = vmatpush3.bf16.msra.mxu0 %v1280_v41  ;;  %820 = vmatmul.mubr.bf16.gmra.mrb[4].mxu1 %v1294_v53 }
  0x31   : > { %1182 = vmatprep.subr.bf16.mxu0 %v1281_v43  ;;  %1217 = vmatpush3.bf16.msra.mxu1 %v1292_v51  ;;  %v1108_v43 = vld [vmem:[%s1557_s2] ss:$0 sm:$0xff] }
  0x32   : > { %1218 = vmatprep.subr.bf16.mxu1 %v1297_v55  ;;  %860 = vmatprep.mubr.bf16.mxu0 %v1304_v60 }
  0x33   : > { %1224 = vmatprep.mubr.msk.bf16.mxu1 %vm723_vm0, %v1306_v62 }
  0x34   : > { %1183 = vmatpush3.bf16.msra.mxu0 %v1283_v44 }
  0x35   : > { %1184 = vmatprep.subr.bf16.mxu0 %v1284_v46  ;;  %1219 = vmatpush3.bf16.msra.mxu1 %v1297_v55  ;;  %v1109_v46 = vld [vmem:[%s1558_s3] ss:$0 sm:$0xff] }
  0x36   : > { %1220 = vmatprep.subr.bf16.mxu1 %v1300_v57 }
  0x38   : > { %1185 = vmatpush3.bf16.msra.mxu0 %v1286_v48 }
  0x39   : > { %1186 = vmatprep.subr.bf16.mxu0 %v1291_v50  ;;  %1221 = vmatpush3.bf16.msra.mxu1 %v1300_v57 }
  0x3a   : > { %1222 = vmatprep.subr.bf16.mxu1 %v1305_v61 }
  0x3c   : > { %1187 = vmatpush3.bf16.msra.mxu0 %v1295_v54 }
  0x3d   : > { %1188 = vmatprep.subr.bf16.mxu0 %v1296_v56  ;;  %1223 = vmatpush3.bf16.msra.mxu1 %v1305_v61 }
  0x40   : > { %1189 = vmatpush3.bf16.msra.mxu0 %v1298_v58  ;;  %1225 = vmatmul.mubr.msk.bf16.vlgmr.msra.gmra.mrb[8].mxu1 %vm723_vm0, %v1307_v1 }
  0x41   : > { %1190 = vmatprep.subr.bf16.mxu0 %v1299_v59 }
  0x44   : > { %1191 = vmatpush3.bf16.msra.mxu0 %v1301_v63 }
  0x47   : > { %861 = vmatmul.mubr.bf16.vlgmr.msra.gmra.mrb[8].mxu0 %v1302_v0 }
  0x48   : > { %868 = vmatprep.mubr.bf16.mxu0 %v1308_v2 }
  0x4f   : > { %869 = vmatmul.mubr.bf16.gmra.mrb[12].mxu0 %v1310_v3 }
  0xfa   : > { %v1136_v4 = vpop.f32.mrb[0].mxu0 }
  0xfb   : > { %v1164_v5 = vpop.f32.mrb[0].mxu1  ;;  %v1137_v6 = vpop.f32.mrb[1].mxu0 }
  0xfc   : > { %v1138_v7 = vadd.f32 %v1137_v6, %v1136_v4  ;;  %v1165_v8 = vpop.f32.mrb[1].mxu1  ;;  %v1139_v9 = vpop.f32.mrb[2].mxu0 }
  0xfd   : > { %v1166_v10 = vadd.f32 %v1165_v8, %v1164_v5  ;;  %v1167_v11 = vpop.f32.mrb[2].mxu1  ;;  %v1140_v12 = vpop.f32.mrb[3].mxu0 }
  0xfe   : > { %v1141_v13 = vadd.f32 %v1140_v12, %v1139_v9  ;;  %v1168_v14 = vpop.f32.mrb[3].mxu1 }
  0xff   : > { %v814_v15 = vadd.f32 %v1166_v10, %v1138_v7  ;;  %v1169_v16 = vadd.f32 %v1168_v14, %v1167_v11 }
 0x101   : > { %v817_v17 = vadd.f32 %v1169_v16, %v1141_v13 }
 0x102   : > { %v1142_v18 = vpop.f32.mrb[4].mxu0 }
 0x103   : > { %v1170_v19 = vpop.f32.mrb[4].mxu1  ;;  %v1143_v20 = vpop.f32.mrb[5].mxu0 }
 0x104   : > { %v1144_v21 = vadd.f32 %v1143_v20, %v1142_v18  ;;  %v1171_v22 = vpop.f32.mrb[5].mxu1  ;;  %v1145_v23 = vpop.f32.mrb[6].mxu0 }
 0x105   : > { %v1172_v24 = vadd.f32 %v1171_v22, %v1170_v19  ;;  %v1173_v25 = vpop.f32.mrb[6].mxu1  ;;  %v1146_v26 = vpop.f32.mrb[7].mxu0 }
 0x106   : > { %v1147_v27 = vadd.f32 %v1146_v26, %v1145_v23  ;;  %v1174_v28 = vpop.f32.mrb[7].mxu1 }
 0x107   : > { %v822_v29 = vadd.f32 %v1172_v24, %v1144_v21  ;;  %v1175_v30 = vadd.f32 %v1174_v28, %v1173_v25 }
 0x109   : > { %v825_v31 = vadd.f32 %v1175_v30, %v1147_v27 }
 0x113   : > { %v1226_v33 = vpop.f32.mrb[8].mxu1 }
 0x114   : > { %v911_v35 = vpop.f32.mrb[9].mxu1 }
 0x115   : > { %v1227_v38 = vpop.f32.mrb[10].mxu1 }
 0x116   : > { %v914_v40 = vpop.f32.mrb[11].mxu1 }
 0x11a   : > { %v1192_v32 = vpop.f32.mrb[8].mxu0 }
 0x11b   : > { %v1193_v34 = vpop.f32.mrb[9].mxu0 }
 0x11c   : > { %v1194_v36 = vadd.f32 %v1193_v34, %v1192_v32  ;;  %v1195_v37 = vpop.f32.mrb[10].mxu0 }
 0x11d   : > { %v1196_v39 = vpop.f32.mrb[11].mxu0 }
 0x11e   : > { %v1197_v41 = vadd.f32 %v1196_v39, %v1195_v37  ;;  %v863_v42 = vadd.f32 %v1194_v36, %v814_v15 }
 0x120   : > { %v912_v44 = vadd.f32 %v911_v35, %v863_v42  ;;  %v866_v45 = vadd.f32 %v1197_v41, %v817_v17 }
 0x122   : > { %v933_v47 = vmul.f32 %v1108_v43, %v912_v44  ;;  %v915_v48 = vadd.f32 %v914_v40, %v866_v45  ;;  %v1198_v49 = vpop.f32.mrb[12].mxu0 }
 0x123   : > { %v1199_v50 = vpop.f32.mrb[13].mxu0 }
 0x124   : > { %v944_v51 = vadd.f32 %v1109_v46, %v933_v47  ;;  %v934_v52 = vmul.f32 %v1108_v43, %v915_v48  ;;  %v1200_v53 = vadd.f32 %v1199_v50, %v1198_v49  ;;  %v1201_v54 = vpop.f32.mrb[14].mxu0 }
 0x125   : > { %v1202_v55 = vpop.f32.mrb[15].mxu0 }
 0x126   : > { %v948_v56 = vmax.f32 %v944_v51, 0.0  ;;  %v945_v57 = vadd.f32 %v1109_v46, %v934_v52  ;;  %v871_v58 = vadd.f32 %v1200_v53, %v822_v29  ;;  %v1203_v59 = vadd.f32 %v1202_v55, %v1201_v54 }
 0x128   : > { %v1116_v60 = vpack.c.bf16 %v948_v56, %v948_v56  ;;  %v949_v61 = vmax.f32 %v945_v57, 0.0  ;;  %v920_v62 = vadd.f32 %v1226_v33, %v871_v58  ;;  %v874_v63 = vadd.f32 %v1203_v59, %v825_v31 }
 0x12a   : > { %969 = vst.msk [vmem:[%s202_s17] sm:$0xf] %vm968_vm1, %v1116_v60  ;;  %v1117_v0 = vpack.c.bf16 %v949_v61, %v949_v61  ;;  %v935_v1 = vmul.f32 %v1108_v43, %v920_v62  ;;  %v923_v2 = vadd.f32 %v1227_v38, %v874_v63 }
 0x12c   : > { %970 = vst.msk [vmem:[%s202_s17 + $0x4] sm:$0xf] %vm968_vm1, %v1117_v0  ;;  %v946_v3 = vadd.f32 %v1109_v46, %v935_v1  ;;  %v936_v4 = vmul.f32 %v1108_v43, %v923_v2 }
 0x12e   : > { %v950_v5 = vmax.f32 %v946_v3, 0.0  ;;  %v947_v6 = vadd.f32 %v1109_v46, %v936_v4 }
 0x130   : > { %v1118_v7 = vpack.c.bf16 %v950_v5, %v950_v5  ;;  %v951_v8 = vmax.f32 %v947_v6, 0.0 }
 0x132   : > { %971 = vst.msk [vmem:[%s202_s17 + $0x8] sm:$0xf] %vm968_vm1, %v1118_v7  ;;  %v1119_v9 = vpack.c.bf16 %v951_v8, %v951_v8 }
 0x134   : > { %972 = vst.msk [vmem:[%s202_s17 + $0xc] sm:$0xf] %vm968_vm1, %v1119_v9 }
 0x135 PF: > { %s14_s15 = sadd.s32 1, %s1317_s15  }
 0x136   : > { %p11_p4 = scmp.ge.s32.totalorder %s14_s15, 4  }
 0x138   :  { %13 = sbr.rel (!%p11_p4) target bundleno = 1 (0x1), region = 66 }

// kernel: basenet_forward.9
= control target key start
LH: loop header
LB: loop body
LE: loop exit
PB: predicated region body
PF: predicated region fallthrough
CT: control target
= control target key end

     0   :  { %s548_s19 = smov 0   ;;  %s584_s0 = inlined_call_operand.vmem [shape: bf16[64,54], index: 0, kind: input, shape index: {}]   ;;  %s585_s1 = inlined_call_operand.vmem [shape: bf16[54,1], index: 1, kind: input, shape index: {}]   ;;  %s586_s2 = inlined_call_operand.<no memory space> [shape: f32[1,1], index: 2, kind: input, shape index: {}]   ;;  %s587_s4 = inlined_call_operand.vmem [shape: bf16[64,1], index: 4, kind: output, shape index: {}]   ;;  %s588_s3 = inlined_call_operand.<no memory space> [shape: f32[1,1], index: 3, kind: input, shape index: {}]  }
   0x1   :  { %v9_v0 = vstv %s586_s2  ;;  %v11_v1 = vstv %s588_s3 }
   0x2   :  { %10 = vst [vmem:[#allocation2] sm:$0x1] %v9_v0  ;;  %12 = vst [vmem:[#allocation3] sm:$0x1] %v11_v1 }
   0x3 LB: > { %s431_s20 = sadd.s32 4294967295, %s515_s19   ;;  %p435_p0 = scmp.ge.s32.totalorder %s515_s19, 1  ;;  %s515_s19 = sphi %s548_s19, %s18_s19  }
   0x4   : > { %p167_p1 = scmp.lt.s32.totalorder %s515_s19, 3 }
   0x6   : > { %p168_p2 = pnand %p435_p0, %p167_p1 }
   0x7   : > { %v487_v2 = vld [vmem:[%s585_s1] sm:$0xff] (!%p168_p2)   ;;  %v488_v3 = vld [vmem:[%s585_s1 + $0x8] sm:$0xff] (!%p168_p2)   ;;  %s436_s23 = sshll.u32 (!%p168_p2), %s431_s20, 2  ;;  %v489_v4 = vld [vmem:[%s585_s1 + $0x10] sm:$0xff] (!%p168_p2)   ;;  %vm248_vm0 = vcmask (!%p168_p2), 441344   ;;  %vm255_vm1 = vcmask (!%p168_p2), 1042432  }
   0x8   : > { %171 = sbr.rel (%p168_p2) target bundleno = 274 (0x112), region = 36  ;;  %466 = vmatprep.subr.bf16.mxu0 (!%p168_p2), %v487_v2  ;;  %p194_p3 = scmp.lt.s32.totalorder (!%p168_p2), %s436_s23, 7  ;;  %v490_v5 = vld [vmem:[%s585_s1 + $0x18] ss:$0 sps:$4 sm:$0x77] (!%p168_p2)   ;;  %vm370_vm2 = vcmask (!%p168_p2), 3072  }
   0x9   : > { %467 = vmatpush3.bf16.msra.mxu0 (!%p168_p2), %v487_v2  ;;  %v257_v7 = vsel (!%p168_p2), %vm255_vm1, %v490_v5, 0  ;;  %v448_v9 = vld [vmem:[#allocation2] ss:$0 sm:$0xff] (!%p168_p2)  ;;  %v449_v11 = vld [vmem:[#allocation3] ss:$0 sm:$0xff] (!%p168_p2) }
   0xa   : > { %468 = vmatprep.subr.bf16.mxu0 (!%p168_p2), %v488_v3 }
   0xd   : > { %469 = vmatpush3.bf16.msra.mxu0 (!%p168_p2), %v488_v3 }
   0xe   : > { %470 = vmatprep.subr.bf16.mxu0 (!%p168_p2), %v489_v4 }
   0xf   : > { %s590_s23 = smov (!%p194_p3, %s436_s23), 7 }
  0x10   : > { %s437_s26 = sshll.u32 %s590_s23, 2 }
  0x11   : > { %s197_s5 = scalar_lea.vmem %s584_s0, %s437_s26  ;;  %471 = vmatpush3.bf16.msra.mxu0 %v489_v4  ;;  %s203_s8 = scalar_lea.vmem %s587_s4, %s437_s26 }
  0x12   : > { %v491_v6 = vld [vmem:[%s197_s5] sm:$0xff]   ;;  %478 = vmatprep.subr.msk.bf16.mxu0 %vm255_vm1, %v490_v5  ;;  %v492_v8 = vld [vmem:[%s197_s5 + $0x8] sm:$0xff]  }
  0x13   : > { %474 = vmatprep.mubr.msk.bf16.mxu0 %vm248_vm0, %v491_v6 }
  0x15   : > { %473 = vmatpush3.bf16.msra.mxu0 %v257_v7 }
  0x18   : > { %475 = vmatmul.mubr.msk.bf16.vlgmr.msra.gmra.mrb[0].mxu0 %vm248_vm0, %v492_v8 }
  0xeb   : > { %v476_v10 = vpop.f32.mrb[0].mxu0 }
  0xec   : > { %v317_v12 = vmul.f32 %v476_v10, %v448_v9  ;;  %v293_v13 = vpop.f32.mrb[1].mxu0 }
  0xed   : > { %v315_v14 = vmul.f32 %v448_v9, %v293_v13  ;;  %v477_v15 = vpop.f32.mrb[2].mxu0 }
  0xee   : > { %v328_v16 = vadd.f32 %v449_v11, %v317_v12  ;;  %v318_v17 = vmul.f32 %v477_v15, %v448_v9  ;;  %v296_v18 = vpop.f32.mrb[3].mxu0 }
  0xef   : > { %v326_v19 = vadd.f32 %v449_v11, %v315_v14  ;;  %v316_v20 = vmul.f32 %v448_v9, %v296_v18 }
  0xf0   : > { %v332_v21 = vsub.f32 0.0, %v328_v16  ;;  %v329_v22 = vadd.f32 %v449_v11, %v318_v17 }
  0xf1   : > { %v330_v23 = vsub.f32 0.0, %v326_v19  ;;  %v327_v24 = vadd.f32 %v449_v11, %v316_v20 }
  0xf2   : > { %v338_v25 = vmul.f32 1.442695, %v332_v21  ;;  %v333_v26 = vsub.f32 0.0, %v329_v22 }
  0xf3   : > { %v334_v27 = vmul.f32 1.442695, %v330_v23  ;;  %v331_v28 = vsub.f32 0.0, %v327_v24 }
  0xf4   : > { %493 = vpow2.f32 %v338_v25  ;;  %v340_v29 = vmul.f32 1.442695, %v333_v26 }
  0xf5   : > { %495 = vpow2.f32 %v334_v27  ;;  %v336_v30 = vmul.f32 1.442695, %v331_v28 }
  0xf6   : > { %497 = vpow2.f32 %v340_v29 }
  0xf7   : > { %499 = vpow2.f32 %v336_v30 }
  0xfe   : > { %v494_v31 = vpop.eup %493 }
  0xff   : > { %v496_v32 = vpop.eup %495  ;;  %v344_v33 = vadd.f32 1.0, %v494_v31 }
 0x100   : > { %v498_v34 = vpop.eup %497  ;;  %v342_v35 = vadd.f32 1.0, %v496_v32 }
 0x101   : > { %v500_v36 = vpop.eup %499  ;;  %501 = vrcp.f32 %v344_v33  ;;  %v345_v37 = vadd.f32 1.0, %v498_v34 }
 0x102   : > { %503 = vrcp.f32 %v342_v35  ;;  %v343_v38 = vadd.f32 1.0, %v500_v36 }
 0x103   : > { %505 = vrcp.f32 %v345_v37 }
 0x104   : > { %507 = vrcp.f32 %v343_v38 }
 0x10b   : > { %v502_v39 = vpop.eup %501 }
 0x10c   : > { %v504_v40 = vpop.eup %503  ;;  %v458_v45 = vpack.c.bf16 %v502_v39, %v502_v39 }
 0x10d   : > { %v506_v41 = vpop.eup %505  ;;  %v456_v42 = vpack.c.bf16 %v504_v40, %v504_v40 }
 0x10e   : > { %v508_v43 = vpop.eup %507  ;;  %v459_v46 = vpack.c.bf16 %v506_v41, %v506_v41  ;;  %373 = vst.msk [vmem:[%s203_s8 + $0x8] sm:$0xf] %vm370_vm2, %v458_v45 }
 0x10f   : > { %371 = vst.msk [vmem:[%s203_s8] sm:$0xf] %vm370_vm2, %v456_v42  ;;  %v457_v44 = vpack.c.bf16 %v508_v43, %v508_v43 }
 0x110   : > { %374 = vst.msk [vmem:[%s203_s8 + $0xc] sm:$0xf] %vm370_vm2, %v459_v46 }
 0x111   : > { %372 = vst.msk [vmem:[%s203_s8 + $0x4] sm:$0xf] %vm370_vm2, %v457_v44 }
 0x112 PF: > { %s18_s19 = sadd.s32 1, %s515_s19  }
 0x113   : > { %p15_p4 = scmp.ge.s32.totalorder %s18_s19, 4  }
 0x115   :  { %17 = sbr.rel (!%p15_p4) target bundleno = 3 (0x3), region = 66 }

</bundles_post_ra>
